<compile_context>
chip_gen: v7x
topology: tpu7x:2x2x1
jax: 0.10.0
libtpu: 0.0.40
codegen_flags: <defaults>
</compile_context>

<pallas_src>
import functools

import jax
import jax.numpy as jnp
from jax.experimental import pallas as pl
from jax.experimental.pallas import tpu as pltpu

# ---------------------------------------------------------------------------
# Model dimensions.
# ---------------------------------------------------------------------------
B = 2               # batch
H = W = 16          # input spatial
CIN = 1             # module replaces the first conv with a 1-channel conv
STEM_OUT = 32       # EfficientNet-B2 stem channels
KSIZE = 3
STRIDE = 2
PAD = 1
OH = (H + 2 * PAD - KSIZE) // STRIDE + 1    # 8
OW = (W + 2 * PAD - KSIZE) // STRIDE + 1    # 8
S = OH * OW                                 # 64 spatial positions after stem
M = B * S                                   # 128 im2col rows (lane/sublane friendly)
K_RAW = CIN * KSIZE * KSIZE                 # 9
K_PAD = 128                                 # lane-padded stem GEMM K

FEAT = 1408         # backbone output features (classifier = Identity)
HID = 128           # hidden width of each head
N_PATH, N_REGION, N_DEPTH = 2, 3, 2
HID_CAT = 3 * HID                           # 384 (concatenated head hiddens)
OUT_PAD = 128                               # lane-dense padded logits width
PATH_OFF = 0
REGION_OFF = N_PATH                         # 2
DEPTH_OFF = N_PATH + N_REGION               # 5


# ---------------------------------------------------------------------------
# The single fused Pallas kernel.
# ---------------------------------------------------------------------------
def fused_forward_kernel(patches_ref, stem_w_ref, stem_s_ref, stem_b_ref,
                         head_w_ref, head_s_ref, head_b_ref,
                         pool_ref, w1_ref, b1_ref, w2_ref, b2_ref,
                         out_ref):
    # --- stem conv (im2col matmul) + folded BN + SiLU -> (M, 32), VMEM only.
    z = jnp.dot(patches_ref[...], stem_w_ref[...],
                preferred_element_type=jnp.float32)
    z = z * stem_s_ref[...] + stem_b_ref[...]
    z = z * jax.nn.sigmoid(z)                                   # SiLU

    # TODO(synk): EfficientNet-B2 MBConv stages (features[1..7]) not reproduced.

    # --- 1x1 conv to 1408 features + folded BN + SiLU.
    # One dense (128,32)@(32,1408) MXU stream (bf16 inputs, f32 accumulate).
    f = jnp.dot(z.astype(jnp.bfloat16), head_w_ref[...],
                preferred_element_type=jnp.float32)             # (M, FEAT) f32
    f = f * head_s_ref[...] + head_b_ref[...]
    f = f * jax.nn.sigmoid(f)                                   # SiLU

    # --- global average pool as an MXU matmul with a (B, M) 1/S selector
    # (keeps the cross-sublane reduction off the XLU).
    feat = jnp.dot(pool_ref[...], f,
                   preferred_element_type=jnp.float32)          # (B, FEAT)

    # --- three task heads fused: Dropout(id) -> Linear -> ReLU -> Dropout(id)
    # -> Linear, with the three w1's concatenated and the three w2's placed
    # block-diagonally into a lane-padded (HID_CAT, OUT_PAD) matrix.
    h = jnp.dot(feat.astype(jnp.bfloat16), w1_ref[...],
                preferred_element_type=jnp.float32) + b1_ref[...]
    h = jnp.maximum(h, 0.0)                                     # ReLU, (B, 384)
    out = jnp.dot(h, w2_ref[...],
                  preferred_element_type=jnp.float32) + b2_ref[...]
    out_ref[...] = out                                          # (B, 128) lane-dense


def _full_spec(shape):
    nd = len(shape)
    return pl.BlockSpec(shape, lambda i, _nd=nd: (0,) * _nd)


def fused_forward(patches, p):
    ins = (patches, p['stem_w'], p['stem_scale'], p['stem_bias'],
           p['head_w'], p['head_scale'], p['head_bias'],
           p['pool_sel'], p['w1cat'], p['b1cat'], p['w2pad'], p['b2pad'])
    return pl.pallas_call(
        fused_forward_kernel,
        out_shape=jax.ShapeDtypeStruct((B, OUT_PAD), jnp.float32),
        grid=(1,),
        in_specs=[_full_spec(a.shape) for a in ins],
        out_specs=_full_spec((B, OUT_PAD)),
        compiler_params=pltpu.CompilerParams(
            dimension_semantics=("arbitrary",),
            vmem_limit_bytes=16 * 1024 * 1024),
    )(*ins)


# ---------------------------------------------------------------------------
# Parameter initialization (deterministic, synthetic).
# ---------------------------------------------------------------------------
def fold_bn(gamma, beta, mean, var, eps=1e-5):
    scale = gamma / jnp.sqrt(var + eps)
    bias = beta - mean * scale
    return scale[None, :], bias[None, :]


def init_params(key):
    ks = jax.random.split(key, 16)

    # --- stem conv: start from a (32, 3, 3, 3) weight and average over the
    # input-channel dim, exactly like the module's 1-channel surgery.
    w3 = jax.random.normal(ks[0], (STEM_OUT, 3, KSIZE, KSIZE), jnp.float32) * 0.1
    w1ch = jnp.mean(w3, axis=1, keepdims=True)                 # (32, 1, 3, 3)
    stem_w = w1ch.reshape(STEM_OUT, K_RAW).T                   # (9, 32)
    stem_w = jnp.pad(stem_w, ((0, K_PAD - K_RAW), (0, 0)))     # (128, 32) lane-pad K
    stem_scale, stem_bias = fold_bn(
        gamma=1.0 + 0.05 * jax.random.normal(ks[1], (STEM_OUT,), jnp.float32),
        beta=0.05 * jax.random.normal(ks[2], (STEM_OUT,), jnp.float32),
        mean=0.05 * jax.random.normal(ks[3], (STEM_OUT,), jnp.float32),
        var=0.5 + jax.random.uniform(ks[4], (STEM_OUT,), jnp.float32))

    # --- surrogate head conv (1x1) to 1408 features + folded BN (bf16 weight,
    # f32 scale/bias epilogue).
    head_w = (jax.random.normal(ks[5], (STEM_OUT, FEAT), jnp.float32) * 0.05
              ).astype(jnp.bfloat16)
    head_scale, head_bias = fold_bn(
        gamma=1.0 + 0.05 * jax.random.normal(ks[6], (FEAT,), jnp.float32),
        beta=0.05 * jax.random.normal(ks[7], (FEAT,), jnp.float32),
        mean=0.05 * jax.random.normal(ks[8], (FEAT,), jnp.float32),
        var=0.5 + jax.random.uniform(ks[9], (FEAT,), jnp.float32))

    # --- global-average-pool selector: (B, B*S), row b has 1/S over its S rows.
    pool_sel = jnp.repeat(jnp.eye(B, dtype=jnp.float32), S, axis=1) / float(S)

    def make_head(k, n_out):
        k1, k2, k3, k4 = jax.random.split(k, 4)
        w1 = jax.random.normal(k1, (FEAT, HID), jnp.float32) * 0.02
        b1 = 0.01 * jax.random.normal(k2, (1, HID), jnp.float32)
        w2 = jax.random.normal(k3, (HID, n_out), jnp.float32) * 0.05
        b2 = 0.01 * jax.random.normal(k4, (1, n_out), jnp.float32)
        return w1, b1, w2, b2

    w1p, b1p, w2p, b2p = make_head(ks[10], N_PATH)
    w1r, b1r, w2r, b2r = make_head(ks[11], N_REGION)
    w1d, b1d, w2d, b2d = make_head(ks[12], N_DEPTH)

    # Fuse the three heads: concatenated first layer, block-diagonal second
    # layer written into a lane-padded (HID_CAT, OUT_PAD) matrix.
    w1cat = jnp.concatenate([w1p, w1r, w1d], axis=1).astype(jnp.bfloat16)  # (1408, 384)
    b1cat = jnp.concatenate([b1p, b1r, b1d], axis=1)                        # (1, 384)

    w2pad = jnp.zeros((HID_CAT, OUT_PAD), jnp.float32)
    w2pad = w2pad.at[0:HID, PATH_OFF:PATH_OFF + N_PATH].set(w2p)
    w2pad = w2pad.at[HID:2 * HID, REGION_OFF:REGION_OFF + N_REGION].set(w2r)
    w2pad = w2pad.at[2 * HID:3 * HID, DEPTH_OFF:DEPTH_OFF + N_DEPTH].set(w2d)

    b2pad = jnp.zeros((1, OUT_PAD), jnp.float32)
    b2pad = b2pad.at[:, PATH_OFF:PATH_OFF + N_PATH].set(b2p)
    b2pad = b2pad.at[:, REGION_OFF:REGION_OFF + N_REGION].set(b2r)
    b2pad = b2pad.at[:, DEPTH_OFF:DEPTH_OFF + N_DEPTH].set(b2d)

    return dict(
        stem_w=stem_w, stem_scale=stem_scale, stem_bias=stem_bias,
        head_w=head_w, head_scale=head_scale, head_bias=head_bias,
        pool_sel=pool_sel,
        w1cat=w1cat, b1cat=b1cat, w2pad=w2pad, b2pad=b2pad,
    )


# ---------------------------------------------------------------------------
# Forward pass.
# ---------------------------------------------------------------------------
def multitask_forward(x_nchw, params):
    # layout: NCHW -> NHWC for the TPU kernel.
    x = jnp.transpose(x_nchw, (0, 2, 3, 1)).astype(jnp.float32)    # (B,H,W,1)
    x_pad = jnp.pad(x, ((0, 0), (PAD, PAD), (PAD, PAD), (0, 0)))

    # im2col (glue): patches ordered (kh, kw, cin) to match the flattened
    # PyTorch weight layout (cin=1 here).
    patch_slices = []
    for ki in range(KSIZE):
        for kj in range(KSIZE):
            patch_slices.append(
                x_pad[:, ki:ki + STRIDE * OH:STRIDE,
                      kj:kj + STRIDE * OW:STRIDE, :])
    patches = jnp.concatenate(patch_slices, axis=-1)               # (B,OH,OW,9)
    patches = patches.reshape(M, K_RAW)                            # (128, 9)
    patches = jnp.pad(patches, ((0, 0), (0, K_PAD - K_RAW)))       # (128, 128)

    # Single fused Pallas kernel: stem -> 1x1 conv -> SiLU -> avg-pool -> 3 heads.
    out = fused_forward(patches, params)                           # (B, 128)

    pathology_pred = out[:, PATH_OFF:PATH_OFF + N_PATH]            # (B, 2)
    region_pred = out[:, REGION_OFF:REGION_OFF + N_REGION]         # (B, 3)
    depth_pred = out[:, DEPTH_OFF:DEPTH_OFF + N_DEPTH]             # (B, 2)
    return pathology_pred, region_pred, depth_pred


# ---------------------------------------------------------------------------
if __name__ == "__main__":
    params = init_params(jax.random.PRNGKey(42))
    x = jax.random.normal(jax.random.PRNGKey(0), (B, CIN, H, W), jnp.float32)

    fwd = jax.jit(functools.partial(multitask_forward, params=params))
    path, region, depth = fwd(x)
    jax.block_until_ready((path, region, depth))

    assert path.shape == (B, N_PATH)
    assert region.shape == (B, N_REGION)
    assert depth.shape == (B, N_DEPTH)
    assert jnp.all(jnp.isfinite(path)) and jnp.all(jnp.isfinite(region)) \
        and jnp.all(jnp.isfinite(depth))
    print("KERNEL_OK")
</pallas_src>

<mosaic_0001>
module attributes {stable_mosaic.version = 11 : i64} {
  func.func @fused_forward_kernel(%arg0: i32, %arg1: memref<128x128xf32, #tpu.memory_space<vmem>>, %arg2: memref<128x32xf32, #tpu.memory_space<vmem>>, %arg3: memref<1x32xf32, #tpu.memory_space<vmem>>, %arg4: memref<1x32xf32, #tpu.memory_space<vmem>>, %arg5: memref<32x1408xbf16, #tpu.memory_space<vmem>>, %arg6: memref<1x1408xf32, #tpu.memory_space<vmem>>, %arg7: memref<1x1408xf32, #tpu.memory_space<vmem>>, %arg8: memref<2x128xf32, #tpu.memory_space<vmem>>, %arg9: memref<1408x384xbf16, #tpu.memory_space<vmem>>, %arg10: memref<1x384xf32, #tpu.memory_space<vmem>>, %arg11: memref<384x128xf32, #tpu.memory_space<vmem>>, %arg12: memref<1x128xf32, #tpu.memory_space<vmem>>, %arg13: memref<2x128xf32, #tpu.memory_space<vmem>>) attributes {dimension_semantics = [#tpu.dimension_semantics<arbitrary>], iteration_bounds = array<i64: 1>, scalar_prefetch = 0 : i64, scratch_operands = 0 : i64, tpu.core_type = #tpu.core_type<tc>, window_params = [{pipeline_mode = #tpu.pipeline_mode<synchronous>, transform_indices = @transform_0, window_bounds = array<i64: 128, 128>}, {pipeline_mode = #tpu.pipeline_mode<synchronous>, transform_indices = @transform_1, window_bounds = array<i64: 128, 32>}, {pipeline_mode = #tpu.pipeline_mode<synchronous>, transform_indices = @transform_2, window_bounds = array<i64: 1, 32>}, {pipeline_mode = #tpu.pipeline_mode<synchronous>, transform_indices = @transform_3, window_bounds = array<i64: 1, 32>}, {pipeline_mode = #tpu.pipeline_mode<synchronous>, transform_indices = @transform_4, window_bounds = array<i64: 32, 1408>}, {pipeline_mode = #tpu.pipeline_mode<synchronous>, transform_indices = @transform_5, window_bounds = array<i64: 1, 1408>}, {pipeline_mode = #tpu.pipeline_mode<synchronous>, transform_indices = @transform_6, window_bounds = array<i64: 1, 1408>}, {pipeline_mode = #tpu.pipeline_mode<synchronous>, transform_indices = @transform_7, window_bounds = array<i64: 2, 128>}, {pipeline_mode = #tpu.pipeline_mode<synchronous>, transform_indices = @transform_8, window_bounds = array<i64: 1408, 384>}, {pipeline_mode = #tpu.pipeline_mode<synchronous>, transform_indices = @transform_9, window_bounds = array<i64: 1, 384>}, {pipeline_mode = #tpu.pipeline_mode<synchronous>, transform_indices = @transform_10, window_bounds = array<i64: 384, 128>}, {pipeline_mode = #tpu.pipeline_mode<synchronous>, transform_indices = @transform_11, window_bounds = array<i64: 1, 128>}, {pipeline_mode = #tpu.pipeline_mode<synchronous>, transform_indices = @transform_12, window_bounds = array<i64: 2, 128>}]} {
    %c0 = arith.constant 0 : index
    %c0_0 = arith.constant 0 : index
    %0 = vector.load %arg1[%c0, %c0_0] : memref<128x128xf32, #tpu.memory_space<vmem>>, vector<128x128xf32>
    %c0_1 = arith.constant 0 : index
    %c0_2 = arith.constant 0 : index
    %1 = vector.load %arg2[%c0_1, %c0_2] : memref<128x32xf32, #tpu.memory_space<vmem>>, vector<128x32xf32>
    %cst = arith.constant dense<0.000000e+00> : vector<128x32xf32>
    %2 = tpu.matmul %0, %1, %cst {dimension_numbers = #tpu.dot_dimension_numbers<[1], [0], [0], [1], [0, 0, 1, 1], [], []>} : vector<128x128xf32>, vector<128x32xf32>, vector<128x32xf32> -> vector<128x32xf32>
    %c0_3 = arith.constant 0 : index
    %c0_4 = arith.constant 0 : index
    %3 = vector.load %arg3[%c0_3, %c0_4] : memref<1x32xf32, #tpu.memory_space<vmem>>, vector<1x32xf32>
    %4 = vector.broadcast %3 : vector<1x32xf32> to vector<128x32xf32>
    %5 = arith.mulf %2, %4 : vector<128x32xf32>
    %c0_5 = arith.constant 0 : index
    %c0_6 = arith.constant 0 : index
    %6 = vector.load %arg4[%c0_5, %c0_6] : memref<1x32xf32, #tpu.memory_space<vmem>>, vector<1x32xf32>
    %7 = vector.broadcast %6 : vector<1x32xf32> to vector<128x32xf32>
    %8 = arith.addf %5, %7 : vector<128x32xf32>
    %9 = arith.negf %8 : vector<128x32xf32>
    %10 = math.exp %9 : vector<128x32xf32>
    %cst_7 = arith.constant 1.000000e+00 : f32
    %11 = vector.broadcast %cst_7 : f32 to vector<128x32xf32>
    %12 = arith.addf %11, %10 : vector<128x32xf32>
    %13 = arith.divf %11, %12 : vector<128x32xf32>
    %14 = arith.mulf %8, %13 : vector<128x32xf32>
    %15 = arith.truncf %14 : vector<128x32xf32> to vector<128x32xbf16>
    %c0_8 = arith.constant 0 : index
    %c0_9 = arith.constant 0 : index
    %16 = vector.load %arg5[%c0_8, %c0_9] : memref<32x1408xbf16, #tpu.memory_space<vmem>>, vector<32x1408xbf16>
    %cst_10 = arith.constant dense<0.000000e+00> : vector<128x1408xf32>
    %17 = tpu.matmul %15, %16, %cst_10 {dimension_numbers = #tpu.dot_dimension_numbers<[1], [0], [0], [1], [0, 0, 1, 1], [], []>} : vector<128x32xbf16>, vector<32x1408xbf16>, vector<128x1408xf32> -> vector<128x1408xf32>
    %c0_11 = arith.constant 0 : index
    %c0_12 = arith.constant 0 : index
    %18 = vector.load %arg6[%c0_11, %c0_12] : memref<1x1408xf32, #tpu.memory_space<vmem>>, vector<1x1408xf32>
    %19 = vector.broadcast %18 : vector<1x1408xf32> to vector<128x1408xf32>
    %20 = arith.mulf %17, %19 : vector<128x1408xf32>
    %c0_13 = arith.constant 0 : index
    %c0_14 = arith.constant 0 : index
    %21 = vector.load %arg7[%c0_13, %c0_14] : memref<1x1408xf32, #tpu.memory_space<vmem>>, vector<1x1408xf32>
    %22 = vector.broadcast %21 : vector<1x1408xf32> to vector<128x1408xf32>
    %23 = arith.addf %20, %22 : vector<128x1408xf32>
    %24 = arith.negf %23 : vector<128x1408xf32>
    %25 = math.exp %24 : vector<128x1408xf32>
    %cst_15 = arith.constant 1.000000e+00 : f32
    %26 = vector.broadcast %cst_15 : f32 to vector<128x1408xf32>
    %27 = arith.addf %26, %25 : vector<128x1408xf32>
    %28 = arith.divf %26, %27 : vector<128x1408xf32>
    %29 = arith.mulf %23, %28 : vector<128x1408xf32>
    %c0_16 = arith.constant 0 : index
    %c0_17 = arith.constant 0 : index
    %30 = vector.load %arg8[%c0_16, %c0_17] : memref<2x128xf32, #tpu.memory_space<vmem>>, vector<2x128xf32>
    %cst_18 = arith.constant dense<0.000000e+00> : vector<2x1408xf32>
    %31 = tpu.matmul %30, %29, %cst_18 {dimension_numbers = #tpu.dot_dimension_numbers<[1], [0], [0], [1], [0, 0, 1, 1], [], []>} : vector<2x128xf32>, vector<128x1408xf32>, vector<2x1408xf32> -> vector<2x1408xf32>
    %32 = arith.truncf %31 : vector<2x1408xf32> to vector<2x1408xbf16>
    %c0_19 = arith.constant 0 : index
    %c0_20 = arith.constant 0 : index
    %33 = vector.load %arg9[%c0_19, %c0_20] : memref<1408x384xbf16, #tpu.memory_space<vmem>>, vector<1408x384xbf16>
    %cst_21 = arith.constant dense<0.000000e+00> : vector<2x384xf32>
    %34 = tpu.matmul %32, %33, %cst_21 {dimension_numbers = #tpu.dot_dimension_numbers<[1], [0], [0], [1], [0, 0, 1, 1], [], []>} : vector<2x1408xbf16>, vector<1408x384xbf16>, vector<2x384xf32> -> vector<2x384xf32>
    %c0_22 = arith.constant 0 : index
    %c0_23 = arith.constant 0 : index
    %35 = vector.load %arg10[%c0_22, %c0_23] : memref<1x384xf32, #tpu.memory_space<vmem>>, vector<1x384xf32>
    %36 = vector.broadcast %35 : vector<1x384xf32> to vector<2x384xf32>
    %37 = arith.addf %34, %36 : vector<2x384xf32>
    %cst_24 = arith.constant 0.000000e+00 : f32
    %38 = vector.broadcast %cst_24 : f32 to vector<2x384xf32>
    %39 = arith.maximumf %37, %38 : vector<2x384xf32>
    %c0_25 = arith.constant 0 : index
    %c0_26 = arith.constant 0 : index
    %40 = vector.load %arg11[%c0_25, %c0_26] : memref<384x128xf32, #tpu.memory_space<vmem>>, vector<384x128xf32>
    %cst_27 = arith.constant dense<0.000000e+00> : vector<2x128xf32>
    %41 = tpu.matmul %39, %40, %cst_27 {dimension_numbers = #tpu.dot_dimension_numbers<[1], [0], [0], [1], [0, 0, 1, 1], [], []>} : vector<2x384xf32>, vector<384x128xf32>, vector<2x128xf32> -> vector<2x128xf32>
    %c0_28 = arith.constant 0 : index
    %c0_29 = arith.constant 0 : index
    %42 = vector.load %arg12[%c0_28, %c0_29] : memref<1x128xf32, #tpu.memory_space<vmem>>, vector<1x128xf32>
    %43 = vector.broadcast %42 : vector<1x128xf32> to vector<2x128xf32>
    %44 = arith.addf %41, %43 : vector<2x128xf32>
    %c0_30 = arith.constant 0 : index
    %c0_31 = arith.constant 0 : index
    %45 = vector.load %arg13[%c0_30, %c0_31] : memref<2x128xf32, #tpu.memory_space<vmem>>, vector<2x128xf32>
    tpu.vector_store %arg13[%c0_30, %c0_31], %44 {strides = array<i32>} : memref<2x128xf32, #tpu.memory_space<vmem>>, vector<2x128xf32>,
    return
  }
  func.func @transform_0(%arg0: i32) -> (i32, i32) {
    %c0_i32 = arith.constant 0 : i32
    %c0_i32_0 = arith.constant 0 : i32
    %c0_i32_1 = arith.constant 0 : i32
    return %c0_i32, %c0_i32_0 : i32, i32
  }
  func.func @transform_1(%arg0: i32) -> (i32, i32) {
    %c0_i32 = arith.constant 0 : i32
    %c0_i32_0 = arith.constant 0 : i32
    %c0_i32_1 = arith.constant 0 : i32
    return %c0_i32, %c0_i32_0 : i32, i32
  }
  func.func @transform_2(%arg0: i32) -> (i32, i32) {
    %c0_i32 = arith.constant 0 : i32
    %c0_i32_0 = arith.constant 0 : i32
    %c0_i32_1 = arith.constant 0 : i32
    return %c0_i32, %c0_i32_0 : i32, i32
  }
  func.func @transform_3(%arg0: i32) -> (i32, i32) {
    %c0_i32 = arith.constant 0 : i32
    %c0_i32_0 = arith.constant 0 : i32
    %c0_i32_1 = arith.constant 0 : i32
    return %c0_i32, %c0_i32_0 : i32, i32
  }
  func.func @transform_4(%arg0: i32) -> (i32, i32) {
    %c0_i32 = arith.constant 0 : i32
    %c0_i32_0 = arith.constant 0 : i32
    %c0_i32_1 = arith.constant 0 : i32
    return %c0_i32, %c0_i32_0 : i32, i32
  }
  func.func @transform_5(%arg0: i32) -> (i32, i32) {
    %c0_i32 = arith.constant 0 : i32
    %c0_i32_0 = arith.constant 0 : i32
    %c0_i32_1 = arith.constant 0 : i32
    return %c0_i32, %c0_i32_0 : i32, i32
  }
  func.func @transform_6(%arg0: i32) -> (i32, i32) {
    %c0_i32 = arith.constant 0 : i32
    %c0_i32_0 = arith.constant 0 : i32
    %c0_i32_1 = arith.constant 0 : i32
    return %c0_i32, %c0_i32_0 : i32, i32
  }
  func.func @transform_7(%arg0: i32) -> (i32, i32) {
    %c0_i32 = arith.constant 0 : i32
    %c0_i32_0 = arith.constant 0 : i32
    %c0_i32_1 = arith.constant 0 : i32
    return %c0_i32, %c0_i32_0 : i32, i32
  }
  func.func @transform_8(%arg0: i32) -> (i32, i32) {
    %c0_i32 = arith.constant 0 : i32
    %c0_i32_0 = arith.constant 0 : i32
    %c0_i32_1 = arith.constant 0 : i32
    return %c0_i32, %c0_i32_0 : i32, i32
  }
  func.func @transform_9(%arg0: i32) -> (i32, i32) {
    %c0_i32 = arith.constant 0 : i32
    %c0_i32_0 = arith.constant 0 : i32
    %c0_i32_1 = arith.constant 0 : i32
    return %c0_i32, %c0_i32_0 : i32, i32
  }
  func.func @transform_10(%arg0: i32) -> (i32, i32) {
    %c0_i32 = arith.constant 0 : i32
    %c0_i32_0 = arith.constant 0 : i32
    %c0_i32_1 = arith.constant 0 : i32
    return %c0_i32, %c0_i32_0 : i32, i32
  }
  func.func @transform_11(%arg0: i32) -> (i32, i32) {
    %c0_i32 = arith.constant 0 : i32
    %c0_i32_0 = arith.constant 0 : i32
    %c0_i32_1 = arith.constant 0 : i32
    return %c0_i32, %c0_i32_0 : i32, i32
  }
  func.func @transform_12(%arg0: i32) -> (i32, i32) {
    %c0_i32 = arith.constant 0 : i32
    %c0_i32_0 = arith.constant 0 : i32
    %c0_i32_1 = arith.constant 0 : i32
    return %c0_i32, %c0_i32_0 : i32, i32
  }
}

</mosaic_0001>

<bundles_post_ra>
// kernel: multitask_forward.1
= control target key start
LH: loop header
LB: loop body
LE: loop exit
PB: predicated region body
PF: predicated region fallthrough
CT: control target
= control target key end

     0   :  { %v11828_v44 = vmov 0   ;;  %vm521_vm0 = vcmask 261120   ;;  %vm8199_vm1 = vmmov 0   ;;  %s11815_s1 = inlined_call_operand.vmem [shape: f32[128,32], index: 1, kind: input, shape index: {}]   ;;  %s11816_s0 = inlined_call_operand.vmem [shape: f32[128,128], index: 0, kind: input, shape index: {}]   ;;  %s11817_s4 = inlined_call_operand.vmem [shape: bf16[32,1408], index: 4, kind: input, shape index: {}]   ;;  %s11818_s2 = inlined_call_operand.vmem [shape: f32[1,32], index: 2, kind: input, shape index: {}]   ;;  %s11819_s3 = inlined_call_operand.vmem [shape: f32[1,32], index: 3, kind: input, shape index: {}]   ;;  %s11820_s5 = inlined_call_operand.vmem [shape: f32[1,1408], index: 5, kind: input, shape index: {}]   ;;  %s11821_s6 = inlined_call_operand.vmem [shape: f32[1,1408], index: 6, kind: input, shape index: {}]   ;;  %s11822_s7 = inlined_call_operand.vmem [shape: f32[2,128], index: 7, kind: input, shape index: {}]   ;;  %s11823_s8 = inlined_call_operand.vmem [shape: bf16[1408,384], index: 8, kind: input, shape index: {}]   ;;  %s11824_s9 = inlined_call_operand.vmem [shape: f32[1,384], index: 9, kind: input, shape index: {}]   ;;  %s11825_s10 = inlined_call_operand.vmem [shape: f32[384,128], index: 10, kind: input, shape index: {}]   ;;  %s11826_s11 = inlined_call_operand.vmem [shape: f32[1,128], index: 11, kind: input, shape index: {}]   ;;  %s11827_s12 = inlined_call_operand.vmem [shape: f32[2,128], index: 12, kind: output, shape index: {}]  }
   0x1   :  { %v58_v0 = vld [vmem:[%s11815_s1] sm:$0xff]  ;;  %v59_v1 = vld [vmem:[%s11815_s1 + $0x8] sm:$0xff]  ;;  %v60_v2 = vld [vmem:[%s11815_s1 + $0x10] sm:$0xff]  ;;  %618 = vmatprep.mubr.bf16.mxu1 %v11828_v44 }
   0x2   :  { %v6738_v3 = vpack.c.bf16 %v59_v1, %v58_v0  ;;  %v61_v4 = vld [vmem:[%s11815_s1 + $0x18] sm:$0xff]  ;;  %v62_v6 = vld [vmem:[%s11815_s1 + $0x20] sm:$0xff]  ;;  %v63_v7 = vld [vmem:[%s11815_s1 + $0x28] sm:$0xff] }
   0x3   :  { %v6742_v5 = vpack.c.bf16 %v61_v4, %v60_v2  ;;  %v6746_v8 = vpack.c.bf16 %v63_v7, %v62_v6  ;;  %v42_v9 = vld [vmem:[%s11816_s0] sm:$0xff]  ;;  %v64_v10 = vld [vmem:[%s11815_s1 + $0x30] sm:$0xff]  ;;  %v65_v11 = vld [vmem:[%s11815_s1 + $0x38] sm:$0xff] }
   0x4   :  { %6739 = vmatprep.subr.bf16.mxu0 %v6738_v3  ;;  %6604 = vmatprep.mubr.f32.mxu0 %v42_v9  ;;  %v6750_v12 = vpack.c.bf16 %v65_v11, %v64_v10  ;;  %v66_v13 = vld [vmem:[%s11815_s1 + $0x40] sm:$0xff]  ;;  %v67_v14 = vld [vmem:[%s11815_s1 + $0x48] sm:$0xff]  ;;  %v68_v16 = vld [vmem:[%s11815_s1 + $0x50] sm:$0xff] }
   0x5   :  { %6741 = vmatpush3.bf16.msra.mxu0 %v6738_v3  ;;  %v6754_v15 = vpack.c.bf16 %v67_v14, %v66_v13  ;;  %v69_v17 = vld [vmem:[%s11815_s1 + $0x58] sm:$0xff]  ;;  %v70_v19 = vld [vmem:[%s11815_s1 + $0x60] sm:$0xff]  ;;  %v71_v20 = vld [vmem:[%s11815_s1 + $0x68] sm:$0xff] }
   0x6   :  { %6743 = vmatprep.subr.bf16.mxu0 %v6742_v5  ;;  %v6758_v18 = vpack.c.bf16 %v69_v17, %v68_v16  ;;  %v6762_v21 = vpack.c.bf16 %v71_v20, %v70_v19  ;;  %v72_v22 = vld [vmem:[%s11815_s1 + $0x70] sm:$0xff]  ;;  %v73_v23 = vld [vmem:[%s11815_s1 + $0x78] sm:$0xff]  ;;  %v43_v25 = vld [vmem:[%s11816_s0 + $0x8] sm:$0xff] }
   0x7   :  { %v6766_v24 = vpack.c.bf16 %v73_v23, %v72_v22  ;;  %v44_v26 = vld [vmem:[%s11816_s0 + $0x10] sm:$0xff]  ;;  %v45_v27 = vld [vmem:[%s11816_s0 + $0x18] sm:$0xff]  ;;  %v46_v28 = vld [vmem:[%s11816_s0 + $0x20] sm:$0xff] }
   0x8   :  { %v47_v29 = vld [vmem:[%s11816_s0 + $0x28] sm:$0xff]  ;;  %v48_v30 = vld [vmem:[%s11816_s0 + $0x30] sm:$0xff]  ;;  %v49_v31 = vld [vmem:[%s11816_s0 + $0x38] sm:$0xff] }
   0x9   :  { %6745 = vmatpush3.bf16.msra.mxu0 %v6742_v5  ;;  %v50_v32 = vld [vmem:[%s11816_s0 + $0x40] sm:$0xff]  ;;  %v51_v33 = vld [vmem:[%s11816_s0 + $0x48] sm:$0xff]  ;;  %v52_v34 = vld [vmem:[%s11816_s0 + $0x50] sm:$0xff] }
   0xa   :  { %6747 = vmatprep.subr.bf16.mxu0 %v6746_v8  ;;  %v53_v35 = vld [vmem:[%s11816_s0 + $0x58] sm:$0xff]  ;;  %v54_v36 = vld [vmem:[%s11816_s0 + $0x60] sm:$0xff]  ;;  %v55_v37 = vld [vmem:[%s11816_s0 + $0x68] sm:$0xff] }
   0xb   :  { %v56_v38 = vld [vmem:[%s11816_s0 + $0x70] sm:$0xff]  ;;  %v57_v39 = vld [vmem:[%s11816_s0 + $0x78] sm:$0xff]  ;;  %v7040_v41 = vld [vmem:[%s11817_s4] ss:$44 sps:$4 sm:$0xff]  }
   0xc   :  { %v7042_v40 = vld [vmem:[%s11817_s4 + $0x4] ss:$44 sps:$4 sm:$0xff]   ;;  %v7045_v42 = vld [vmem:[%s11817_s4 + $0x5c] ss:$44 sps:$4 sm:$0xff]   ;;  %v7048_v45 = vld [vmem:[%s11817_s4 + $0xc] ss:$44 sps:$4 sm:$0xff]  }
   0xd   :  { %6749 = vmatpush3.bf16.msra.mxu0 %v6746_v8  ;;  %7010 = vmatprep.subr.bf16.mxu1 %v7042_v40  ;;  %v7043_v43 = vld [vmem:[%s11817_s4 + $0x58] ss:$44 sps:$4 sm:$0xff]   ;;  %v7054_v46 = vld [vmem:[%s11817_s4 + $0x14] ss:$44 sps:$4 sm:$0xff]  }
   0xe   :  { %6751 = vmatprep.subr.bf16.mxu0 %v6750_v12  ;;  %7012 = vmatpush1.bf16.msra.mxu1 %v7040_v41  ;;  %v8384_v47 = vld [vmem:[%s11818_s2] ss:$0 sm:$0xff] }
   0xf   :  { %7011 = vmatprep.subr.bf16.mxu1 %v7045_v42  ;;  %v8389_v49 = vld [vmem:[%s11819_s3] ss:$0 sm:$0xff] }
  0x11   :  { %6753 = vmatpush3.bf16.msra.mxu0 %v6750_v12 }
  0x12   :  { %6755 = vmatprep.subr.bf16.mxu0 %v6754_v15  ;;  %7013 = vmatpush1.bf16.msra.mxu1 %v7043_v43 }
  0x13   :  { %772 = vmatprep.subr.bf16.mxu1 %v7054_v46 }
  0x15   :  { %6757 = vmatpush3.bf16.msra.mxu0 %v6754_v15 }
  0x16   :  { %6759 = vmatprep.subr.bf16.mxu0 %v6758_v18 }
  0x19   :  { %6761 = vmatpush3.bf16.msra.mxu0 %v6758_v18 }
  0x1a   :  { %6763 = vmatprep.subr.bf16.mxu0 %v6762_v21 }
  0x1d   :  { %6765 = vmatpush3.bf16.msra.mxu0 %v6762_v21 }
  0x1e   :  { %6767 = vmatprep.subr.bf16.mxu0 %v6766_v24 }
  0x21   :  { %6769 = vmatpush3.bf16.msra.mxu0 %v6766_v24 }
  0x22   :  { %546 = vmatprep.subr.bf16.mxu0 %v7042_v40 }
  0x24   :  { %6605 = vmatmul.mubr.f32.vlgmr.msra.gmra.mrb[0].mxu0 %v43_v25 }
  0x25   :  { %6607 = vmatprep.mubr.f32.mxu0 %v44_v26  ;;  %547 = vmatpush1.bf16.msra.mxu0 %v7040_v41 }
  0x26   :  { %548 = vmatprep.subr.bf16.mxu0 %v7045_v42 }
  0x28   :  { %6608 = vmatmul.mubr.f32.gmra.mrb[2].mxu0 %v45_v27 }
  0x29   :  { %6610 = vmatprep.mubr.f32.mxu0 %v46_v28  ;;  %549 = vmatpush1.bf16.msra.mxu0 %v7043_v43 }
  0x2a   :  { %659 = vmatprep.subr.bf16.mxu0 %v7048_v45 }
  0x2c   :  { %6611 = vmatmul.mubr.f32.gmra.mrb[4].mxu0 %v47_v29 }
  0x2d   :  { %6613 = vmatprep.mubr.f32.mxu0 %v48_v30 }
  0x30   :  { %6614 = vmatmul.mubr.f32.gmra.mrb[6].mxu0 %v49_v31 }
  0x31   :  { %6616 = vmatprep.mubr.f32.mxu0 %v50_v32 }
  0x34   :  { %6617 = vmatmul.mubr.f32.gmra.mrb[8].mxu0 %v51_v33 }
  0x35   :  { %6619 = vmatprep.mubr.f32.mxu0 %v52_v34 }
  0x38   :  { %6620 = vmatmul.mubr.f32.gmra.mrb[10].mxu0 %v53_v35 }
  0x39   :  { %6622 = vmatprep.mubr.f32.mxu0 %v54_v36 }
  0x3c   :  { %6623 = vmatmul.mubr.f32.gmra.mrb[12].mxu0 %v55_v37 }
  0x3d   :  { %6625 = vmatprep.mubr.f32.mxu0 %v56_v38 }
  0x40   :  { %6626 = vmatmul.mubr.f32.gmra.mrb[14].mxu0 %v57_v39 }
  0x41   :  { %578 = vmatprep.mubr.bf16.mxu0 %v11828_v44 }
  0xf7   :  { %v6606_v48 = vpop.f32.mrb[0].mxu0 }
  0xf8   :  { %v227_v50 = vmul.f32 %v6606_v48, %v8384_v47  ;;  %v140_v51 = vpop.f32.mrb[1].mxu0 }
  0xf9   :  { %v226_v52 = vmul.f32 %v8384_v47, %v140_v51 }
  0xfa   :  { %v8394_v53 = vadd.f32 %v8389_v49, %v227_v50 }
  0xfb   :  { %v8397_v54 = vadd.f32 %v8389_v49, %v226_v52  ;;  %v6609_v55 = vpop.f32.mrb[2].mxu0 }
  0xfc   :  { %v5816_v56 = vmul.f32 -1.442695, %v8394_v53  ;;  %v229_v57 = vmul.f32 %v6609_v55, %v8384_v47  ;;  %v150_v58 = vpop.f32.mrb[3].mxu0 }
  0xfd   :  { %v5815_v59 = vmul.f32 -1.442695, %v8397_v54  ;;  %v228_v60 = vmul.f32 %v8384_v47, %v150_v58 }
  0xfe   :  { %7424 = vpow2.f32 %v5816_v56  ;;  %v8404_v61 = vadd.f32 %v8389_v49, %v229_v57 }
  0xff   :  { %7426 = vpow2.f32 %v5815_v59  ;;  %v8407_v62 = vadd.f32 %v8389_v49, %v228_v60  ;;  %v6612_v63 = vpop.f32.mrb[4].mxu0 }
 0x100   :  { %v5818_v0 = vmul.f32 -1.442695, %v8404_v61  ;;  %v231_v1 = vmul.f32 %v6612_v63, %v8384_v47  ;;  %v160_v2 = vpop.f32.mrb[5].mxu0 }
 0x101   :  { %v5817_v3 = vmul.f32 -1.442695, %v8407_v62  ;;  %v230_v4 = vmul.f32 %v8384_v47, %v160_v2 }
 0x102   :  { %7428 = vpow2.f32 %v5818_v0  ;;  %v8414_v5 = vadd.f32 %v8389_v49, %v231_v1 }
 0x103   :  { %7430 = vpow2.f32 %v5817_v3  ;;  %v8417_v6 = vadd.f32 %v8389_v49, %v230_v4  ;;  %v6615_v7 = vpop.f32.mrb[6].mxu0 }
 0x104   :  { %v5820_v8 = vmul.f32 -1.442695, %v8414_v5  ;;  %v233_v9 = vmul.f32 %v6615_v7, %v8384_v47  ;;  %v170_v10 = vpop.f32.mrb[7].mxu0 }
 0x105   :  { %v5819_v11 = vmul.f32 -1.442695, %v8417_v6  ;;  %v232_v12 = vmul.f32 %v8384_v47, %v170_v10 }
 0x106   :  { %7432 = vpow2.f32 %v5820_v8  ;;  %v8424_v13 = vadd.f32 %v8389_v49, %v233_v9 }
 0x107   :  { %7434 = vpow2.f32 %v5819_v11  ;;  %v8427_v14 = vadd.f32 %v8389_v49, %v232_v12  ;;  %v6618_v15 = vpop.f32.mrb[8].mxu0 }
 0x108   :  { %v7425_v16 = vpop.eup %7424  ;;  %v5822_v17 = vmul.f32 -1.442695, %v8424_v13  ;;  %v235_v18 = vmul.f32 %v6618_v15, %v8384_v47  ;;  %v180_v19 = vpop.f32.mrb[9].mxu0 }
 0x109   :  { %v7427_v20 = vpop.eup %7426  ;;  %v314_v21 = vadd.f32 1.0, %v7425_v16  ;;  %v5821_v22 = vmul.f32 -1.442695, %v8427_v14  ;;  %v234_v23 = vmul.f32 %v8384_v47, %v180_v19 }
 0x10a   :  { %v313_v24 = vadd.f32 1.0, %v7427_v20  ;;  %7436 = vpow2.f32 %v5822_v17  ;;  %v8434_v25 = vadd.f32 %v8389_v49, %v235_v18 }
 0x10b   :  { %7438 = vrcp.f32 %v314_v21  ;;  %v8437_v26 = vadd.f32 %v8389_v49, %v234_v23  ;;  %v6621_v27 = vpop.f32.mrb[10].mxu0 }
 0x10c   :  { %v7429_v28 = vpop.eup %7428  ;;  %7440 = vrcp.f32 %v313_v24  ;;  %v5824_v29 = vmul.f32 -1.442695, %v8434_v25  ;;  %v237_v30 = vmul.f32 %v6621_v27, %v8384_v47  ;;  %v190_v31 = vpop.f32.mrb[11].mxu0  ;;  %v7049_v24 = vld [vmem:[%s11817_s4 + $0x60] ss:$44 sps:$4 sm:$0xff]  }
 0x10d   :  { %v7431_v32 = vpop.eup %7430  ;;  %v316_v33 = vadd.f32 1.0, %v7429_v28  ;;  %7442 = vpow2.f32 %v5821_v22  ;;  %v5823_v34 = vmul.f32 -1.442695, %v8437_v26  ;;  %v236_v35 = vmul.f32 %v8384_v47, %v190_v31 }
 0x10e   :  { %v315_v36 = vadd.f32 1.0, %v7431_v32  ;;  %7444 = vpow2.f32 %v5824_v29  ;;  %v8444_v37 = vadd.f32 %v8389_v49, %v237_v30 }
 0x10f   :  { %7446 = vrcp.f32 %v316_v33  ;;  %v8447_v38 = vadd.f32 %v8389_v49, %v236_v35  ;;  %v6624_v39 = vpop.f32.mrb[12].mxu0 }
 0x110   :  { %v7433_v40 = vpop.eup %7432  ;;  %7448 = vrcp.f32 %v315_v36  ;;  %v5826_v41 = vmul.f32 -1.442695, %v8444_v37  ;;  %v239_v42 = vmul.f32 %v6624_v39, %v8384_v47  ;;  %v200_v43 = vpop.f32.mrb[13].mxu0 }
 0x111   :  { %v7435_v45 = vpop.eup %7434  ;;  %v318_v46 = vadd.f32 1.0, %v7433_v40  ;;  %7450 = vpow2.f32 %v5823_v34  ;;  %v5825_v48 = vmul.f32 -1.442695, %v8447_v38  ;;  %v238_v50 = vmul.f32 %v8384_v47, %v200_v43 }
 0x112   :  { %v317_v51 = vadd.f32 1.0, %v7435_v45  ;;  %7452 = vpow2.f32 %v5826_v41  ;;  %v8454_v52 = vadd.f32 %v8389_v49, %v239_v42 }
 0x113   :  { %7454 = vrcp.f32 %v318_v46  ;;  %v8457_v55 = vadd.f32 %v8389_v49, %v238_v50  ;;  %v6627_v56 = vpop.f32.mrb[14].mxu0 }
 0x114   :  { %v7437_v57 = vpop.eup %7436  ;;  %7456 = vrcp.f32 %v317_v51  ;;  %v5828_v58 = vmul.f32 -1.442695, %v8454_v52  ;;  %v241_v59 = vmul.f32 %v6627_v56, %v8384_v47  ;;  %v210_v60 = vpop.f32.mrb[15].mxu0 }
 0x115   :  { %v7439_v63 = vpop.eup %7438  ;;  %v320_v0 = vadd.f32 1.0, %v7437_v57  ;;  %7458 = vpow2.f32 %v5825_v48  ;;  %v5827_v1 = vmul.f32 -1.442695, %v8457_v55  ;;  %v240_v2 = vmul.f32 %v8384_v47, %v210_v60  ;;  %v7046_v47 = vld [vmem:[%s11817_s4 + $0x8] ss:$44 sps:$4 sm:$0xff]  }
 0x116   :  { %v7441_v3 = vpop.eup %7440  ;;  %v362_v4 = vmul.f32 %v7439_v63, %v8394_v53  ;;  %7460 = vpow2.f32 %v5828_v58  ;;  %v8465_v7 = vadd.f32 %v8389_v49, %v241_v59  ;;  %v7052_v59 = vld [vmem:[%s11817_s4 + $0x10] ss:$44 sps:$4 sm:$0xff]  }
 0x117   :  { %v7443_v8 = vpop.eup %7442  ;;  %v361_v9 = vmul.f32 %v7441_v3, %v8397_v54  ;;  %7462 = vrcp.f32 %v320_v0  ;;  %v8469_v10 = vadd.f32 %v8389_v49, %v240_v2  ;;  %v7051_v49 = vld [vmem:[%s11817_s4 + $0x64] ss:$44 sps:$4 sm:$0xff]  }
 0x118   :  { %v7445_v11 = vpop.eup %7444  ;;  %v319_v12 = vadd.f32 1.0, %v7443_v8  ;;  %7464 = vpow2.f32 %v5827_v1  ;;  %v5830_v15 = vmul.f32 -1.442695, %v8465_v7 }
 0x119   :  { %v7447_v53 = vpop.eup %7446  ;;  %v8475_v16 = vpack.c.bf16 %v362_v4, %v361_v9  ;;  %v322_v17 = vadd.f32 1.0, %v7445_v11  ;;  %v5829_v54 = vmul.f32 -1.442695, %v8469_v10 }
 0x11a   :  { %v7449_v18 = vpop.eup %7448  ;;  %v364_v19 = vmul.f32 %v7447_v53, %v8404_v61  ;;  %7466 = vrcp.f32 %v319_v12  ;;  %v7061_v53 = vld [vmem:[%s11817_s4 + $0x20] ss:$44 sps:$4 sm:$0xff]  }
 0x11b   :  { %v7451_v20 = vpop.eup %7450  ;;  %v363_v21 = vmul.f32 %v7449_v18, %v8407_v62  ;;  %7468 = vrcp.f32 %v322_v17  ;;  %5853 = vmatmul.mubr.msk.bf16.vlgmr.msra.gmra.mrb[16].mxu0 %vm521_vm0, %v8475_v16  ;;  %v7060_v62 = vld [vmem:[%s11817_s4 + $0x1c] ss:$44 sps:$4 sm:$0xff]  }
 0x11c   :  { %v7453_v22 = vpop.eup %7452  ;;  %v321_v23 = vadd.f32 1.0, %v7451_v20  ;;  %7470 = vpow2.f32 %v5830_v15  ;;  %588 = vmatprep.mubr.bf16.mxu0 %v11828_v44  ;;  %660 = vmatpush1.bf16.msra.mxu0 %v7046_v47  ;;  %v7058_v15 = vld [vmem:[%s11817_s4 + $0x18] ss:$44 sps:$4 sm:$0xff]   ;;  %v7066_v47 = vld [vmem:[%s11817_s4 + $0x74] ss:$44 sps:$4 sm:$0xff]  }
 0x11d   :  { %v7455_v27 = vpop.eup %7454  ;;  %v8489_v61 = vpack.c.bf16 %v364_v19, %v363_v21  ;;  %v324_v28 = vadd.f32 1.0, %v7453_v22  ;;  %7472 = vpow2.f32 %v5829_v54  ;;  %661 = vmatprep.subr.bf16.mxu0 %v7051_v49  ;;  %v7069_v17 = vld [vmem:[%s11817_s4 + $0x7c] ss:$44 sps:$4 sm:$0xff]   ;;  %v7067_v54 = vld [vmem:[%s11817_s4 + $0x78] ss:$44 sps:$4 sm:$0xff]  }
 0x11e   :  { %v7457_v29 = vpop.eup %7456  ;;  %v366_v30 = vmul.f32 %v7455_v27, %v8414_v5  ;;  %7474 = vrcp.f32 %v321_v23  ;;  %v7071_v49 = vld [vmem:[%s11817_s4 + $0x80] ss:$44 sps:$4 sm:$0xff]  }
 0x11f   :  { %v7459_v31 = vpop.eup %7458  ;;  %v365_v32 = vmul.f32 %v7457_v29, %v8417_v6  ;;  %7476 = vrcp.f32 %v324_v28  ;;  %v8693_v20 = vld [vmem:[%s11820_s5] sm:$0xff] }
 0x120   :  { %v7461_v33 = vpop.eup %7460  ;;  %v323_v34 = vadd.f32 1.0, %v7459_v31  ;;  %662 = vmatpush1.bf16.msra.mxu0 %v7049_v24  ;;  %v8701_v22 = vld [vmem:[%s11821_s6] sm:$0xff] }
 0x121   :  { %v7463_v35 = vpop.eup %7462  ;;  %v8496_v36 = vpack.c.bf16 %v366_v30, %v365_v32  ;;  %v326_v39 = vadd.f32 1.0, %v7461_v33  ;;  %885 = vmatprep.subr.bf16.mxu0 %v7060_v62 }
 0x122   :  { %v7465_v40 = vpop.eup %7464  ;;  %7478 = vrcp.f32 %v323_v34  ;;  %v368_v41 = vmul.f32 %v7463_v35, %v8424_v13 }
 0x123   :  { %7480 = vrcp.f32 %v326_v39  ;;  %v325_v42 = vadd.f32 1.0, %v7465_v40  ;;  %5854 = vmatmul.mubr.msk.bf16.gmra.mrb[20].mxu0 %vm521_vm0, %v8489_v61 }
 0x124   :  { %v7467_v5 = vpop.eup %7466  ;;  %598 = vmatprep.mubr.bf16.mxu0 %v11828_v44 }
 0x125   :  { %v7469_v6 = vpop.eup %7468  ;;  %v367_v43 = vmul.f32 %v7467_v5, %v8427_v14  ;;  %7482 = vrcp.f32 %v325_v42 }
 0x126   :  { %v7471_v45 = vpop.eup %7470  ;;  %v370_v50 = vmul.f32 %v7469_v6, %v8434_v25  ;;  %v7057_v25 = vld [vmem:[%s11817_s4 + $0x6c] ss:$44 sps:$4 sm:$0xff]  }
 0x127   :  { %v7473_v46 = vpop.eup %7472  ;;  %v8503_v48 = vpack.c.bf16 %v368_v41, %v367_v43  ;;  %v328_v51 = vadd.f32 1.0, %v7471_v45 }
 0x128   :  { %v7475_v13 = vpop.eup %7474  ;;  %v327_v56 = vadd.f32 1.0, %v7473_v46 }
 0x129   :  { %v7477_v57 = vpop.eup %7476  ;;  %v369_v58 = vmul.f32 %v7475_v13, %v8437_v26  ;;  %7484 = vrcp.f32 %v328_v51 }
 0x12a   :  { %7486 = vrcp.f32 %v327_v56  ;;  %v372_v60 = vmul.f32 %v7477_v57, %v8444_v37  ;;  %v7055_v37 = vld [vmem:[%s11817_s4 + $0x68] ss:$44 sps:$4 sm:$0xff]  }
 0x12b   :  { %v8510_v14 = vpack.c.bf16 %v370_v50, %v369_v58  ;;  %5855 = vmatmul.mubr.msk.bf16.gmra.mrb[24].mxu0 %vm521_vm0, %v8496_v36 }
 0x12c   :  { %v7479_v63 = vpop.eup %7478  ;;  %608 = vmatprep.mubr.bf16.mxu0 %v11828_v44 }
 0x12d   :  { %v7481_v26 = vpop.eup %7480  ;;  %v371_v0 = vmul.f32 %v7479_v63, %v8447_v38  ;;  %5857 = vmatmul.mubr.msk.bf16.vlgmr.msra.gmra.mrb[0].mxu1 %vm521_vm0, %v8510_v14  ;;  %v7063_v38 = vld [vmem:[%s11817_s4 + $0x24] ss:$44 sps:$4 sm:$0xff]  }
 0x12e   :  { %v374_v1 = vmul.f32 %v7481_v26, %v8454_v52  ;;  %628 = vmatprep.mubr.bf16.mxu1 %v11828_v44  ;;  %773 = vmatpush1.bf16.msra.mxu1 %v7052_v59 }
 0x12f   :  { %v7483_v2 = vpop.eup %7482  ;;  %v8527_v3 = vpack.c.bf16 %v372_v60, %v371_v0  ;;  %774 = vmatprep.subr.bf16.mxu1 %v7057_v25 }
 0x130   :  { %v373_v4 = vmul.f32 %v7483_v2, %v8457_v55 }
 0x132   :  { %v8533_v8 = vpack.c.bf16 %v374_v1, %v373_v4  ;;  %775 = vmatpush1.bf16.msra.mxu1 %v7055_v37 }
 0x133   :  { %v7485_v52 = vpop.eup %7484  ;;  %5856 = vmatmul.mubr.msk.bf16.gmra.mrb[28].mxu0 %vm521_vm0, %v8503_v48  ;;  %998 = vmatprep.subr.bf16.mxu1 %v7063_v38 }
 0x134   :  { %v7487_v9 = vpop.eup %7486  ;;  %v376_v11 = vmul.f32 %v7485_v52, %v8465_v7  ;;  %691 = vmatprep.mubr.bf16.mxu0 %v11828_v44  ;;  %v7064_v7 = vld [vmem:[%s11817_s4 + $0x70] ss:$44 sps:$4 sm:$0xff]  }
 0x135   :  { %v375_v12 = vmul.f32 %v7487_v9, %v8469_v10  ;;  %5858 = vmatmul.mubr.msk.bf16.gmra.mrb[4].mxu1 %vm521_vm0, %v8527_v3  ;;  %v7070_v10 = vld [vmem:[%s11817_s4 + $0x28] ss:$44 sps:$4 sm:$0xff]  }
 0x136   :  { %638 = vmatprep.mubr.bf16.mxu1 %v11828_v44 }
 0x137   :  { %v8543_v55 = vpack.c.bf16 %v376_v11, %v375_v12 }
 0x13b   :  { %5861 = vmatmul.mubr.msk.bf16.vlgmr.msra.gmra.mrb[32].mxu0 %vm521_vm0, %v8475_v16 }
 0x13c   :  { %701 = vmatprep.mubr.bf16.mxu0 %v11828_v44  ;;  %886 = vmatpush1.bf16.msra.mxu0 %v7058_v15 }
 0x13d   :  { %5859 = vmatmul.mubr.msk.bf16.gmra.mrb[8].mxu1 %vm521_vm0, %v8533_v8  ;;  %887 = vmatprep.subr.bf16.mxu0 %v7066_v47 }
 0x13e   :  { %648 = vmatprep.mubr.bf16.mxu1 %v11828_v44 }
 0x140   :  { %888 = vmatpush1.bf16.msra.mxu0 %v7064_v7 }
 0x141   :  { %6628 = vmatprep.subr.bf16.mxu0 %v7070_v10 }
 0x143   :  { %5862 = vmatmul.mubr.msk.bf16.gmra.mrb[36].mxu0 %vm521_vm0, %v8489_v61 }
 0x144   :  { %711 = vmatprep.mubr.bf16.mxu0 %v11828_v44 }
 0x145   :  { %5860 = vmatmul.mubr.msk.bf16.gmra.mrb[12].mxu1 %vm521_vm0, %v8543_v55 }
 0x146   :  { %804 = vmatprep.mubr.bf16.mxu1 %v11828_v44 }
 0x14b   :  { %5863 = vmatmul.mubr.msk.bf16.gmra.mrb[40].mxu0 %vm521_vm0, %v8496_v36 }
 0x14c   :  { %721 = vmatprep.mubr.bf16.mxu0 %v11828_v44 }
 0x14d   :  { %5869 = vmatmul.mubr.msk.bf16.vlgmr.msra.gmra.mrb[16].mxu1 %vm521_vm0, %v8475_v16 }
 0x14e   :  { %814 = vmatprep.mubr.bf16.mxu1 %v11828_v44  ;;  %999 = vmatpush1.bf16.msra.mxu1 %v7061_v53 }
 0x14f   :  { %1000 = vmatprep.subr.bf16.mxu1 %v7069_v17 }
 0x152   :  { %1001 = vmatpush1.bf16.msra.mxu1 %v7067_v54 }
 0x153   :  { %5864 = vmatmul.mubr.msk.bf16.gmra.mrb[44].mxu0 %vm521_vm0, %v8503_v48 }
 0x154   :  { %731 = vmatprep.mubr.bf16.mxu0 %v11828_v44 }
 0x155   :  { %5870 = vmatmul.mubr.msk.bf16.gmra.mrb[20].mxu1 %vm521_vm0, %v8489_v61 }
 0x156   :  { %824 = vmatprep.mubr.bf16.mxu1 %v11828_v44 }
 0x15b   :  { %5865 = vmatmul.mubr.msk.bf16.gmra.mrb[48].mxu0 %vm521_vm0, %v8510_v14 }
 0x15c   :  { %741 = vmatprep.mubr.bf16.mxu0 %v11828_v44 }
 0x15d   :  { %5871 = vmatmul.mubr.msk.bf16.gmra.mrb[24].mxu1 %vm521_vm0, %v8496_v36 }
 0x15e   :  { %834 = vmatprep.mubr.bf16.mxu1 %v11828_v44 }
 0x163   :  { %5866 = vmatmul.mubr.msk.bf16.gmra.mrb[52].mxu0 %vm521_vm0, %v8527_v3 }
 0x164   :  { %751 = vmatprep.mubr.bf16.mxu0 %v11828_v44 }
 0x165   :  { %5872 = vmatmul.mubr.msk.bf16.gmra.mrb[28].mxu1 %vm521_vm0, %v8503_v48 }
 0x166   :  { %844 = vmatprep.mubr.bf16.mxu1 %v11828_v44 }
 0x16b   :  { %5867 = vmatmul.mubr.msk.bf16.gmra.mrb[56].mxu0 %vm521_vm0, %v8533_v8 }
 0x16c   :  { %761 = vmatprep.mubr.bf16.mxu0 %v11828_v44 }
 0x16d   :  { %5873 = vmatmul.mubr.msk.bf16.gmra.mrb[32].mxu1 %vm521_vm0, %v8510_v14 }
 0x16e   :  { %854 = vmatprep.mubr.bf16.mxu1 %v11828_v44 }
 0x173   :  { %5868 = vmatmul.mubr.msk.bf16.gmra.mrb[60].mxu0 %vm521_vm0, %v8543_v55 }
 0x174   :  { %917 = vmatprep.mubr.bf16.mxu0 %v11828_v44 }
 0x175   :  { %5874 = vmatmul.mubr.msk.bf16.gmra.mrb[36].mxu1 %vm521_vm0, %v8527_v3 }
 0x176   :  { %864 = vmatprep.mubr.bf16.mxu1 %v11828_v44 }
 0x17b   :  { %5877 = vmatmul.mubr.msk.bf16.vlgmr.msra.gmra.mrb[64].mxu0 %vm521_vm0, %v8475_v16 }
 0x17c   :  { %927 = vmatprep.mubr.bf16.mxu0 %v11828_v44  ;;  %6629 = vmatpush3.bf16.msra.mxu0 %v7070_v10 }
 0x17d   :  { %5875 = vmatmul.mubr.msk.bf16.gmra.mrb[40].mxu1 %vm521_vm0, %v8533_v8  ;;  %6630 = vmatprep.subr.bf16.mxu0 %v7071_v49 }
 0x17e   :  { %874 = vmatprep.mubr.bf16.mxu1 %v11828_v44 }
 0x180   :  { %6631 = vmatpush3.bf16.msra.mxu0 %v7071_v49 }
 0x183   :  { %5878 = vmatmul.mubr.msk.bf16.gmra.mrb[68].mxu0 %vm521_vm0, %v8489_v61 }
 0x184   :  { %937 = vmatprep.mubr.bf16.mxu0 %v11828_v44 }
 0x185   :  { %5876 = vmatmul.mubr.msk.bf16.gmra.mrb[44].mxu1 %vm521_vm0, %v8543_v55 }
 0x186   :  { %1030 = vmatprep.mubr.bf16.mxu1 %v11828_v44 }
 0x18b   :  { %5879 = vmatmul.mubr.msk.bf16.gmra.mrb[72].mxu0 %vm521_vm0, %v8496_v36 }
 0x18c   :  { %947 = vmatprep.mubr.bf16.mxu0 %v11828_v44 }
 0x18d   :  { %5885 = vmatmul.mubr.msk.bf16.vlgmr.msra.gmra.mrb[48].mxu1 %vm521_vm0, %v8475_v16 }
 0x18e   :  { %1040 = vmatprep.mubr.bf16.mxu1 %v11828_v44 }
 0x193   :  { %5880 = vmatmul.mubr.msk.bf16.gmra.mrb[76].mxu0 %vm521_vm0, %v8503_v48 }
 0x194   :  { %957 = vmatprep.mubr.bf16.mxu0 %v11828_v44 }
 0x195   :  { %5886 = vmatmul.mubr.msk.bf16.gmra.mrb[52].mxu1 %vm521_vm0, %v8489_v61 }
 0x196   :  { %1050 = vmatprep.mubr.bf16.mxu1 %v11828_v44 }
 0x19b   :  { %5881 = vmatmul.mubr.msk.bf16.gmra.mrb[80].mxu0 %vm521_vm0, %v8510_v14 }
 0x19c   :  { %967 = vmatprep.mubr.bf16.mxu0 %v11828_v44 }
 0x19d   :  { %5887 = vmatmul.mubr.msk.bf16.gmra.mrb[56].mxu1 %vm521_vm0, %v8496_v36 }
 0x19e   :  { %1060 = vmatprep.mubr.bf16.mxu1 %v11828_v44 }
 0x1a3   :  { %5882 = vmatmul.mubr.msk.bf16.gmra.mrb[84].mxu0 %vm521_vm0, %v8527_v3 }
 0x1a4   :  { %977 = vmatprep.mubr.bf16.mxu0 %v11828_v44 }
 0x1a5   :  { %5888 = vmatmul.mubr.msk.bf16.gmra.mrb[60].mxu1 %vm521_vm0, %v8503_v48 }
 0x1a6   :  { %1070 = vmatprep.mubr.bf16.mxu1 %v11828_v44 }
 0x1ab   :  { %5883 = vmatmul.mubr.msk.bf16.gmra.mrb[88].mxu0 %vm521_vm0, %v8533_v8 }
 0x1ac   :  { %987 = vmatprep.mubr.bf16.mxu0 %v11828_v44 }
 0x1ad   :  { %5889 = vmatmul.mubr.msk.bf16.gmra.mrb[64].mxu1 %vm521_vm0, %v8510_v14 }
 0x1ae   :  { %1080 = vmatprep.mubr.bf16.mxu1 %v11828_v44 }
 0x1b3   :  { %5884 = vmatmul.mubr.msk.bf16.gmra.mrb[92].mxu0 %vm521_vm0, %v8543_v55 }
 0x1b4   :  { %6632 = vmatprep.mubr.msk.bf16.mxu0 %vm521_vm0, %v8475_v16  ;;  %v1212_v16 = vlaneseq }
 0x1b5   :  { %5890 = vmatmul.mubr.msk.bf16.gmra.mrb[68].mxu1 %vm521_vm0, %v8527_v3 }
 0x1b6   :  { %1090 = vmatprep.mubr.bf16.mxu1 %v11828_v44  ;;  %v8685_v18 = vshrl.u32 %v1212_v16, 7 }
 0x1b8   :  { %11869 = vst [vmem:[#allocation2_spill] sm:$0xff] %v8685_v18  ;;  %v8688_v19 = vsub.s32 0, %v8685_v18  ;;  %v8696_v21 = vsub.s32 1, %v8685_v18 }
 0x1ba   :  { %11870 = vst [vmem:[#allocation3_spill] sm:$0xff] %v8688_v19  ;;  %11871 = vst [vmem:[#allocation4_spill] sm:$0xff] %v8696_v21  ;;  %v8705_v23 = vrot.slane %v8693_v20, %v8688_v19  ;;  %v8709_v24 = vrot.slane %v8693_v20, %v8696_v21  ;;  %v8713_v27 = vrot.slane %v8701_v22, %v8688_v19 }
 0x1bb   :  { %6633 = vmatmul.mubr.msk.bf16.vlgmr.msra.gmra.mrb[96].mxu0 %vm521_vm0, %v8489_v61  ;;  %v8717_v28 = vrot.slane %v8701_v22, %v8696_v21 }
 0x1bc   :  { %6636 = vmatprep.mubr.msk.bf16.mxu0 %vm521_vm0, %v8496_v36 }
 0x1bd   :  { %5891 = vmatmul.mubr.msk.bf16.gmra.mrb[72].mxu1 %vm521_vm0, %v8533_v8 }
 0x1be   :  { %1100 = vmatprep.mubr.bf16.mxu1 %v11828_v44 }
 0x1c3   :  { %6637 = vmatmul.mubr.msk.bf16.gmra.mrb[100].mxu0 %vm521_vm0, %v8503_v48 }
 0x1c4   :  { %6640 = vmatprep.mubr.msk.bf16.mxu0 %vm521_vm0, %v8510_v14 }
 0x1c5   :  { %5892 = vmatmul.mubr.msk.bf16.gmra.mrb[76].mxu1 %vm521_vm0, %v8543_v55 }
 0x1cb   :  { %6641 = vmatmul.mubr.msk.bf16.gmra.mrb[104].mxu0 %vm521_vm0, %v8527_v3 }
 0x1cc   :  { %6644 = vmatprep.mubr.msk.bf16.mxu0 %vm521_vm0, %v8533_v8 }
 0x1d3   :  { %6645 = vmatmul.mubr.msk.bf16.gmra.mrb[108].mxu0 %vm521_vm0, %v8543_v55 }
 0x1ee   :  { %v580_v61 = vpop.f32.mrb[16].mxu0 }
 0x1ef   :  { %v1267_v62 = vmul.f32 %v8705_v23, %v580_v61  ;;  %v582_v29 = vpop.f32.mrb[17].mxu0 }
 0x1f0   :  { %v1268_v30 = vmul.f32 %v8709_v24, %v582_v29  ;;  %v584_v31 = vpop.f32.mrb[18].mxu0 }
 0x1f1   :  { %v8722_v32 = vadd.f32 %v8713_v27, %v1267_v62  ;;  %v1278_v33 = vmul.f32 %v8705_v23, %v584_v31  ;;  %v586_v34 = vpop.f32.mrb[19].mxu0 }
 0x1f2   :  { %v8726_v35 = vadd.f32 %v8717_v28, %v1268_v30  ;;  %v1279_v36 = vmul.f32 %v8709_v24, %v586_v34 }
 0x1f3   :  { %v5901_v39 = vmul.f32 -1.442695, %v8722_v32  ;;  %v8731_v40 = vadd.f32 %v8713_v27, %v1278_v33 }
 0x1f4   :  { %v5902_v41 = vmul.f32 -1.442695, %v8726_v35  ;;  %v8735_v42 = vadd.f32 %v8717_v28, %v1279_v36 }
 0x1f5   :  { %7488 = vpow2.f32 %v5901_v39  ;;  %v5912_v5 = vmul.f32 -1.442695, %v8731_v40 }
 0x1f6   :  { %7490 = vpow2.f32 %v5902_v41  ;;  %v5913_v6 = vmul.f32 -1.442695, %v8735_v42  ;;  %v590_v43 = vpop.f32.mrb[20].mxu0 }
 0x1f7   :  { %7492 = vpow2.f32 %v5912_v5  ;;  %v1289_v45 = vmul.f32 %v8705_v23, %v590_v43  ;;  %v592_v46 = vpop.f32.mrb[21].mxu0 }
 0x1f8   :  { %7494 = vpow2.f32 %v5913_v6  ;;  %v1290_v48 = vmul.f32 %v8709_v24, %v592_v46  ;;  %v594_v50 = vpop.f32.mrb[22].mxu0 }
 0x1f9   :  { %v8742_v51 = vadd.f32 %v8713_v27, %v1289_v45  ;;  %v1300_v13 = vmul.f32 %v8705_v23, %v594_v50  ;;  %v596_v56 = vpop.f32.mrb[23].mxu0 }
 0x1fa   :  { %v8746_v57 = vadd.f32 %v8717_v28, %v1290_v48  ;;  %v1301_v58 = vmul.f32 %v8709_v24, %v596_v56 }
 0x1fb   :  { %v5923_v59 = vmul.f32 -1.442695, %v8742_v51  ;;  %v8751_v14 = vadd.f32 %v8713_v27, %v1300_v13 }
 0x1fc   :  { %v5924_v60 = vmul.f32 -1.442695, %v8746_v57  ;;  %v8755_v25 = vadd.f32 %v8717_v28, %v1301_v58 }
 0x1fd   :  { %7496 = vpow2.f32 %v5923_v59  ;;  %v5934_v63 = vmul.f32 -1.442695, %v8751_v14 }
 0x1fe   :  { %7498 = vpow2.f32 %v5924_v60  ;;  %v5935_v26 = vmul.f32 -1.442695, %v8755_v25  ;;  %v600_v0 = vpop.f32.mrb[24].mxu0 }
 0x1ff   :  { %v7489_v1 = vpop.eup %7488  ;;  %7500 = vpow2.f32 %v5934_v63  ;;  %v1311_v37 = vmul.f32 %v8705_v23, %v600_v0  ;;  %v602_v2 = vpop.f32.mrb[25].mxu0 }
 0x200   :  { %v7491_v3 = vpop.eup %7490  ;;  %v2206_v38 = vadd.f32 1.0, %v7489_v1  ;;  %7502 = vpow2.f32 %v5935_v26  ;;  %v620_v4 = vpop.f32.mrb[0].mxu1  ;;  %v1312_v8 = vmul.f32 %v8709_v24, %v602_v2 }
 0x201   :  { %v604_v52 = vpop.f32.mrb[26].mxu0  ;;  %v7493_v9 = vpop.eup %7492  ;;  %v2207_v11 = vadd.f32 1.0, %v7491_v3  ;;  %v8762_v12 = vadd.f32 %v8713_v27, %v1311_v37  ;;  %v1355_v55 = vmul.f32 %v8705_v23, %v620_v4 }
 0x202   :  { %v622_v15 = vpop.f32.mrb[1].mxu1  ;;  %v1322_v47 = vmul.f32 %v8705_v23, %v604_v52  ;;  %v606_v7 = vpop.f32.mrb[27].mxu0  ;;  %7504 = vrcp.f32 %v2206_v38  ;;  %v2217_v53 = vadd.f32 1.0, %v7493_v9  ;;  %v8767_v17 = vadd.f32 %v8717_v28, %v1312_v8 }
 0x203   :  { %v7495_v10 = vpop.eup %7494  ;;  %v1356_v54 = vmul.f32 %v8709_v24, %v622_v15  ;;  %v624_v49 = vpop.f32.mrb[2].mxu1  ;;  %7506 = vrcp.f32 %v2207_v11  ;;  %v5945_v61 = vmul.f32 -1.442695, %v8762_v12  ;;  %v8772_v62 = vadd.f32 %v8713_v27, %v1355_v55 }
 0x204   :  { %11872 = vst [vmem:[#allocation5_spill] sm:$0xff] %v8767_v17  ;;  %v2218_v16 = vadd.f32 1.0, %v7495_v10  ;;  %v626_v29 = vpop.f32.mrb[3].mxu1  ;;  %7508 = vrcp.f32 %v2217_v53  ;;  %v5946_v30 = vmul.f32 -1.442695, %v8767_v17  ;;  %v1366_v34 = vmul.f32 %v8705_v23, %v624_v49 }
 0x205   :  { %v8776_v31 = vadd.f32 %v8717_v28, %v1356_v54  ;;  %v5989_v33 = vmul.f32 -1.442695, %v8772_v62  ;;  %v1323_v36 = vmul.f32 %v8709_v24, %v606_v7  ;;  %v8783_v41 = vadd.f32 %v8713_v27, %v1322_v47 }
 0x206   :  { %7510 = vrcp.f32 %v2218_v16  ;;  %v1367_v5 = vmul.f32 %v8709_v24, %v626_v29  ;;  %v610_v6 = vpop.f32.mrb[28].mxu0  ;;  %v8787_v45 = vadd.f32 %v8713_v27, %v1366_v34  ;;  %v8805_v7 = vsub.s32 2, %v8685_v18 }
 0x207   :  { %11873 = vst [vmem:[#allocation6_spill] sm:$0xff] %v8776_v31  ;;  %7512 = vpow2.f32 %v5945_v61  ;;  %v5990_v39 = vmul.f32 -1.442695, %v8776_v31  ;;  %v7497_v43 = vpop.eup %7496  ;;  %v1333_v46 = vmul.f32 %v8705_v23, %v610_v6  ;;  %v612_v48 = vpop.f32.mrb[29].mxu0  ;;  %v8791_v56 = vadd.f32 %v8717_v28, %v1323_v36 }
 0x208   :  { %7514 = vpow2.f32 %v5989_v33  ;;  %v7499_v50 = vpop.eup %7498  ;;  %v2228_v13 = vadd.f32 1.0, %v7497_v43  ;;  %v630_v58 = vpop.f32.mrb[4].mxu1  ;;  %v8794_v26 = vadd.f32 %v8717_v28, %v1367_v5  ;;  %v5956_v2 = vmul.f32 -1.442695, %v8783_v41  ;;  %11875 = vst [vmem:[#allocation8_spill] sm:$0xff] %v8805_v7 }
 0x209   :  { %7516 = vpow2.f32 %v5946_v30  ;;  %v614_v59 = vpop.f32.mrb[30].mxu0  ;;  %v7501_v60 = vpop.eup %7500  ;;  %v2229_v63 = vadd.f32 1.0, %v7499_v50  ;;  %v8798_v3 = vadd.f32 %v8713_v27, %v1333_v46  ;;  %v6000_v52 = vmul.f32 -1.442695, %v8787_v45 }
 0x20a   :  { %7518 = vpow2.f32 %v5990_v39  ;;  %11874 = vst [vmem:[#allocation7_spill] sm:$0xff] %v8794_v26  ;;  %v632_v0 = vpop.f32.mrb[5].mxu1  ;;  %v7503_v1 = vpop.eup %7502  ;;  %v2239_v37 = vadd.f32 1.0, %v7501_v60  ;;  %v1377_v9 = vmul.f32 %v8705_v23, %v630_v58  ;;  %v5957_v15 = vmul.f32 -1.442695, %v8791_v56 }
 0x20b   :  { %7520 = vrcp.f32 %v2228_v13  ;;  %v634_v38 = vpop.f32.mrb[6].mxu1  ;;  %v616_v4 = vpop.f32.mrb[31].mxu0  ;;  %v2240_v8 = vadd.f32 1.0, %v7503_v1  ;;  %v1334_v47 = vmul.f32 %v8709_v24, %v612_v48  ;;  %v6001_v53 = vmul.f32 -1.442695, %v8794_v26 }
 0x20c   :  { %7522 = vrcp.f32 %v2229_v63  ;;  %v636_v11 = vpop.f32.mrb[7].mxu1  ;;  %v7505_v55 = vpop.eup %7504  ;;  %v1378_v54 = vmul.f32 %v8709_v24, %v632_v0  ;;  %v5967_v16 = vmul.f32 -1.442695, %v8798_v3  ;;  %v1344_v61 = vmul.f32 %v8705_v23, %v614_v59 }
 0x20d   :  { %7524 = vrcp.f32 %v2239_v37  ;;  %v8807_v10 = vpop.eup %7506  ;;  %v8816_v33 = vmul.f32 %v7505_v55, %v8722_v32  ;;  %v8822_v36 = vadd.f32 %v8713_v27, %v1377_v9  ;;  %v8825_v6 = vadd.f32 %v8717_v28, %v1334_v47 }
 0x20e   :  { %7526 = vrcp.f32 %v2240_v8  ;;  %v7509_v49 = vpop.eup %7508  ;;  %v693_v29 = vpop.f32.mrb[32].mxu0  ;;  %v8829_v46 = vrot.slane %v8693_v20, %v8805_v7  ;;  %v1226_v32 = vsub.s32 3, %v8685_v18  ;;  %v8837_v58 = vadd.f32 %v8717_v28, %v1378_v54 }
 0x20f   :  { %7528 = vpow2.f32 %v5956_v2  ;;  %v8819_v34 = vmul.f32 %v7509_v49, %v8731_v40  ;;  %v695_v39 = vpop.f32.mrb[33].mxu0  ;;  %11876 = vst [vmem:[#allocation9_spill] sm:$0xff] %v8825_v6  ;;  %v8842_v1 = vadd.f32 %v8713_v27, %v1344_v61  ;;  %v1388_v37 = vmul.f32 %v8705_v23, %v634_v38 }
 0x210   :  { %v8813_v30 = vpop.eup %7510  ;;  %7530 = vpow2.f32 %v6000_v52  ;;  %v640_v43 = vpop.f32.mrb[8].mxu1  ;;  %11877 = vst [vmem:[#allocation10_spill] sm:$0xff] %v8837_v58  ;;  %v6011_v9 = vmul.f32 -1.442695, %v8822_v36  ;;  %v8850_v55 = vrot.slane %v8701_v22, %v8805_v7  ;;  %v5968_v54 = vmul.f32 -1.442695, %v8825_v6 }
 0x211   :  { %v7513_v5 = vpop.eup %7512  ;;  %7532 = vpow2.f32 %v5957_v15  ;;  %v8832_v48 = vpop.f32.mrb[34].mxu0  ;;  %v1345_v38 = vmul.f32 %v8709_v24, %v616_v4  ;;  %v8860_v61 = vrot.slane %v8693_v20, %v1226_v32  ;;  %v1389_v4 = vmul.f32 %v8709_v24, %v636_v11 }
 0x212   :  { %v7515_v40 = vpop.eup %7514  ;;  %v2250_v13 = vadd.f32 1.0, %v7513_v5  ;;  %7534 = vpow2.f32 %v6001_v53  ;;  %v642_v59 = vpop.f32.mrb[9].mxu1  ;;  %v8863_v5 = vrot.slane %v8701_v22, %v1226_v32  ;;  %v1399_v32 = vmul.f32 %v8705_v23, %v640_v43 }
 0x213   :  { %v8839_v60 = vpop.f32.mrb[35].mxu0  ;;  %v7517_v63 = vpop.eup %7516  ;;  %v2294_v0 = vadd.f32 1.0, %v7515_v40  ;;  %7536 = vpow2.f32 %v5967_v16  ;;  %v6012_v16 = vmul.f32 -1.442695, %v8837_v58  ;;  %v1269_v11 = vmul.f32 %v8829_v46, %v693_v29 }
 0x214   :  { %v8845_v2 = vpop.f32.mrb[10].mxu1  ;;  %v7519_v8 = vpop.eup %7518  ;;  %7538 = vrcp.f32 %v2250_v13  ;;  %v2251_v52 = vadd.f32 1.0, %v7517_v63  ;;  %v5978_v13 = vmul.f32 -1.442695, %v8842_v1  ;;  %v8867_v63 = vadd.f32 %v8713_v27, %v1388_v37 }
 0x215   :  { %v8852_v15 = vpop.f32.mrb[11].mxu1  ;;  %v7521_v47 = vpop.eup %7520  ;;  %7540 = vrcp.f32 %v2294_v0  ;;  %v2295_v53 = vadd.f32 1.0, %v7519_v8  ;;  %v8884_v37 = vadd.f32 %v8717_v28, %v1345_v38  ;;  %v1400_v7 = vmul.f32 %v8709_v24, %v642_v59 }
 0x216   :  { %v8856_v49 = vpop.eup %7522  ;;  %7542 = vrcp.f32 %v2251_v52  ;;  %v8870_v0 = vpop.f32.mrb[36].mxu0  ;;  %v8875_v52 = vmul.f32 %v7521_v47, %v8742_v51  ;;  %v1270_v43 = vmul.f32 %v8860_v61, %v695_v39  ;;  %v2746_v29 = vmul.f32 %v8813_v30, %v8735_v42 }
 0x217   :  { %v7525_v40 = vpop.eup %7524  ;;  %7544 = vrcp.f32 %v2295_v53  ;;  %v8881_v53 = vpop.f32.mrb[37].mxu0  ;;  %11878 = vst [vmem:[#allocation11_spill] sm:$0xff] %v8884_v37  ;;  %v8900_v19 = vadd.f32 %v8717_v28, %v1389_v4  ;;  %v6022_v39 = vmul.f32 -1.442695, %v8867_v63  ;;  %v8911_v30 = vadd.f32 %v8850_v55, %v1269_v11 }
 0x218   :  { %v8872_v8 = vpop.eup %7526  ;;  %v8878_v44 = vmul.f32 %v7525_v40, %v8751_v14  ;;  %7546 = vpow2.f32 %v6011_v9  ;;  %v650_v21 = vpop.f32.mrb[12].mxu1  ;;  %v1280_v11 = vmul.f32 %v8829_v46, %v8832_v48 }
 0x219   :  { %v7529_v50 = vpop.eup %7528  ;;  %7548 = vpow2.f32 %v5968_v54  ;;  %v8888_v51 = vpop.f32.mrb[38].mxu0  ;;  %11879 = vst [vmem:[#allocation12_spill] sm:$0xff] %v8900_v19  ;;  %11881 = vst [vmem:[#allocation14_spill] sm:$0xff] %v8911_v30  ;;  %v6023_v31 = vmul.f32 -1.442695, %v8900_v19 }
 0x21a   :  { %v7531_v47 = vpop.eup %7530  ;;  %v2261_v9 = vadd.f32 1.0, %v7529_v50  ;;  %7550 = vpow2.f32 %v6012_v16  ;;  %v8893_v40 = vpop.f32.mrb[13].mxu1  ;;  %v8906_v16 = vadd.f32 %v8713_v27, %v1399_v32 }
 0x21b   :  { %v8895_v54 = vpop.f32.mrb[39].mxu0  ;;  %v7533_v38 = vpop.eup %7532  ;;  %v2305_v59 = vadd.f32 1.0, %v7531_v47  ;;  %7552 = vpow2.f32 %v5978_v13  ;;  %v8914_v13 = vadd.f32 %v8717_v28, %v1400_v7 }
 0x21c   :  { %v8902_v58 = vpop.f32.mrb[14].mxu1  ;;  %v7535_v14 = vpop.eup %7534  ;;  %7554 = vrcp.f32 %v2261_v9  ;;  %v2262_v50 = vadd.f32 1.0, %v7533_v38  ;;  %11880 = vst [vmem:[#allocation13_spill] sm:$0xff] %v8906_v16  ;;  %v5979_v9 = vmul.f32 -1.442695, %v8884_v37  ;;  %v8918_v38 = vadd.f32 %v8863_v5, %v1270_v43 }
 0x21d   :  { %v8908_v6 = vpop.f32.mrb[15].mxu1  ;;  %v7537_v26 = vpop.eup %7536  ;;  %7556 = vrcp.f32 %v2305_v59  ;;  %v2306_v42 = vadd.f32 1.0, %v7535_v14  ;;  %11882 = vst [vmem:[#allocation15_spill] sm:$0xff] %v8914_v13  ;;  %v1410_v14 = vmul.f32 %v8705_v23, %v8845_v2  ;;  %v6033_v43 = vmul.f32 -1.442695, %v8906_v16 }
 0x21e   :  { %v7539_v4 = vpop.eup %7538  ;;  %7558 = vrcp.f32 %v2262_v50  ;;  %v2272_v47 = vadd.f32 1.0, %v7537_v26  ;;  %11883 = vst [vmem:[#allocation16_spill] sm:$0xff] %v8918_v38  ;;  %v8925_v7 = vpop.f32.mrb[40].mxu0  ;;  %v2735_v26 = vmul.f32 %v8807_v10, %v8726_v35  ;;  %v5903_v2 = vmul.f32 -1.442695, %v8911_v30 }
 0x21f   :  { %v7541_v32 = vpop.eup %7540  ;;  %7560 = vrcp.f32 %v2306_v42  ;;  %v8932_v50 = vpop.f32.mrb[41].mxu0  ;;  %v6034_v19 = vmul.f32 -1.442695, %v8914_v13  ;;  %v5904_v35 = vmul.f32 -1.442695, %v8918_v38  ;;  %v8949_v13 = vadd.f32 %v8713_v27, %v1410_v14 }
 0x220   :  { %v8927_v59 = vpop.eup %7542  ;;  %7562 = vrcp.f32 %v2272_v47  ;;  %v8938_v48 = vpop.f32.mrb[16].mxu1  ;;  %v6770_v10 = vpack.c.bf16 %v2746_v29, %v2735_v26  ;;  %v1421_v47 = vmul.f32 %v8705_v23, %v650_v21  ;;  %v8952_v30 = vadd.f32 %v8850_v55, %v1280_v11 }
 0x221   :  { %11884 = vst [vmem:[#allocation17_spill] sm:$0xff] %v8927_v59  ;;  %v8934_v42 = vpop.eup %7544  ;;  %7564 = vpow2.f32 %v6022_v39  ;;  %v8940_v37 = vpop.f32.mrb[42].mxu0  ;;  %v8957_v29 = vmul.f32 %v7539_v4, %v8762_v12  ;;  %v1411_v11 = vmul.f32 %v8709_v24, %v8852_v15  ;;  %v11887_v38 = vpack.c.bf16 %v8819_v34, %v8816_v33 }
 0x222   :  { %11885 = vst [vmem:[#allocation18_spill] sm:$0xff] %v8934_v42  ;;  %11886 = vst [vmem:[#allocation19_spill] sm:$0xff] %v8940_v37  ;;  %v7547_v59 = vpop.eup %7546  ;;  %7566 = vpow2.f32 %v5979_v9  ;;  %v8944_v16 = vpop.f32.mrb[17].mxu1  ;;  %6771 = vmatprep.subr.bf16.mxu1 %v6770_v10  ;;  %v8960_v26 = vadd.f32 %v8713_v27, %v1421_v47  ;;  %v1422_v12 = vmul.f32 %v8709_v24, %v8893_v40  ;;  %v6044_v33 = vmul.f32 -1.442695, %v8949_v13 }
 0x223   :  { %v8946_v17 = vpop.f32.mrb[43].mxu0  ;;  %v7549_v39 = vpop.eup %7548  ;;  %v2316_v42 = vadd.f32 1.0, %v7547_v59  ;;  %7568 = vpow2.f32 %v6023_v31  ;;  %6773 = vmatpush1.bf16.msra.mxu1 %v11887_v38 }
 0x224   :  { %v8954_v37 = vpop.f32.mrb[18].mxu1  ;;  %v7551_v9 = vpop.eup %7550  ;;  %v2273_v21 = vadd.f32 1.0, %v7549_v39  ;;  %7570 = vpow2.f32 %v6033_v43  ;;  %v8972_v43 = vmul.f32 %v7541_v32, %v8772_v62  ;;  %v8981_v34 = vadd.f32 %v8717_v28, %v1422_v12 }
 0x225   :  { %v8962_v59 = vpop.f32.mrb[19].mxu1  ;;  %v7553_v31 = vpop.eup %7552  ;;  %7572 = vrcp.f32 %v2316_v42  ;;  %v2317_v14 = vadd.f32 1.0, %v7551_v9  ;;  %v1281_v42 = vmul.f32 %v8860_v61, %v8839_v60  ;;  %v5914_v60 = vmul.f32 -1.442695, %v8952_v30 }
 0x226   :  { %v7555_v4 = vpop.eup %7554  ;;  %11888 = vst [vmem:[#allocation20_spill] sm:$0xff] %v8972_v43  ;;  %7574 = vrcp.f32 %v2273_v21  ;;  %v2283_v10 = vadd.f32 1.0, %v7553_v31  ;;  %11889 = vst [vmem:[#allocation21_spill] sm:$0xff] %v8981_v34  ;;  %v8983_v15 = vpop.f32.mrb[44].mxu0  ;;  %v9000_v21 = vadd.f32 %v8717_v28, %v1411_v11  ;;  %v1433_v43 = vmul.f32 %v8709_v24, %v8908_v6 }
 0x227   :  { %v7557_v47 = vpop.eup %7556  ;;  %v8977_v39 = vmul.f32 %v7555_v4, %v8783_v41  ;;  %7576 = vrcp.f32 %v2317_v14  ;;  %v1432_v41 = vmul.f32 %v8705_v23, %v8902_v58  ;;  %v8993_v38 = vpop.f32.mrb[45].mxu0  ;;  %v9011_v58 = vadd.f32 %v8863_v5, %v1281_v42 }
 0x228   :  { %v8985_v40 = vpop.eup %7558  ;;  %v8988_v62 = vmul.f32 %v7557_v47, %v8787_v45  ;;  %7578 = vrcp.f32 %v2283_v10  ;;  %v1291_v45 = vmul.f32 %v8829_v46, %v8870_v0  ;;  %v9004_v31 = vpop.f32.mrb[20].mxu1  ;;  %v2768_v0 = vmul.f32 %v8872_v8, %v8755_v25 }
 0x229   :  { %v8995_v32 = vpop.eup %7560  ;;  %7580 = vpow2.f32 %v5903_v2  ;;  %v9006_v14 = vpop.f32.mrb[46].mxu0  ;;  %v9020_v10 = vadd.f32 %v8713_v27, %v1432_v41  ;;  %v1230_v47 = vsub.s32 4, %v8685_v18  ;;  %v2757_v42 = vmul.f32 %v8856_v49, %v8746_v57 }
 0x22a   :  { %11890 = vst [vmem:[#allocation22_spill] sm:$0xff] %v8988_v62  ;;  %v7563_v12 = vpop.eup %7562  ;;  %7582 = vpow2.f32 %v6034_v19  ;;  %v9013_v4 = vpop.f32.mrb[21].mxu1  ;;  %v6045_v27 = vmul.f32 -1.442695, %v9000_v21  ;;  %v5915_v57 = vmul.f32 -1.442695, %v9011_v58  ;;  %v9037_v49 = vadd.f32 %v8717_v28, %v1433_v43 }
 0x22b   :  { %v9015_v2 = vpop.f32.mrb[47].mxu0  ;;  %v7565_v11 = vpop.eup %7564  ;;  %7584 = vpow2.f32 %v5904_v35  ;;  %v9033_v35 = vadd.f32 %v8850_v55, %v1291_v45  ;;  %v1292_v6 = vmul.f32 %v8860_v61, %v8881_v53  ;;  %v6055_v45 = vmul.f32 -1.442695, %v8960_v26 }
 0x22c   :  { %11891 = vst [vmem:[#allocation23_spill] sm:$0xff] %v9015_v2  ;;  %v9023_v9 = vpop.f32.mrb[22].mxu1  ;;  %v7567_v19 = vpop.eup %7566  ;;  %v2327_v23 = vadd.f32 1.0, %v7565_v11  ;;  %7586 = vpow2.f32 %v6044_v33 }
 0x22d   :  { %v9029_v62 = vpop.f32.mrb[23].mxu1  ;;  %v7569_v25 = vpop.eup %7568  ;;  %v2284_v8 = vadd.f32 1.0, %v7567_v19  ;;  %7588 = vpow2.f32 %v5914_v60  ;;  %v6774_v60 = vpack.c.bf16 %v2768_v0, %v2757_v42  ;;  %v5925_v43 = vmul.f32 -1.442695, %v9033_v35 }
 0x22e   :  { %v7571_v41 = vpop.eup %7570  ;;  %7590 = vrcp.f32 %v2327_v23  ;;  %v2328_v2 = vadd.f32 1.0, %v7569_v25  ;;  %v9041_v11 = vpop.f32.mrb[48].mxu0  ;;  %v1234_v23 = vsub.s32 5, %v8685_v18  ;;  %v11894_v42 = vpack.c.bf16 %v8878_v44, %v8875_v52 }
 0x22f   :  { %v7573_v33 = vpop.eup %7572  ;;  %7592 = vrcp.f32 %v2284_v8  ;;  %v2338_v24 = vadd.f32 1.0, %v7571_v41  ;;  %v9047_v25 = vpop.f32.mrb[49].mxu0  ;;  %6775 = vmatprep.subr.bf16.mxu1 %v6774_v60  ;;  %v9062_v41 = vrot.slane %v8693_v20, %v1230_v47 }
 0x230   :  { %v9043_v19 = vpop.eup %7574  ;;  %7594 = vrcp.f32 %v2328_v2  ;;  %11892 = vst [vmem:[#allocation24_spill] sm:$0xff] %v9047_v25  ;;  %v9052_v8 = vpop.f32.mrb[24].mxu1  ;;  %v1302_v2 = vmul.f32 %v8829_v46, %v8888_v51  ;;  %6777 = vmatpush1.bf16.msra.mxu1 %v11894_v42  ;;  %v9069_v25 = vmul.f32 %v7563_v12, %v8798_v3  ;;  %v9075_v51 = vadd.f32 %v8863_v5, %v1292_v6 }
 0x231   :  { %v9049_v28 = vpop.eup %7576  ;;  %7596 = vrcp.f32 %v2338_v24  ;;  %v9054_v53 = vpop.f32.mrb[50].mxu0  ;;  %v9090_v6 = vrot.slane %v8701_v22, %v1234_v23 }
 0x232   :  { %11893 = vst [vmem:[#allocation25_spill] sm:$0xff] %v9054_v53  ;;  %v7579_v0 = vpop.eup %7578  ;;  %7598 = vpow2.f32 %v6045_v27  ;;  %v9064_v24 = vpop.f32.mrb[25].mxu1  ;;  %11896 = vst [vmem:[#allocation27_spill] sm:$0xff] %v9075_v51  ;;  %v9080_v53 = vrot.slane %v8701_v22, %v1230_v47 }
 0x233   :  { %v9066_v18 = vpop.f32.mrb[51].mxu0  ;;  %v7581_v60 = vpop.eup %7580  ;;  %v9072_v27 = vmul.f32 %v7579_v0, %v8842_v1  ;;  %7600 = vpow2.f32 %v5915_v57  ;;  %v6066_v1 = vmul.f32 -1.442695, %v9020_v10 }
 0x234   :  { %11895 = vst [vmem:[#allocation26_spill] sm:$0xff] %v9066_v18  ;;  %v9077_v44 = vpop.f32.mrb[26].mxu1  ;;  %v7583_v52 = vpop.eup %7582  ;;  %v2208_v42 = vadd.f32 1.0, %v7581_v60  ;;  %7602 = vpow2.f32 %v6055_v45  ;;  %v9083_v18 = vrot.slane %v8693_v20, %v1234_v23  ;;  %v2790_v45 = vmul.f32 %v8985_v40, %v8791_v56 }
 0x235   :  { %11897 = vst [vmem:[#allocation28_spill] sm:$0xff] %v9077_v44  ;;  %v9085_v3 = vpop.f32.mrb[27].mxu1  ;;  %v7585_v12 = vpop.eup %7584  ;;  %v2339_v57 = vadd.f32 1.0, %v7583_v52  ;;  %7604 = vpow2.f32 %v5925_v43  ;;  %v9095_v20 = vadd.f32 %v8850_v55, %v1302_v2  ;;  %v6056_v44 = vmul.f32 -1.442695, %v8981_v34 }
 0x236   :  { %11898 = vst [vmem:[#allocation29_spill] sm:$0xff] %v9085_v3  ;;  %v7587_v0 = vpop.eup %7586  ;;  %7606 = vrcp.f32 %v2208_v42  ;;  %v2209_v47 = vadd.f32 1.0, %v7585_v12  ;;  %v5926_v52 = vmul.f32 -1.442695, %v9075_v51  ;;  %v9099_v43 = vpop.f32.mrb[52].mxu0  ;;  %v1303_v56 = vmul.f32 %v8860_v61, %v8895_v54  ;;  %v11909_v51 = vld [vmem:[#allocation6_spill] sm:$0xff] }
 0x237   :  { %v7589_v60 = vpop.eup %7588  ;;  %7608 = vrcp.f32 %v2339_v57  ;;  %v2349_v3 = vadd.f32 1.0, %v7587_v0  ;;  %11899 = vst [vmem:[#allocation30_spill] sm:$0xff] %v9099_v43  ;;  %v9104_v40 = vpop.f32.mrb[53].mxu0  ;;  %v9109_v42 = vmul.f32 %v7573_v33, %v8822_v36  ;;  %v1313_v57 = vmul.f32 %v8829_v46, %v8925_v7 }
 0x238   :  { %v7591_v22 = vpop.eup %7590  ;;  %7610 = vrcp.f32 %v2209_v47  ;;  %v2219_v23 = vadd.f32 1.0, %v7589_v60  ;;  %11900 = vst [vmem:[#allocation31_spill] sm:$0xff] %v9104_v40  ;;  %v9116_v0 = vpop.f32.mrb[28].mxu1  ;;  %v5936_v54 = vmul.f32 -1.442695, %v9095_v20  ;;  %v1271_v36 = vmul.f32 %v9062_v41, %v8938_v48  ;;  %v11907_v40 = vld [vmem:[#allocation17_spill] sm:$0xff] }
 0x239   :  { %v9106_v2 = vpop.eup %7592  ;;  %11901 = vst [vmem:[#allocation32_spill] sm:$0xff] %v9109_v42  ;;  %v9112_v12 = vmul.f32 %v7591_v22, %v8867_v63  ;;  %7612 = vrcp.f32 %v2349_v3  ;;  %11902 = vst [vmem:[#allocation33_spill] sm:$0xff] %v9116_v0  ;;  %v9118_v47 = vpop.f32.mrb[54].mxu0  ;;  %v1314_v63 = vmul.f32 %v8860_v61, %v8932_v50  ;;  %v11906_v22 = vld [vmem:[#allocation5_spill] sm:$0xff]  ;;  %v11910_v50 = vld [vmem:[#allocation18_spill] sm:$0xff] }
 0x23a   :  { %11903 = vst [vmem:[#allocation34_spill] sm:$0xff] %v9118_v47  ;;  %v9120_v60 = vpop.eup %7594  ;;  %7614 = vrcp.f32 %v2219_v23  ;;  %v9127_v33 = vpop.f32.mrb[29].mxu1  ;;  %v2779_v0 = vmul.f32 %v11907_v40, %v11906_v22  ;;  %v1272_v23 = vmul.f32 %v9083_v18, %v8944_v16  ;;  %v9141_v34 = vmul.f32 %v11910_v50, %v11909_v51 }
 0x23b   :  { %11904 = vst [vmem:[#allocation35_spill] sm:$0xff] %v9127_v33  ;;  %v9129_v3 = vpop.f32.mrb[55].mxu0  ;;  %v7597_v7 = vpop.eup %7596  ;;  %7616 = vpow2.f32 %v6056_v44  ;;  %v9145_v33 = vadd.f32 %v8863_v5, %v1303_v56  ;;  %v9150_v16 = vadd.f32 %v8850_v55, %v1313_v57  ;;  %v9153_v51 = vadd.f32 %v9080_v53, %v1271_v36 }
 0x23c   :  { %11905 = vst [vmem:[#allocation36_spill] sm:$0xff] %v9129_v3  ;;  %v9137_v43 = vpop.f32.mrb[30].mxu1  ;;  %v7599_v48 = vpop.eup %7598  ;;  %7618 = vpow2.f32 %v5926_v52  ;;  %v6067_v3 = vmul.f32 -1.442695, %v9037_v49  ;;  %v6778_v47 = vpack.c.bf16 %v2790_v45, %v2779_v0  ;;  %v9156_v52 = vadd.f32 %v8863_v5, %v1314_v63 }
 0x23d   :  { %11908 = vst [vmem:[#allocation5_spill] sm:$0xff] %v9137_v43  ;;  %v9147_v40 = vpop.f32.mrb[31].mxu1  ;;  %v7601_v22 = vpop.eup %7600  ;;  %v2350_v44 = vadd.f32 1.0, %v7599_v48  ;;  %7620 = vpow2.f32 %v6066_v1  ;;  %11912 = vst [vmem:[#allocation6_spill] sm:$0xff] %v9153_v51  ;;  %v11915_v1 = vld [vmem:[#allocation19_spill] sm:$0xff] }
 0x23e   :  { %11911 = vst [vmem:[#allocation17_spill] sm:$0xff] %v9147_v40  ;;  %v7603_v43 = vpop.eup %7602  ;;  %v2220_v42 = vadd.f32 1.0, %v7601_v22  ;;  %7622 = vpow2.f32 %v5936_v54  ;;  %11913 = vst [vmem:[#allocation18_spill] sm:$0xff] %v9156_v52  ;;  %v9159_v40 = vadd.f32 %v9090_v6, %v1272_v23  ;;  %v1324_v57 = vmul.f32 %v8829_v46, %v11915_v1  ;;  %6779 = vmatprep.subr.bf16.mxu1 %v6778_v47  ;;  %v9163_v45 = vpop.f32.mrb[56].mxu0  ;;  %v11917_v54 = vld [vmem:[#allocation7_spill] sm:$0xff]  ;;  %v11920_v47 = vld [vmem:[#allocation9_spill] sm:$0xff] }
 0x23f   :  { %v7605_v56 = vpop.eup %7604  ;;  %7624 = vrcp.f32 %v2350_v44  ;;  %v2360_v50 = vadd.f32 1.0, %v7603_v43  ;;  %11916 = vst [vmem:[#allocation19_spill] sm:$0xff] %v9163_v45  ;;  %v9167_v36 = vmul.f32 %v8995_v32, %v11917_v54  ;;  %v5937_v48 = vmul.f32 -1.442695, %v9145_v33  ;;  %v9173_v23 = vpop.f32.mrb[57].mxu0  ;;  %v11926_v45 = vld [vmem:[#allocation11_spill] sm:$0xff] }
 0x240   :  { %11914 = vst [vmem:[#allocation37_spill] sm:$0xff] %v9159_v40  ;;  %v7607_v0 = vpop.eup %7606  ;;  %7626 = vrcp.f32 %v2220_v42  ;;  %v2230_v63 = vadd.f32 1.0, %v7605_v56  ;;  %v11918_v43 = vpack.c.bf16 %v8977_v39, %v8957_v29  ;;  %11919 = vst [vmem:[#allocation7_spill] sm:$0xff] %v9173_v23  ;;  %v9179_v44 = vmul.f32 %v9043_v19, %v11920_v47  ;;  %v9184_v56 = vpop.f32.mrb[32].mxu1 }
 0x241   :  { %v9175_v22 = vpop.eup %7608  ;;  %7628 = vrcp.f32 %v2360_v50  ;;  %v5947_v32 = vmul.f32 -1.442695, %v9150_v16  ;;  %v1282_v42 = vmul.f32 %v9062_v41, %v8954_v37  ;;  %11921 = vst [vmem:[#allocation9_spill] sm:$0xff] %v9184_v56  ;;  %v9186_v1 = vpop.f32.mrb[58].mxu0  ;;  %v5905_v39 = vmul.f32 -1.442695, %v9153_v51 }
 0x242   :  { %6781 = vmatpush1.bf16.msra.mxu1 %v11918_v43  ;;  %11922 = vst [vmem:[#allocation38_spill] sm:$0xff] %v9186_v1  ;;  %v9188_v29 = vpop.eup %7610  ;;  %7630 = vrcp.f32 %v2230_v63  ;;  %v5948_v54 = vmul.f32 -1.442695, %v9156_v52  ;;  %v1325_v19 = vmul.f32 %v8860_v61, %v8946_v17  ;;  %v9194_v50 = vpop.f32.mrb[33].mxu1  ;;  %v5906_v37 = vmul.f32 -1.442695, %v9159_v40 }
 0x243   :  { %11923 = vst [vmem:[#allocation39_spill] sm:$0xff] %v9194_v50  ;;  %v9196_v43 = vpop.f32.mrb[59].mxu0  ;;  %v7613_v47 = vpop.eup %7612  ;;  %7632 = vpow2.f32 %v6067_v3  ;;  %v9200_v1 = vadd.f32 %v8850_v55, %v1324_v57  ;;  %v1283_v63 = vmul.f32 %v9083_v18, %v8962_v59  ;;  %v2812_v17 = vmul.f32 %v9106_v2, %v11926_v45  ;;  %v11927_v52 = vld [vmem:[#allocation13_spill] sm:$0xff]  ;;  %v11928_v40 = vld [vmem:[#allocation14_spill] sm:$0xff] }
 0x244   :  { %11924 = vst [vmem:[#allocation40_spill] sm:$0xff] %v9196_v43  ;;  %v9204_v23 = vpop.f32.mrb[34].mxu1  ;;  %v7615_v56 = vpop.eup %7614  ;;  %v9209_v50 = vmul.f32 %v7597_v7, %v11927_v52  ;;  %v9212_v43 = vmul.f32 %v7613_v47, %v8949_v13  ;;  %7634 = vpow2.f32 %v5937_v48  ;;  %v9217_v51 = vmul.f32 %v7607_v0, %v11928_v40 }
 0x245   :  { %11925 = vst [vmem:[#allocation41_spill] sm:$0xff] %v9204_v23  ;;  %v9214_v3 = vpop.f32.mrb[35].mxu1  ;;  %v7617_v57 = vpop.eup %7616  ;;  %v9220_v59 = vmul.f32 %v7615_v56, %v8952_v30  ;;  %7636 = vpow2.f32 %v5947_v32  ;;  %v9223_v23 = vadd.f32 %v9080_v53, %v1282_v42  ;;  %v9228_v52 = vadd.f32 %v8863_v5, %v1325_v19 }
 0x246   :  { %v7619_v2 = vpop.eup %7618  ;;  %v2361_v13 = vadd.f32 1.0, %v7617_v57  ;;  %7638 = vpow2.f32 %v5905_v39  ;;  %v5958_v30 = vmul.f32 -1.442695, %v9200_v1  ;;  %v9233_v48 = vpop.f32.mrb[60].mxu0  ;;  %v9236_v56 = vadd.f32 %v9090_v6, %v1283_v63 }
 0x247   :  { %v7621_v45 = vpop.eup %7620  ;;  %v2231_v0 = vadd.f32 1.0, %v7619_v2  ;;  %7640 = vpow2.f32 %v5948_v54  ;;  %11929 = vst [vmem:[#allocation11_spill] sm:$0xff] %v9233_v48  ;;  %v1335_v39 = vmul.f32 %v8829_v46, %v8983_v15  ;;  %v9240_v19 = vpop.f32.mrb[61].mxu0  ;;  %v1293_v54 = vmul.f32 %v9062_v41, %v9004_v31 }
 0x248   :  { %v7623_v32 = vpop.eup %7622  ;;  %7642 = vrcp.f32 %v2361_v13  ;;  %v2371_v42 = vadd.f32 1.0, %v7621_v45  ;;  %11930 = vst [vmem:[#allocation13_spill] sm:$0xff] %v9240_v19  ;;  %v1336_v2 = vmul.f32 %v8860_v61, %v8993_v38  ;;  %v9248_v13 = vpop.f32.mrb[36].mxu1  ;;  %v5916_v15 = vmul.f32 -1.442695, %v9223_v23  ;;  %v11935_v38 = vld [vmem:[#allocation10_spill] sm:$0xff] }
 0x249   :  { %v9242_v47 = vpop.eup %7624  ;;  %7644 = vrcp.f32 %v2231_v0  ;;  %v2241_v57 = vadd.f32 1.0, %v7623_v32  ;;  %11931 = vst [vmem:[#allocation14_spill] sm:$0xff] %v9248_v13  ;;  %v9250_v45 = vpop.f32.mrb[62].mxu0  ;;  %v1294_v7 = vmul.f32 %v9083_v18, %v9013_v4  ;;  %v6782_v0 = vpack.c.bf16 %v2812_v17, %v9179_v44  ;;  %v11937_v4 = vld [vmem:[#allocation12_spill] sm:$0xff] }
 0x24a   :  { %11932 = vst [vmem:[#allocation42_spill] sm:$0xff] %v9250_v45  ;;  %v9252_v63 = vpop.eup %7626  ;;  %7646 = vrcp.f32 %v2371_v42  ;;  %v9258_v32 = vpop.f32.mrb[37].mxu1  ;;  %v9266_v19 = vmul.f32 %v9049_v28, %v11935_v38  ;;  %v5959_v42 = vmul.f32 -1.442695, %v9228_v52  ;;  %v9275_v44 = vmul.f32 %v9120_v60, %v11937_v4 }
 0x24b   :  { %11933 = vst [vmem:[#allocation43_spill] sm:$0xff] %v9258_v32  ;;  %v9260_v31 = vpop.f32.mrb[63].mxu0  ;;  %v9262_v40 = vpop.eup %7628  ;;  %7648 = vrcp.f32 %v2241_v57  ;;  %v9278_v17 = vadd.f32 %v8850_v55, %v1335_v39  ;;  %6783 = vmatprep.subr.bf16.mxu1 %v6782_v0  ;;  %v6786_v28 = vpack.c.bf16 %v9167_v36, %v9141_v34  ;;  %v9289_v60 = vadd.f32 %v8863_v5, %v1336_v2  ;;  %v11940_v0 = vld [vmem:[#allocation15_spill] sm:$0xff] }
 0x24c   :  { %11934 = vst [vmem:[#allocation44_spill] sm:$0xff] %v9260_v31  ;;  %v9269_v45 = vpop.f32.mrb[38].mxu1  ;;  %v9271_v13 = vpop.eup %7630  ;;  %7650 = vpow2.f32 %v5906_v37  ;;  %v5917_v31 = vmul.f32 -1.442695, %v9236_v56  ;;  %v11939_v37 = vpack.c.bf16 %v9072_v27, %v9069_v25  ;;  %v9296_v34 = vmul.f32 %v9175_v22, %v11940_v0  ;;  %v11944_v0 = vld [vmem:[#allocation22_spill] sm:$0xff] }
 0x24d   :  { %11936 = vst [vmem:[#allocation10_spill] sm:$0xff] %v9269_v45  ;;  %v9282_v38 = vpop.f32.mrb[39].mxu1  ;;  %v7633_v57 = vpop.eup %7632  ;;  %7652 = vpow2.f32 %v5958_v30  ;;  %v9286_v45 = vadd.f32 %v9080_v53, %v1293_v54  ;;  %v9299_v30 = vadd.f32 %v9090_v6, %v1294_v7  ;;  %v1346_v2 = vmul.f32 %v8829_v46, %v9006_v14 }
 0x24e   :  { %11938 = vst [vmem:[#allocation12_spill] sm:$0xff] %v9282_v38  ;;  %6785 = vmatpush1.bf16.msra.mxu1 %v11939_v37  ;;  %v7635_v39 = vpop.eup %7634  ;;  %v2372_v36 = vadd.f32 1.0, %v7633_v57  ;;  %7654 = vpow2.f32 %v5916_v15  ;;  %v1304_v25 = vmul.f32 %v9062_v41, %v9023_v9  ;;  %v9305_v27 = vpop.f32.mrb[64].mxu0  ;;  %v5969_v15 = vmul.f32 -1.442695, %v9278_v17  ;;  %v11942_v57 = vld [vmem:[#allocation23_spill] sm:$0xff] }
 0x24f   :  { %6787 = vmatprep.subr.bf16.mxu1 %v6786_v28  ;;  %v7637_v54 = vpop.eup %7636  ;;  %v2242_v4 = vadd.f32 1.0, %v7635_v39  ;;  %7656 = vpow2.f32 %v5959_v42  ;;  %11941 = vst [vmem:[#allocation15_spill] sm:$0xff] %v9305_v27  ;;  %v1347_v7 = vmul.f32 %v8860_v61, %v11942_v57  ;;  %v9310_v28 = vpop.f32.mrb[65].mxu0  ;;  %v5927_v14 = vmul.f32 -1.442695, %v9286_v45  ;;  %v11945_v27 = vld [vmem:[#allocation20_spill] sm:$0xff] }
 0x250   :  { %v7639_v37 = vpop.eup %7638  ;;  %7658 = vrcp.f32 %v2372_v36  ;;  %v2252_v22 = vadd.f32 1.0, %v7637_v54  ;;  %11943 = vst [vmem:[#allocation23_spill] sm:$0xff] %v9310_v28  ;;  %v1305_v9 = vmul.f32 %v9083_v18, %v9029_v62  ;;  %v11946_v38 = vpack.c.bf16 %v11944_v0, %v11945_v27  ;;  %v9318_v36 = vpop.f32.mrb[40].mxu1  ;;  %v11948_v57 = vld [vmem:[#allocation16_spill] sm:$0xff] }
 0x251   :  { %v7641_v39 = vpop.eup %7640  ;;  %7660 = vrcp.f32 %v2242_v4  ;;  %v2210_v42 = vadd.f32 1.0, %v7639_v37  ;;  %v9320_v54 = vpop.f32.mrb[66].mxu0  ;;  %v9326_v28 = vmul.f32 %v9188_v29, %v11948_v57  ;;  %v5970_v37 = vmul.f32 -1.442695, %v9289_v60 }
 0x252   :  { %6789 = vmatpush1.bf16.msra.mxu1 %v11946_v38  ;;  %11947 = vst [vmem:[#allocation22_spill] sm:$0xff] %v9320_v54  ;;  %v9322_v32 = vpop.eup %7642  ;;  %7662 = vrcp.f32 %v2252_v22  ;;  %v2253_v4 = vadd.f32 1.0, %v7641_v39  ;;  %v9329_v48 = vpop.f32.mrb[41].mxu1  ;;  %v5928_v38 = vmul.f32 -1.442695, %v9299_v30  ;;  %v9337_v0 = vadd.f32 %v8850_v55, %v1346_v2 }
 0x253   :  { %v9331_v62 = vpop.f32.mrb[67].mxu0  ;;  %v9333_v27 = vpop.eup %7644  ;;  %7664 = vrcp.f32 %v2210_v42  ;;  %v9340_v54 = vadd.f32 %v9080_v53, %v1304_v25  ;;  %v2878_v39 = vmul.f32 %v9242_v47, %v9000_v21  ;;  %v2748_v57 = vmul.f32 %v9252_v63, %v9011_v58 }
 0x254   :  { %11949 = vst [vmem:[#allocation20_spill] sm:$0xff] %v9331_v62  ;;  %v9342_v29 = vpop.f32.mrb[42].mxu1  ;;  %v7647_v22 = vpop.eup %7646  ;;  %7666 = vrcp.f32 %v2253_v4  ;;  %v9349_v42 = vadd.f32 %v8863_v5, %v1347_v7  ;;  %v9355_v25 = vmul.f32 %v9262_v40, %v8960_v26  ;;  %v9361_v21 = vadd.f32 %v9090_v6, %v1305_v9 }
 0x255   :  { %11950 = vst [vmem:[#allocation16_spill] sm:$0xff] %v9342_v29  ;;  %v9351_v62 = vpop.f32.mrb[43].mxu1  ;;  %v7649_v2 = vpop.eup %7648  ;;  %v9358_v29 = vmul.f32 %v7647_v22, %v9020_v10  ;;  %7668 = vpow2.f32 %v5917_v31  ;;  %v9365_v58 = vmul.f32 %v9271_v13, %v9033_v35  ;;  %v1357_v26 = vmul.f32 %v8829_v46, %v9041_v11 }
 0x256   :  { %11951 = vst [vmem:[#allocation45_spill] sm:$0xff] %v9351_v62  ;;  %v7651_v47 = vpop.eup %7650  ;;  %v9368_v63 = vmul.f32 %v7649_v2, %v9095_v20  ;;  %7670 = vpow2.f32 %v5969_v15  ;;  %v1315_v7 = vmul.f32 %v9062_v41, %v9052_v8  ;;  %v9376_v9 = vpop.f32.mrb[68].mxu0  ;;  %v11953_v15 = vld [vmem:[#allocation24_spill] sm:$0xff]  ;;  %v6790_v8 = vpack.c.bf16 %v9275_v44, %v9266_v19  ;;  %v12010_v62 = vld [vmem:[#allocation19_spill] sm:$0xff] }
 0x257   :  { %v7653_v40 = vpop.eup %7652  ;;  %v2211_v31 = vadd.f32 1.0, %v7651_v47  ;;  %7672 = vpow2.f32 %v5927_v14  ;;  %11952 = vst [vmem:[#allocation46_spill] sm:$0xff] %v9376_v9  ;;  %v1358_v11 = vmul.f32 %v8860_v61, %v11953_v15  ;;  %v9382_v4 = vpop.f32.mrb[69].mxu0  ;;  %v1316_v14 = vmul.f32 %v9083_v18, %v9064_v24 }
 0x258   :  { %v7655_v35 = vpop.eup %7654  ;;  %v2263_v13 = vadd.f32 1.0, %v7653_v40  ;;  %7674 = vpow2.f32 %v5970_v37  ;;  %11954 = vst [vmem:[#allocation24_spill] sm:$0xff] %v9382_v4  ;;  %v9388_v47 = vpop.f32.mrb[44].mxu1  ;;  %v5980_v15 = vmul.f32 -1.442695, %v9337_v0  ;;  %v6802_v20 = vpack.c.bf16 %v2748_v57, %v9326_v28  ;;  %6791 = vmatprep.subr.bf16.mxu1 %v6790_v8 }
 0x259   :  { %v7657_v22 = vpop.eup %7656  ;;  %7676 = vrcp.f32 %v2211_v31  ;;  %v2221_v2 = vadd.f32 1.0, %v7655_v35  ;;  %11955 = vst [vmem:[#allocation47_spill] sm:$0xff] %v9388_v47  ;;  %v9390_v10 = vpop.f32.mrb[70].mxu0  ;;  %v5938_v24 = vmul.f32 -1.442695, %v9340_v54  ;;  %v9400_v19 = vadd.f32 %v8850_v55, %v1357_v26 }
 0x25a   :  { %11956 = vst [vmem:[#allocation48_spill] sm:$0xff] %v9390_v10  ;;  %v7659_v40 = vpop.eup %7658  ;;  %7678 = vrcp.f32 %v2263_v13  ;;  %v2264_v37 = vadd.f32 1.0, %v7657_v22  ;;  %v9394_v4 = vpop.f32.mrb[45].mxu1  ;;  %v6794_v44 = vpack.c.bf16 %v2878_v39, %v9296_v34  ;;  %v5981_v28 = vmul.f32 -1.442695, %v9349_v42  ;;  %6803 = vmatprep.subr.bf16.mxu0 %v6802_v20  ;;  %v11964_v20 = vld [vmem:[#allocation25_spill] sm:$0xff] }
 0x25b   :  { %11957 = vst [vmem:[#allocation49_spill] sm:$0xff] %v9394_v4  ;;  %v9396_v31 = vpop.f32.mrb[71].mxu0  ;;  %v7661_v35 = vpop.eup %7660  ;;  %7680 = vrcp.f32 %v2221_v2  ;;  %v9407_v57 = vadd.f32 %v9080_v53, %v1315_v7  ;;  %v11960_v2 = vld [vmem:[#allocation32_spill] sm:$0xff]  ;;  %v5939_v39 = vmul.f32 -1.442695, %v9361_v21  ;;  %v11963_v7 = vpack.c.bf16 %v9220_v59, %v9217_v51 }
 0x25c   :  { %11958 = vst [vmem:[#allocation50_spill] sm:$0xff] %v9396_v31  ;;  %v9403_v13 = vpop.f32.mrb[46].mxu1  ;;  %v7663_v22 = vpop.eup %7662  ;;  %7682 = vrcp.f32 %v2264_v37  ;;  %v9410_v31 = vadd.f32 %v8863_v5, %v1358_v11  ;;  %v11961_v26 = vpack.c.bf16 %v9112_v12, %v11960_v2  ;;  %v9419_v37 = vadd.f32 %v9090_v6, %v1316_v14 }
 0x25d   :  { %11959 = vst [vmem:[#allocation51_spill] sm:$0xff] %v9403_v13  ;;  %v9415_v8 = vpop.f32.mrb[47].mxu1  ;;  %v7665_v34 = vpop.eup %7664  ;;  %7684 = vpow2.f32 %v5928_v38  ;;  %6805 = vmatpush1.bf16.msra.mxu0 %v11963_v7  ;;  %v1368_v12 = vmul.f32 %v8829_v46, %v11964_v20  ;;  %v5991_v38 = vmul.f32 -1.442695, %v9400_v19  ;;  %v5949_v51 = vmul.f32 -1.442695, %v9407_v57 }
 0x25e   :  { %6793 = vmatpush1.bf16.msra.mxu1 %v11961_v26  ;;  %11962 = vst [vmem:[#allocation32_spill] sm:$0xff] %v9415_v8  ;;  %v9424_v11 = vpop.eup %7666  ;;  %7686 = vpow2.f32 %v5980_v15  ;;  %v11965_v26 = vld [vmem:[#allocation28_spill] sm:$0xff]  ;;  %v9431_v14 = vpop.f32.mrb[72].mxu0  ;;  %v5992_v59 = vmul.f32 -1.442695, %v9410_v31  ;;  %v11967_v15 = vpack.c.bf16 %v9212_v43, %v9209_v50  ;;  %v11969_v7 = vld [vmem:[#allocation21_spill] sm:$0xff]  ;;  %v2900_v9 = vmul.f32 %v7659_v40, %v9037_v49 }
 0x25f   :  { %6795 = vmatprep.subr.bf16.mxu1 %v6794_v44  ;;  %v7669_v2 = vpop.eup %7668  ;;  %7688 = vpow2.f32 %v5938_v24  ;;  %v1326_v8 = vmul.f32 %v9062_v41, %v11965_v26  ;;  %11966 = vst [vmem:[#allocation25_spill] sm:$0xff] %v9431_v14  ;;  %v9438_v44 = vpop.f32.mrb[73].mxu0  ;;  %v2889_v20 = vmul.f32 %v9322_v32, %v11969_v7  ;;  %v5950_v14 = vmul.f32 -1.442695, %v9419_v37 }
 0x260   :  { %v7671_v10 = vpop.eup %7670  ;;  %v2222_v13 = vadd.f32 1.0, %v7669_v2  ;;  %7690 = vpow2.f32 %v5981_v28  ;;  %11968 = vst [vmem:[#allocation28_spill] sm:$0xff] %v9438_v44  ;;  %v9443_v2 = vpop.f32.mrb[48].mxu1  ;;  %v9449_v43 = vadd.f32 %v8850_v55, %v1368_v12  ;;  %v11976_v12 = vld [vmem:[#allocation26_spill] sm:$0xff] }
 0x261   :  { %v7673_v24 = vpop.eup %7672  ;;  %v2274_v26 = vadd.f32 1.0, %v7671_v10  ;;  %7692 = vpow2.f32 %v5939_v39  ;;  %11970 = vst [vmem:[#allocation21_spill] sm:$0xff] %v9443_v2  ;;  %v9445_v28 = vpop.f32.mrb[74].mxu0  ;;  %v11974_v10 = vld [vmem:[#allocation27_spill] sm:$0xff] }
 0x262   :  { %6797 = vmatpush1.bf16.msra.mxu1 %v11967_v15  ;;  %11971 = vst [vmem:[#allocation52_spill] sm:$0xff] %v9445_v28  ;;  %v7675_v4 = vpop.eup %7674  ;;  %7694 = vrcp.f32 %v2222_v13  ;;  %v2232_v50 = vadd.f32 1.0, %v7673_v24  ;;  %v9451_v15 = vpop.f32.mrb[49].mxu1  ;;  %v2759_v39 = vmul.f32 %v9333_v27, %v11974_v10  ;;  %v9460_v28 = vadd.f32 %v9080_v53, %v1326_v8 }
 0x263   :  { %11972 = vst [vmem:[#allocation53_spill] sm:$0xff] %v9451_v15  ;;  %v9453_v44 = vpop.f32.mrb[75].mxu0  ;;  %v9455_v32 = vpop.eup %7676  ;;  %7696 = vrcp.f32 %v2274_v26  ;;  %v2275_v7 = vadd.f32 1.0, %v7675_v4  ;;  %v2770_v13 = vmul.f32 %v7661_v35, %v9145_v33  ;;  %v1369_v24 = vmul.f32 %v8860_v61, %v11976_v12  ;;  %v11979_v26 = vld [vmem:[#allocation30_spill] sm:$0xff] }
 0x264   :  { %11973 = vst [vmem:[#allocation54_spill] sm:$0xff] %v9453_v44  ;;  %v9462_v49 = vpop.f32.mrb[50].mxu1  ;;  %v7679_v40 = vpop.eup %7678  ;;  %7698 = vrcp.f32 %v2232_v50  ;;  %v11977_v44 = vld [vmem:[#allocation29_spill] sm:$0xff]  ;;  %v9472_v4 = vmul.f32 %v7663_v22, %v9150_v16  ;;  %v1379_v33 = vmul.f32 %v8829_v46, %v11979_v26  ;;  %v11980_v50 = vld [vmem:[#allocation6_spill] sm:$0xff]  ;;  %v6798_v12 = vpack.c.bf16 %v2900_v9, %v2889_v20 }
 0x265   :  { %11975 = vst [vmem:[#allocation27_spill] sm:$0xff] %v9462_v49  ;;  %v1327_v15 = vmul.f32 %v9083_v18, %v11977_v44  ;;  %v9469_v2 = vpop.f32.mrb[51].mxu1  ;;  %v7681_v27 = vpop.eup %7680  ;;  %v9475_v8 = vmul.f32 %v7679_v40, %v9200_v1  ;;  %7700 = vrcp.f32 %v2275_v7  ;;  %v9482_v10 = vmul.f32 %v7665_v34, %v11980_v50  ;;  %v11981_v1 = vld [vmem:[#allocation33_spill] sm:$0xff]  ;;  %v11982_v7 = vld [vmem:[#allocation31_spill] sm:$0xff] }
 0x266   :  { %11978 = vst [vmem:[#allocation26_spill] sm:$0xff] %v9469_v2  ;;  %v9479_v35 = vpop.eup %7682  ;;  %v9485_v44 = vmul.f32 %v7681_v27, %v9223_v23  ;;  %7702 = vpow2.f32 %v5991_v38  ;;  %v1337_v22 = vmul.f32 %v9062_v41, %v11981_v1  ;;  %v1380_v40 = vmul.f32 %v8860_v61, %v11982_v7  ;;  %v9493_v26 = vpop.f32.mrb[76].mxu0  ;;  %6799 = vmatprep.subr.bf16.mxu1 %v6798_v12 }
 0x267   :  { %v7685_v2 = vpop.eup %7684  ;;  %7704 = vpow2.f32 %v5949_v51  ;;  %11983 = vst [vmem:[#allocation29_spill] sm:$0xff] %v9493_v26  ;;  %v6806_v9 = vpack.c.bf16 %v2770_v13, %v2759_v39  ;;  %v9497_v38 = vpop.f32.mrb[77].mxu0  ;;  %v6002_v50 = vmul.f32 -1.442695, %v9449_v43  ;;  %v9501_v1 = vadd.f32 %v8863_v5, %v1369_v24 }
 0x268   :  { %v7687_v34 = vpop.eup %7686  ;;  %v2233_v27 = vadd.f32 1.0, %v7685_v2  ;;  %7706 = vpow2.f32 %v5992_v59  ;;  %11984 = vst [vmem:[#allocation30_spill] sm:$0xff] %v9497_v38  ;;  %v11985_v7 = vpack.c.bf16 %v9358_v29, %v9355_v25  ;;  %v9506_v16 = vpop.f32.mrb[52].mxu1  ;;  %v9511_v13 = vadd.f32 %v9090_v6, %v1327_v15 }
 0x269   :  { %v7689_v20 = vpop.eup %7688  ;;  %v2285_v51 = vadd.f32 1.0, %v7687_v34  ;;  %7708 = vpow2.f32 %v5950_v14  ;;  %11986 = vst [vmem:[#allocation6_spill] sm:$0xff] %v9506_v16  ;;  %v9508_v2 = vpop.f32.mrb[78].mxu0  ;;  %v11988_v14 = vld [vmem:[#allocation35_spill] sm:$0xff]  ;;  %6807 = vmatprep.subr.bf16.mxu0 %v6806_v9  ;;  %v9521_v23 = vadd.f32 %v8850_v55, %v1379_v33  ;;  %v11991_v15 = vpack.c.bf16 %v9368_v63, %v9365_v58 }
 0x26a   :  { %6801 = vmatpush1.bf16.msra.mxu1 %v11985_v7  ;;  %11987 = vst [vmem:[#allocation33_spill] sm:$0xff] %v9508_v2  ;;  %v7691_v59 = vpop.eup %7690  ;;  %7710 = vrcp.f32 %v2233_v27  ;;  %v2243_v39 = vadd.f32 1.0, %v7689_v20  ;;  %v1338_v12 = vmul.f32 %v9083_v18, %v11988_v14  ;;  %v9515_v24 = vpop.f32.mrb[53].mxu1  ;;  %v5960_v7 = vmul.f32 -1.442695, %v9460_v28  ;;  %v11995_v2 = vld [vmem:[#allocation34_spill] sm:$0xff] }
 0x26b   :  { %11989 = vst [vmem:[#allocation31_spill] sm:$0xff] %v9515_v24  ;;  %v9517_v34 = vpop.f32.mrb[79].mxu0  ;;  %v7693_v29 = vpop.eup %7692  ;;  %7712 = vrcp.f32 %v2285_v51  ;;  %v2286_v25 = vadd.f32 1.0, %v7691_v59  ;;  %6809 = vmatpush1.bf16.msra.mxu0 %v11991_v15  ;;  %v9529_v14 = vadd.f32 %v9080_v53, %v1337_v22  ;;  %v9532_v51 = vadd.f32 %v8863_v5, %v1380_v40  ;;  %v2910_v22 = vld [vmem:[%s11822_s7] sm:$0x3] }
 0x26c   :  { %11990 = vst [vmem:[#allocation35_spill] sm:$0xff] %v9517_v34  ;;  %v9526_v27 = vpop.f32.mrb[54].mxu1  ;;  %v7695_v20 = vpop.eup %7694  ;;  %7714 = vrcp.f32 %v2243_v39  ;;  %v2244_v9 = vadd.f32 1.0, %v7693_v29  ;;  %v6003_v33 = vmul.f32 -1.442695, %v9501_v1  ;;  %v1390_v58 = vmul.f32 %v8829_v46, %v11995_v2  ;;  %v11998_v2 = vld [vmem:[#allocation18_spill] sm:$0xff] }
 0x26d   :  { %11992 = vst [vmem:[#allocation55_spill] sm:$0xff] %v9526_v27  ;;  %11993 = vst [vmem:[#allocation56_spill] sm:$0xff] %v9532_v51  ;;  %v9534_v59 = vpop.f32.mrb[55].mxu1  ;;  %v7697_v34 = vpop.eup %7696  ;;  %7716 = vrcp.f32 %v2286_v25  ;;  %v5961_v39 = vmul.f32 -1.442695, %v9511_v13  ;;  %v9541_v29 = vadd.f32 %v9090_v6, %v1338_v12  ;;  %v11856_v24 = vmov 0.0  }
 0x26e   :  { %11994 = vst [vmem:[#allocation57_spill] sm:$0xff] %v9534_v59  ;;  %v7699_v63 = vpop.eup %7698  ;;  %7718 = vrcp.f32 %v2244_v9  ;;  %v6013_v25 = vmul.f32 -1.442695, %v9521_v23  ;;  %v9549_v15 = vpop.f32.mrb[80].mxu0  ;;  %v2781_v9 = vmul.f32 %v9424_v11, %v11998_v2  ;;  %v5971_v27 = vmul.f32 -1.442695, %v9529_v14  ;;  %2975 = vmatprep.mubr.f32.mxu1 %v11856_v24  ;;  %3046 = vmatprep.mubr.f32.mxu0 %v11856_v24 }
 0x26f   :  { %11996 = vst [vmem:[#allocation34_spill] sm:$0xff] %v9541_v29  ;;  %v9546_v40 = vpop.eup %7700  ;;  %7720 = vpow2.f32 %v6002_v50  ;;  %11997 = vst [vmem:[#allocation58_spill] sm:$0xff] %v9549_v15  ;;  %v6014_v12 = vmul.f32 -1.442695, %v9532_v51  ;;  %v9556_v38 = vpop.f32.mrb[81].mxu0  ;;  %v2792_v15 = vmul.f32 %v9479_v35, %v9228_v52  ;;  %v9562_v11 = vadd.f32 %v8850_v55, %v1390_v58  ;;  %2976 = vmatmul.mubr.f32.vlgmr.msra.gmra.mrb[80].mxu1 %v2910_v22  ;;  %v12005_v58 = vld [vmem:[#allocation5_spill] sm:$0xff] }
 0x270   :  { %v7703_v59 = vpop.eup %7702  ;;  %7722 = vpow2.f32 %v5960_v7  ;;  %11999 = vst [vmem:[#allocation18_spill] sm:$0xff] %v9556_v38  ;;  %v9564_v7 = vpop.f32.mrb[56].mxu1  ;;  %v2750_v49 = vmul.f32 %v7695_v20, %v9236_v56  ;;  %v5972_v24 = vmul.f32 -1.442695, %v9541_v29  ;;  %v12004_v35 = vmov 0.0  }
 0x271   :  { %v7705_v50 = vpop.eup %7704  ;;  %v2296_v16 = vadd.f32 1.0, %v7703_v59  ;;  %7724 = vpow2.f32 %v6003_v33  ;;  %12000 = vst [vmem:[#allocation59_spill] sm:$0xff] %v9564_v7  ;;  %v9566_v2 = vpop.f32.mrb[82].mxu0  ;;  %3117 = vmatprep.mubr.f32.mxu1 %v12004_v35  ;;  %v1348_v22 = vmul.f32 %v9062_v41, %v12005_v58  ;;  %v6024_v58 = vmul.f32 -1.442695, %v9562_v11 }
 0x272   :  { %12001 = vst [vmem:[#allocation60_spill] sm:$0xff] %v9566_v2  ;;  %v7707_v26 = vpop.eup %7706  ;;  %v2254_v38 = vadd.f32 1.0, %v7705_v50  ;;  %7726 = vpow2.f32 %v5961_v39  ;;  %v9570_v47 = vpop.f32.mrb[57].mxu1  ;;  %v12006_v2 = vld [vmem:[#allocation36_spill] sm:$0xff]  ;;  %v12008_v39 = vld [vmem:[#allocation37_spill] sm:$0xff]  ;;  %v9593_v51 = vmul.f32 %v7697_v34, %v9278_v17 }
 0x273   :  { %12002 = vst [vmem:[#allocation61_spill] sm:$0xff] %v9570_v47  ;;  %v9572_v52 = vpop.f32.mrb[83].mxu0  ;;  %v7709_v59 = vpop.eup %7708  ;;  %7728 = vrcp.f32 %v2296_v16  ;;  %v2297_v33 = vadd.f32 1.0, %v7707_v26  ;;  %v1391_v7 = vmul.f32 %v8860_v61, %v12006_v2  ;;  %v2739_v50 = vmul.f32 %v9455_v32, %v12008_v39  ;;  %v12009_v47 = vld [vmem:[#allocation17_spill] sm:$0xff] }
 0x274   :  { %12003 = vst [vmem:[#allocation62_spill] sm:$0xff] %v9572_v52  ;;  %v9579_v56 = vpop.f32.mrb[58].mxu1  ;;  %v9581_v20 = vpop.eup %7710  ;;  %7730 = vrcp.f32 %v2254_v38  ;;  %v2255_v52 = vadd.f32 1.0, %v7709_v59  ;;  %v1349_v35 = vmul.f32 %v9083_v18, %v12009_v47  ;;  %v1401_v2 = vmul.f32 %v8829_v46, %v12010_v62  ;;  %v12011_v39 = vld [vmem:[#allocation9_spill] sm:$0xff] }
 0x275   :  { %12007 = vst [vmem:[#allocation5_spill] sm:$0xff] %v9579_v56  ;;  %v9587_v16 = vpop.f32.mrb[59].mxu1  ;;  %v7713_v26 = vpop.eup %7712  ;;  %7732 = vrcp.f32 %v2297_v33  ;;  %v6810_v56 = vpack.c.bf16 %v2792_v15, %v2781_v9  ;;  %v6834_v38 = vpack.c.bf16 %v2750_v49, %v2739_v50  ;;  %v9599_v59 = vmul.f32 %v7699_v63, %v9286_v45 }
 0x276   :  { %v7715_v29 = vpop.eup %7714  ;;  %v9596_v32 = vmul.f32 %v7713_v26, %v9337_v0  ;;  %7734 = vrcp.f32 %v2255_v52  ;;  %v1359_v62 = vmul.f32 %v9062_v41, %v12011_v39  ;;  %v9606_v15 = vpop.f32.mrb[84].mxu0  ;;  %v9611_v49 = vadd.f32 %v9080_v53, %v1348_v22  ;;  %v12016_v52 = vld [vmem:[#allocation7_spill] sm:$0xff] }
 0x277   :  { %v7717_v47 = vpop.eup %7716  ;;  %v9602_v33 = vmul.f32 %v7715_v29, %v9340_v54  ;;  %7736 = vpow2.f32 %v6013_v25  ;;  %6811 = vmatprep.subr.bf16.mxu0 %v6810_v56  ;;  %v9614_v45 = vadd.f32 %v8863_v5, %v1391_v7  ;;  %6835 = vmatprep.subr.bf16.mxu1 %v6834_v38  ;;  %v12012_v54 = vpack.c.bf16 %v9475_v8, %v9472_v4  ;;  %v9619_v34 = vpop.f32.mrb[85].mxu0  ;;  %v12017_v56 = vld [vmem:[#allocation39_spill] sm:$0xff] }
 0x278   :  { %v7719_v17 = vpop.eup %7718  ;;  %7738 = vpow2.f32 %v5971_v27  ;;  %12013 = vst [vmem:[#allocation36_spill] sm:$0xff] %v9619_v34  ;;  %v9624_v27 = vadd.f32 %v9090_v6, %v1349_v35  ;;  %v12014_v25 = vpack.c.bf16 %v9485_v44, %v9482_v10  ;;  %v9629_v9 = vpop.f32.mrb[60].mxu1  ;;  %v1402_v22 = vmul.f32 %v8860_v61, %v12016_v52 }
 0x279   :  { %6813 = vmatpush1.bf16.msra.mxu0 %v12012_v54  ;;  %v7721_v63 = vpop.eup %7720  ;;  %7740 = vpow2.f32 %v6014_v12  ;;  %v9631_v7 = vpop.f32.mrb[86].mxu0  ;;  %v1360_v12 = vmul.f32 %v9083_v18, %v12017_v56  ;;  %v9642_v44 = vadd.f32 %v8850_v55, %v1401_v2  ;;  %v9645_v38 = vadd.f32 %v9080_v53, %v1359_v62 }
 0x27a   :  { %6837 = vmatpush1.bf16.msra.mxu1 %v12014_v25  ;;  %12015 = vst [vmem:[#allocation37_spill] sm:$0xff] %v9631_v7  ;;  %v7723_v4 = vpop.eup %7722  ;;  %v2307_v8 = vadd.f32 1.0, %v7721_v63  ;;  %7742 = vpow2.f32 %v5972_v24  ;;  %v9637_v50 = vpop.f32.mrb[61].mxu1  ;;  %v5982_v63 = vmul.f32 -1.442695, %v9611_v49  ;;  %v2814_v0 = vmul.f32 %v7717_v47, %v9349_v42  ;;  %v12023_v47 = vld [vmem:[#allocation41_spill] sm:$0xff] }
 0x27b   :  { %12018 = vst [vmem:[#allocation17_spill] sm:$0xff] %v9637_v50  ;;  %v9639_v35 = vpop.f32.mrb[87].mxu0  ;;  %v7725_v26 = vpop.eup %7724  ;;  %v2265_v10 = vadd.f32 1.0, %v7723_v4  ;;  %7744 = vpow2.f32 %v6024_v58  ;;  %v6025_v25 = vmul.f32 -1.442695, %v9614_v45  ;;  %v12022_v4 = vld [vmem:[#allocation38_spill] sm:$0xff]  ;;  %v2803_v42 = vmul.f32 %v9546_v40, %v9289_v60 }
 0x27c   :  { %12019 = vst [vmem:[#allocation19_spill] sm:$0xff] %v9639_v35  ;;  %v9647_v24 = vpop.f32.mrb[62].mxu1  ;;  %v7727_v39 = vpop.eup %7726  ;;  %7746 = vrcp.f32 %v2307_v8  ;;  %v2308_v54 = vadd.f32 1.0, %v7725_v26  ;;  %v5983_v2 = vmul.f32 -1.442695, %v9624_v27  ;;  %v1412_v62 = vmul.f32 %v8829_v46, %v12022_v4 }
 0x27d   :  { %12020 = vst [vmem:[#allocation9_spill] sm:$0xff] %v9647_v24  ;;  %v9651_v52 = vpop.f32.mrb[63].mxu1  ;;  %v7729_v56 = vpop.eup %7728  ;;  %7748 = vrcp.f32 %v2265_v10  ;;  %v2266_v58 = vadd.f32 1.0, %v7727_v39  ;;  %v9658_v8 = vadd.f32 %v8863_v5, %v1402_v22  ;;  %v9661_v26 = vadd.f32 %v9090_v6, %v1360_v12  ;;  %v12024_v12 = vld [vmem:[#allocation40_spill] sm:$0xff] }
 0x27e   :  { %12021 = vst [vmem:[#allocation7_spill] sm:$0xff] %v9651_v52  ;;  %v7731_v29 = vpop.eup %7730  ;;  %7750 = vrcp.f32 %v2308_v54  ;;  %v2772_v10 = vmul.f32 %v7719_v17, %v9361_v21  ;;  %v6035_v39 = vmul.f32 -1.442695, %v9642_v44  ;;  %v5993_v52 = vmul.f32 -1.442695, %v9645_v38  ;;  %v9683_v7 = vpop.f32.mrb[88].mxu0 }
 0x27f   :  { %v9663_v35 = vpop.eup %7732  ;;  %7752 = vrcp.f32 %v2266_v58  ;;  %v1370_v22 = vmul.f32 %v9062_v41, %v12023_v47  ;;  %v1413_v54 = vmul.f32 %v8860_v61, %v12024_v12  ;;  %v2761_v21 = vmul.f32 %v9581_v20, %v9299_v30  ;;  %12025 = vst [vmem:[#allocation39_spill] sm:$0xff] %v9683_v7  ;;  %v9688_v50 = vpop.f32.mrb[89].mxu0 }
 0x280   :  { %v9668_v4 = vpop.eup %7734  ;;  %7754 = vpow2.f32 %v5982_v63  ;;  %v9679_v17 = vadd.f32 %v8850_v55, %v1412_v62  ;;  %v1371_v58 = vmul.f32 %v9083_v18, %v9214_v3  ;;  %v9685_v60 = vpop.f32.mrb[64].mxu1  ;;  %v6036_v47 = vmul.f32 -1.442695, %v9658_v8  ;;  %12027 = vst [vmem:[#allocation41_spill] sm:$0xff] %v9688_v50 }
 0x281   :  { %v7737_v24 = vpop.eup %7736  ;;  %7756 = vpow2.f32 %v6025_v25  ;;  %12026 = vst [vmem:[#allocation38_spill] sm:$0xff] %v9685_v60  ;;  %v6814_v12 = vpack.c.bf16 %v2814_v0, %v2803_v42  ;;  %v5994_v25 = vmul.f32 -1.442695, %v9661_v26  ;;  %v6838_v62 = vpack.c.bf16 %v2772_v10, %v2761_v21  ;;  %v12030_v21 = vld [vmem:[#allocation11_spill] sm:$0xff] }
 0x282   :  { %v7739_v40 = vpop.eup %7738  ;;  %v2318_v63 = vadd.f32 1.0, %v7737_v24  ;;  %7758 = vpow2.f32 %v5983_v2  ;;  %v9692_v7 = vadd.f32 %v9080_v53, %v1370_v22  ;;  %v9695_v24 = vadd.f32 %v8863_v5, %v1413_v54  ;;  %v9697_v2 = vpop.f32.mrb[65].mxu1 }
 0x283   :  { %v7741_v30 = vpop.eup %7740  ;;  %v2276_v20 = vadd.f32 1.0, %v7739_v40  ;;  %7760 = vpow2.f32 %v6035_v39  ;;  %6815 = vmatprep.subr.bf16.mxu0 %v6814_v12  ;;  %12028 = vst [vmem:[#allocation40_spill] sm:$0xff] %v9697_v2  ;;  %v6046_v39 = vmul.f32 -1.442695, %v9679_v17  ;;  %v9701_v40 = vadd.f32 %v9090_v6, %v1371_v58  ;;  %6839 = vmatprep.subr.bf16.mxu1 %v6838_v62  ;;  %v12031_v12 = vld [vmem:[#allocation14_spill] sm:$0xff]  ;;  %v9713_v58 = vpop.f32.mrb[90].mxu0 }
 0x284   :  { %v7743_v34 = vpop.eup %7742  ;;  %7762 = vrcp.f32 %v2318_v63  ;;  %v2319_v3 = vadd.f32 1.0, %v7741_v30  ;;  %v12029_v10 = vpack.c.bf16 %v9596_v32, %v9593_v51  ;;  %v1423_v63 = vmul.f32 %v8829_v46, %v12030_v21  ;;  %12033 = vst [vmem:[#allocation11_spill] sm:$0xff] %v9713_v58 }
 0x285   :  { %v7745_v0 = vpop.eup %7744  ;;  %7764 = vrcp.f32 %v2276_v20  ;;  %v2277_v42 = vadd.f32 1.0, %v7743_v34  ;;  %v1381_v30 = vmul.f32 %v9062_v41, %v12031_v12  ;;  %v12032_v34 = vpack.c.bf16 %v9602_v33, %v9599_v59  ;;  %v9715_v20 = vpop.f32.mrb[66].mxu1  ;;  %v12036_v33 = vld [vmem:[#allocation43_spill] sm:$0xff] }
 0x286   :  { %6817 = vmatpush1.bf16.msra.mxu0 %v12029_v10  ;;  %v7747_v22 = vpop.eup %7746  ;;  %7766 = vrcp.f32 %v2319_v3  ;;  %v2329_v54 = vadd.f32 1.0, %v7745_v0  ;;  %12034 = vst [vmem:[#allocation14_spill] sm:$0xff] %v9715_v20  ;;  %v9718_v51 = vmul.f32 %v7729_v56, %v9400_v19  ;;  %v12035_v3 = vld [vmem:[#allocation13_spill] sm:$0xff]  ;;  %v9726_v21 = vmul.f32 %v7731_v29, %v9407_v57  ;;  %v9733_v19 = vpop.f32.mrb[91].mxu0 }
 0x287   :  { %6841 = vmatpush1.bf16.msra.mxu1 %v12032_v34  ;;  %v7749_v62 = vpop.eup %7748  ;;  %v9721_v32 = vmul.f32 %v7747_v22, %v9449_v43  ;;  %7768 = vrcp.f32 %v2277_v42  ;;  %v1424_v0 = vmul.f32 %v8860_v61, %v12035_v3  ;;  %v1382_v12 = vmul.f32 %v9083_v18, %v12036_v33  ;;  %12037 = vst [vmem:[#allocation13_spill] sm:$0xff] %v9733_v19  ;;  %v12038_v22 = vld [vmem:[#allocation42_spill] sm:$0xff]  ;;  %v9756_v43 = vpop.f32.mrb[67].mxu1 }
 0x288   :  { %v7751_v10 = vpop.eup %7750  ;;  %v9729_v59 = vmul.f32 %v7749_v62, %v9460_v28  ;;  %7770 = vrcp.f32 %v2329_v54  ;;  %v6004_v42 = vmul.f32 -1.442695, %v9692_v7  ;;  %v1434_v57 = vmul.f32 %v8829_v46, %v12038_v22  ;;  %12039 = vst [vmem:[#allocation43_spill] sm:$0xff] %v9756_v43 }
 0x289   :  { %v7753_v56 = vpop.eup %7752  ;;  %7772 = vpow2.f32 %v5993_v52  ;;  %v6047_v54 = vmul.f32 -1.442695, %v9695_v24  ;;  %v9744_v34 = vadd.f32 %v8850_v55, %v1423_v63  ;;  %v9747_v52 = vadd.f32 %v9080_v53, %v1381_v30  ;;  %v12040_v30 = vld [vmem:[#allocation10_spill] sm:$0xff] }
 0x28a   :  { %v7755_v29 = vpop.eup %7754  ;;  %7774 = vpow2.f32 %v6036_v47  ;;  %v9750_v33 = vadd.f32 %v8863_v5, %v1424_v0  ;;  %v6005_v28 = vmul.f32 -1.442695, %v9701_v40  ;;  %v9754_v47 = vadd.f32 %v9090_v6, %v1382_v12 }
 0x28b   :  { %v7757_v62 = vpop.eup %7756  ;;  %v2287_v3 = vadd.f32 1.0, %v7755_v29  ;;  %7776 = vpow2.f32 %v5994_v25  ;;  %v9759_v25 = vadd.f32 %v8850_v55, %v1434_v57  ;;  %v1392_v0 = vmul.f32 %v9062_v41, %v12040_v30 }
 0x28c   :  { %v7759_v46 = vpop.eup %7758  ;;  %v2330_v22 = vadd.f32 1.0, %v7757_v62  ;;  %7778 = vpow2.f32 %v6046_v39  ;;  %v2836_v62 = vmul.f32 %v7751_v10, %v9501_v1  ;;  %v6057_v20 = vmul.f32 -1.442695, %v9744_v34  ;;  %v12042_v10 = vld [vmem:[#allocation2_spill] sm:$0xff] }
 0x28d   :  { %v7761_v63 = vpop.eup %7760  ;;  %7780 = vrcp.f32 %v2287_v3  ;;  %v2288_v29 = vadd.f32 1.0, %v7759_v46  ;;  %v6015_v43 = vmul.f32 -1.442695, %v9747_v52  ;;  %v9767_v3 = vmul.f32 -1.442695, %v9750_v33  ;;  %v12041_v46 = vld [vmem:[#allocation44_spill] sm:$0xff] }
 0x28e   :  { %v7763_v19 = vpop.eup %7762  ;;  %7782 = vrcp.f32 %v2330_v22  ;;  %v2340_v39 = vadd.f32 1.0, %v7761_v63  ;;  %v1435_v55 = vmul.f32 %v8860_v61, %v12041_v46  ;;  %v2825_v30 = vmul.f32 %v9663_v35, %v9410_v31 }
 0x28f   :  { %v7765_v12 = vpop.eup %7764  ;;  %7784 = vrcp.f32 %v2288_v29  ;;  %v2794_v1 = vmul.f32 %v7753_v56, %v9511_v13  ;;  %v1238_v22 = vsub.s32 6, %v12042_v10  ;;  %v6016_v29 = vmul.f32 -1.442695, %v9754_v47  ;;  %v12043_v13 = vld [vmem:[#allocation12_spill] sm:$0xff] }
 0x290   :  { %v9771_v57 = vpop.eup %7766  ;;  %7786 = vrcp.f32 %v2340_v39  ;;  %v9781_v58 = vmul.f32 -1.442695, %v9759_v25  ;;  %v9784_v61 = vadd.f32 %v9080_v53, %v1392_v0  ;;  %v2783_v31 = vmul.f32 %v9668_v4, %v9419_v37  ;;  %v9790_v39 = vpop.f32.mrb[92].mxu0 }
 0x291   :  { %v9777_v63 = vpop.eup %7768  ;;  %7788 = vpow2.f32 %v6004_v42  ;;  %v1393_v35 = vmul.f32 %v9083_v18, %v12043_v13  ;;  %v6818_v56 = vpack.c.bf16 %v2836_v62, %v2825_v30  ;;  %12044 = vst [vmem:[#allocation42_spill] sm:$0xff] %v9790_v39  ;;  %v9792_v42 = vpop.f32.mrb[68].mxu1  ;;  %v9795_v50 = vmul.f32 %v7763_v19, %v9521_v23  ;;  %v8192_v30 = vld [vmem:[%s11820_s5] sm:$0xff] }
 0x292   :  { %v7771_v46 = vpop.eup %7770  ;;  %7790 = vpow2.f32 %v6047_v54  ;;  %12045 = vst [vmem:[#allocation10_spill] sm:$0xff] %v9792_v42  ;;  %v9801_v60 = vadd.f32 %v8863_v5, %v1435_v55  ;;  %v9803_v37 = vpop.f32.mrb[93].mxu0  ;;  %v9810_v23 = vrot.slane %v8192_v30, %v1238_v22  ;;  %v1242_v55 = vsub.s32 7, %v12042_v10 }
 0x293   :  { %v7773_v2 = vpop.eup %7772  ;;  %v9798_v0 = vmul.f32 %v7771_v46, %v9562_v11  ;;  %7792 = vpow2.f32 %v6005_v28  ;;  %12046 = vst [vmem:[#allocation44_spill] sm:$0xff] %v9803_v37  ;;  %v9805_v4 = vpop.f32.mrb[69].mxu1  ;;  %6819 = vmatprep.subr.bf16.mxu0 %v6818_v56  ;;  %v6842_v11 = vpack.c.bf16 %v2794_v1, %v2783_v31  ;;  %v9819_v13 = vadd.f32 %v9090_v6, %v1393_v35  ;;  %v12058_v37 = vld [vmem:[#allocation56_spill] sm:$0xff] }
 0x294   :  { %12047 = vst [vmem:[#allocation2_spill] sm:$0xff] %v9805_v4  ;;  %v7775_v54 = vpop.eup %7774  ;;  %v2298_v62 = vadd.f32 1.0, %v7773_v2  ;;  %7794 = vpow2.f32 %v6057_v20  ;;  %v12048_v2 = vpack.c.bf16 %v9721_v32, %v9718_v51  ;;  %v1403_v1 = vmul.f32 %v9062_v41, %v9318_v36  ;;  %v9823_v31 = vpop.f32.mrb[94].mxu0  ;;  %v8193_v51 = vld [vmem:[%s11821_s6] sm:$0xff] }
 0x295   :  { %v7777_v19 = vpop.eup %7776  ;;  %v2341_v28 = vadd.f32 1.0, %v7775_v54  ;;  %7796 = vpow2.f32 %v6015_v43  ;;  %6843 = vmatprep.subr.bf16.mxu1 %v6842_v11  ;;  %12049 = vst [vmem:[#allocation12_spill] sm:$0xff] %v9823_v31  ;;  %v9825_v56 = vpop.f32.mrb[70].mxu1  ;;  %v9830_v32 = vrot.slane %v8193_v51, %v1238_v22  ;;  %v1404_v35 = vmul.f32 %v9083_v18, %v9329_v48  ;;  %v12057_v4 = vld [vmem:[#allocation22_spill] sm:$0xff] }
 0x296   :  { %6821 = vmatpush1.bf16.msra.mxu0 %v12048_v2  ;;  %v7779_v20 = vpop.eup %7778  ;;  %7798 = vrcp.f32 %v2298_v62  ;;  %v2299_v46 = vadd.f32 1.0, %v7777_v19  ;;  %12050 = vst [vmem:[#allocation63_spill] sm:$0xff] %v9825_v56  ;;  %v12051_v36 = vpack.c.bf16 %v9729_v59, %v9726_v21  ;;  %v9838_v62 = vmul.f32 %v7765_v12, %v9529_v14  ;;  %v12052_v19 = vld [vmem:[#allocation15_spill] sm:$0xff]  ;;  %v9845_v22 = vpop.f32.mrb[95].mxu0 }
 0x297   :  { %v7781_v43 = vpop.eup %7780  ;;  %7800 = vrcp.f32 %v2341_v28  ;;  %v2351_v10 = vadd.f32 1.0, %v7779_v20  ;;  %v1273_v28 = vmul.f32 %v9810_v23, %v12052_v19  ;;  %12053 = vst [vmem:[#allocation15_spill] sm:$0xff] %v9845_v22  ;;  %v9847_v2 = vpop.f32.mrb[71].mxu1  ;;  %v6026_v21 = vmul.f32 -1.442695, %v9784_v61 }
 0x298   :  { %6845 = vmatpush1.bf16.msra.mxu1 %v12051_v36  ;;  %v7783_v54 = vpop.eup %7782  ;;  %v9841_v11 = vmul.f32 %v7781_v43, %v9611_v49  ;;  %7802 = vrcp.f32 %v2299_v46  ;;  %12054 = vst [vmem:[#allocation64_spill] sm:$0xff] %v9847_v2  ;;  %v9850_v59 = vrot.slane %v8192_v30, %v1242_v55  ;;  %v6069_v49 = vmul.f32 -1.442695, %v9801_v60  ;;  %v12056_v2 = vld [vmem:[#allocation23_spill] sm:$0xff] }
 0x299   :  { %v7785_v48 = vpop.eup %7784  ;;  %7804 = vrcp.f32 %v2351_v10  ;;  %v6027_v46 = vmul.f32 -1.442695, %v9819_v13  ;;  %v9858_v43 = vadd.f32 %v9080_v53, %v1403_v1  ;;  %v9861_v10 = vadd.f32 %v9090_v6, %v1404_v35 }
 0x29a   :  { %v7787_v20 = vpop.eup %7786  ;;  %7806 = vpow2.f32 %v9767_v3  ;;  %v9865_v19 = vadd.f32 %v9830_v32, %v1273_v28  ;;  %v12055_v3 = vld [vmem:[#allocation16_spill] sm:$0xff]  ;;  %v1274_v1 = vmul.f32 %v9850_v59, %v12056_v2  ;;  %v9871_v22 = vrot.slane %v8193_v51, %v1242_v55  ;;  %v12059_v51 = vld [vmem:[#allocation34_spill] sm:$0xff] }
 0x29b   :  { %v7789_v12 = vpop.eup %7788  ;;  %7808 = vpow2.f32 %v6016_v29  ;;  %v1414_v14 = vmul.f32 %v9062_v41, %v12055_v3  ;;  %v2858_v56 = vmul.f32 %v7783_v54, %v9614_v45  ;;  %v6037_v3 = vmul.f32 -1.442695, %v9858_v43 }
 0x29c   :  { %v7791_v30 = vpop.eup %7790  ;;  %v2309_v36 = vadd.f32 1.0, %v7789_v12  ;;  %7810 = vpow2.f32 %v9781_v58  ;;  %v2816_v12 = vmul.f32 %v7785_v48, %v9624_v27  ;;  %v2847_v55 = vmul.f32 %v9771_v57, %v12058_v37  ;;  %v12060_v48 = vld [vmem:[#allocation45_spill] sm:$0xff] }
 0x29d   :  { %v7793_v5 = vpop.eup %7792  ;;  %v2352_v29 = vadd.f32 1.0, %v7791_v30  ;;  %7812 = vpow2.f32 %v6026_v21  ;;  %v1284_v21 = vmul.f32 %v9810_v23, %v12057_v4  ;;  %v2805_v2 = vmul.f32 %v9777_v63, %v12059_v51  ;;  %v9903_v51 = vpop.f32.mrb[96].mxu0 }
 0x29e   :  { %v7795_v35 = vpop.eup %7794  ;;  %7814 = vrcp.f32 %v2309_v36  ;;  %v2310_v58 = vadd.f32 1.0, %v7793_v5  ;;  %v5907_v5 = vmul.f32 -1.442695, %v9865_v19  ;;  %v9886_v54 = vadd.f32 %v9080_v53, %v1414_v14  ;;  %v12061_v14 = vld [vmem:[#allocation20_spill] sm:$0xff]  ;;  %12063 = vst [vmem:[#allocation23_spill] sm:$0xff] %v9903_v51 }
 0x29f   :  { %v7797_v28 = vpop.eup %7796  ;;  %7816 = vrcp.f32 %v2352_v29  ;;  %v2362_v31 = vadd.f32 1.0, %v7795_v35  ;;  %v1415_v4 = vmul.f32 %v9083_v18, %v12060_v48  ;;  %v9893_v57 = vadd.f32 %v9871_v22, %v1274_v1 }
 0x2a0   :  { %v7799_v30 = vpop.eup %7798  ;;  %7818 = vrcp.f32 %v2310_v58  ;;  %v2320_v45 = vadd.f32 1.0, %v7797_v28  ;;  %v6822_v63 = vpack.c.bf16 %v2858_v56, %v2847_v55  ;;  %v6846_v37 = vpack.c.bf16 %v2816_v12, %v2805_v2  ;;  %v9901_v28 = vpop.f32.mrb[72].mxu1 }
 0x2a1   :  { %v9882_v27 = vpop.eup %7800  ;;  %7820 = vrcp.f32 %v2362_v31  ;;  %v6038_v31 = vmul.f32 -1.442695, %v9861_v10  ;;  %v9897_v35 = vadd.f32 %v9830_v32, %v1284_v21  ;;  %v1285_v58 = vmul.f32 %v9850_v59, %v12061_v14  ;;  %12062 = vst [vmem:[#allocation16_spill] sm:$0xff] %v9901_v28  ;;  %v9913_v21 = vpop.f32.mrb[73].mxu1 }
 0x2a2   :  { %v9890_v36 = vpop.eup %7802  ;;  %7822 = vrcp.f32 %v2320_v45  ;;  %v9906_v1 = vmul.f32 %v7787_v20, %v9642_v44  ;;  %6823 = vmatprep.subr.bf16.mxu0 %v6822_v63  ;;  %6847 = vmatprep.subr.bf16.mxu1 %v6846_v37  ;;  %12065 = vst [vmem:[#allocation22_spill] sm:$0xff] %v9913_v21  ;;  %v9915_v55 = vpop.f32.mrb[97].mxu0  ;;  %v6048_v14 = vmul.f32 -1.442695, %v9886_v54  ;;  %v9919_v44 = vadd.f32 %v9090_v6, %v1415_v4 }
 0x2a3   :  { %v7805_v29 = vpop.eup %7804  ;;  %7824 = vpow2.f32 %v6069_v49  ;;  %v12064_v49 = vld [vmem:[#allocation47_spill] sm:$0xff]  ;;  %12066 = vst [vmem:[#allocation56_spill] sm:$0xff] %v9915_v55  ;;  %v12068_v20 = vpack.c.bf16 %v9841_v11, %v9838_v62  ;;  %v9937_v62 = vpop.f32.mrb[98].mxu0  ;;  %v12078_v55 = vld [vmem:[#allocation32_spill] sm:$0xff] }
 0x2a4   :  { %v7807_v45 = vpop.eup %7806  ;;  %v9909_v56 = vmul.f32 %v7805_v29, %v9679_v17  ;;  %7826 = vpow2.f32 %v6027_v46  ;;  %v1425_v12 = vmul.f32 %v9062_v41, %v12064_v49  ;;  %v12067_v17 = vpack.c.bf16 %v9798_v0, %v9795_v50  ;;  %v12069_v50 = vld [vmem:[#allocation46_spill] sm:$0xff]  ;;  %v9935_v49 = vpop.f32.mrb[74].mxu1  ;;  %12071 = vst [vmem:[#allocation45_spill] sm:$0xff] %v9937_v62 }
 0x2a5   :  { %v7809_v2 = vpop.eup %7808  ;;  %v2363_v48 = vadd.f32 1.0, %v7807_v45  ;;  %7828 = vpow2.f32 %v6037_v3  ;;  %6849 = vmatpush1.bf16.msra.mxu1 %v12068_v20  ;;  %v5908_v3 = vmul.f32 -1.442695, %v9893_v57  ;;  %v9931_v45 = vadd.f32 %v9871_v22, %v1285_v58  ;;  %12070 = vst [vmem:[#allocation34_spill] sm:$0xff] %v9935_v49  ;;  %v9952_v62 = vpop.f32.mrb[75].mxu1  ;;  %v12076_v49 = vld [vmem:[#allocation51_spill] sm:$0xff] }
 0x2a6   :  { %6825 = vmatpush1.bf16.msra.mxu0 %v12067_v17  ;;  %v7811_v46 = vpop.eup %7810  ;;  %v2321_v37 = vadd.f32 1.0, %v7809_v2  ;;  %7830 = vpow2.f32 %v5907_v5  ;;  %v1295_v0 = vmul.f32 %v9810_v23, %v12069_v50  ;;  %v9940_v5 = vadd.f32 %v9080_v53, %v1425_v12  ;;  %v12072_v2 = vld [vmem:[#allocation49_spill] sm:$0xff]  ;;  %v12073_v50 = vld [vmem:[#allocation24_spill] sm:$0xff]  ;;  %12074 = vst [vmem:[#allocation20_spill] sm:$0xff] %v9952_v62 }
 0x2a7   :  { %v7813_v29 = vpop.eup %7812  ;;  %7832 = vrcp.f32 %v2363_v48  ;;  %v2373_v4 = vadd.f32 1.0, %v7811_v46  ;;  %v1426_v48 = vmul.f32 %v9083_v18, %v12072_v2  ;;  %v9945_v58 = vmul.f32 %v7799_v30, %v9645_v38 }
 0x2a8   :  { %v7815_v11 = vpop.eup %7814  ;;  %7834 = vrcp.f32 %v2321_v37  ;;  %v2331_v17 = vadd.f32 1.0, %v7813_v29  ;;  %v1296_v63 = vmul.f32 %v9850_v59, %v12073_v50  ;;  %v9954_v37 = vpop.f32.mrb[99].mxu0  ;;  %v5918_v29 = vmul.f32 -1.442695, %v9897_v35 }
 0x2a9   :  { %v7817_v20 = vpop.eup %7816  ;;  %v9948_v46 = vmul.f32 %v7815_v11, %v9692_v7  ;;  %7836 = vrcp.f32 %v2373_v4  ;;  %12075 = vst [vmem:[#allocation47_spill] sm:$0xff] %v9954_v37  ;;  %v6049_v2 = vmul.f32 -1.442695, %v9919_v44  ;;  %v1436_v38 = vmul.f32 %v9062_v41, %v12076_v49  ;;  %v12077_v11 = vld [vmem:[#allocation48_spill] sm:$0xff] }
 0x2aa   :  { %v7819_v12 = vpop.eup %7818  ;;  %7838 = vrcp.f32 %v2331_v17  ;;  %v5919_v4 = vmul.f32 -1.442695, %v9931_v45  ;;  %v1306_v50 = vmul.f32 %v9810_v23, %v12077_v11  ;;  %v6059_v17 = vmul.f32 -1.442695, %v9940_v5 }
 0x2ab   :  { %v7821_v30 = vpop.eup %7820  ;;  %7840 = vpow2.f32 %v6038_v31  ;;  %v9967_v62 = vadd.f32 %v9830_v32, %v1295_v0  ;;  %v1437_v41 = vmul.f32 %v9083_v18, %v12078_v55  ;;  %v2880_v21 = vmul.f32 %v7817_v20, %v9695_v24 }
 0x2ac   :  { %v7823_v37 = vpop.eup %7822  ;;  %7842 = vpow2.f32 %v5908_v3  ;;  %v9973_v31 = vadd.f32 %v9090_v6, %v1426_v48  ;;  %v9976_v7 = vadd.f32 %v9871_v22, %v1296_v63  ;;  %v2838_v3 = vmul.f32 %v7819_v12, %v9701_v40  ;;  %v9989_v63 = vpop.f32.mrb[100].mxu0 }
 0x2ad   :  { %v7825_v49 = vpop.eup %7824  ;;  %7844 = vpow2.f32 %v6048_v14  ;;  %v9980_v0 = vadd.f32 %v9080_v53, %v1436_v38  ;;  %v2869_v18 = vmul.f32 %v9882_v27, %v9658_v8  ;;  %v9985_v55 = vadd.f32 %v9830_v32, %v1306_v50  ;;  %v9987_v14 = vpop.f32.mrb[76].mxu1  ;;  %12080 = vst [vmem:[#allocation49_spill] sm:$0xff] %v9989_v63  ;;  %v12099_v63 = vld [vmem:[#allocation27_spill] sm:$0xff] }
 0x2ae   :  { %v7827_v11 = vpop.eup %7826  ;;  %v2374_v51 = vadd.f32 1.0, %v7825_v49  ;;  %7846 = vpow2.f32 %v5918_v29  ;;  %12079 = vst [vmem:[#allocation46_spill] sm:$0xff] %v9987_v14  ;;  %v2827_v40 = vmul.f32 %v9890_v36, %v9661_v26  ;;  %v9994_v20 = vadd.f32 %v9090_v6, %v1437_v41  ;;  %v10001_v38 = vpop.f32.mrb[101].mxu0  ;;  %v10012_v6 = vld [vmem:[%s11820_s5 + $0x8] sm:$0x7]  ;;  %v12084_v49 = vld [vmem:[#allocation50_spill] sm:$0xff] }
 0x2af   :  { %v7829_v28 = vpop.eup %7828  ;;  %v2332_v24 = vadd.f32 1.0, %v7827_v11  ;;  %7848 = vpow2.f32 %v6049_v2  ;;  %v5929_v27 = vmul.f32 -1.442695, %v9967_v62  ;;  %v6826_v29 = vpack.c.bf16 %v2880_v21, %v2869_v18  ;;  %v9999_v2 = vpop.f32.mrb[77].mxu1  ;;  %12082 = vst [vmem:[#allocation51_spill] sm:$0xff] %v10001_v38  ;;  %12083 = vst [vmem:[#allocation48_spill] sm:$0xff] %v10012_v6 }
 0x2b0   :  { %v7831_v48 = vpop.eup %7830  ;;  %7850 = vrcp.f32 %v2374_v51  ;;  %v2342_v53 = vadd.f32 1.0, %v7829_v28  ;;  %12081 = vst [vmem:[#allocation24_spill] sm:$0xff] %v9999_v2  ;;  %v6060_v26 = vmul.f32 -1.442695, %v9973_v31  ;;  %v10007_v36 = vmul.f32 -1.442695, %v9976_v7 }
 0x2b1   :  { %v9996_v12 = vpop.eup %7832  ;;  %7852 = vrcp.f32 %v2332_v24  ;;  %v2212_v8 = vadd.f32 1.0, %v7831_v48  ;;  %v6850_v28 = vpack.c.bf16 %v2838_v3, %v2827_v40  ;;  %v10015_v21 = vmul.f32 -1.442695, %v9980_v0  ;;  %6827 = vmatprep.subr.bf16.mxu0 %v6826_v29  ;;  %v10022_v18 = vpop.f32.mrb[78].mxu1  ;;  %v12096_v2 = vld [vmem:[#allocation52_spill] sm:$0xff] }
 0x2b2   :  { %v10003_v50 = vpop.eup %7834  ;;  %7854 = vrcp.f32 %v2342_v53  ;;  %v10018_v41 = vmul.f32 -1.442695, %v9985_v55  ;;  %v1307_v11 = vmul.f32 %v9850_v59, %v12084_v49  ;;  %12085 = vst [vmem:[#allocation32_spill] sm:$0xff] %v10022_v18  ;;  %v10025_v48 = vmul.f32 %v7821_v30, %v9744_v34  ;;  %v12087_v34 = vld [vmem:[#allocation3_spill] sm:$0xff] }
 0x2b3   :  { %v7837_v51 = vpop.eup %7836  ;;  %7856 = vrcp.f32 %v2212_v8  ;;  %v10031_v40 = vmul.f32 -1.442695, %v9994_v20  ;;  %6851 = vmatprep.subr.bf16.mxu1 %v6850_v28  ;;  %v12086_v53 = vpack.c.bf16 %v9909_v56, %v9906_v1  ;;  %v10037_v29 = vmul.f32 %v7823_v37, %v9747_v52  ;;  %v10049_v30 = vld [vmem:[%s11821_s6 + $0x8] sm:$0x7]  ;;  %v12090_v37 = vld [vmem:[#allocation4_spill] sm:$0xff]  ;;  %v10070_v52 = vpop.f32.mrb[102].mxu0 }
 0x2b4   :  { %v7839_v24 = vpop.eup %7838  ;;  %v10028_v3 = vmul.f32 %v7837_v51, %v9759_v25  ;;  %7858 = vpow2.f32 %v5919_v4  ;;  %v10044_v25 = vrot.slane %v10012_v6, %v12087_v34  ;;  %12088 = vst [vmem:[#allocation50_spill] sm:$0xff] %v10049_v30  ;;  %v12089_v1 = vpack.c.bf16 %v9948_v46, %v9945_v58 }
 0x2b5   :  { %6829 = vmatpush1.bf16.msra.mxu0 %v12086_v53  ;;  %v7841_v8 = vpop.eup %7840  ;;  %v10040_v49 = vmul.f32 %v7839_v24, %v9784_v61  ;;  %7860 = vpow2.f32 %v6059_v17  ;;  %v10058_v4 = vrot.slane %v10012_v6, %v12090_v37  ;;  %v12091_v24 = vld [vmem:[#allocation25_spill] sm:$0xff] }
 0x2b6   :  { %6853 = vmatpush1.bf16.msra.mxu1 %v12089_v1  ;;  %v7843_v56 = vpop.eup %7842  ;;  %v2343_v61 = vadd.f32 1.0, %v7841_v8  ;;  %7862 = vpow2.f32 %v5929_v27  ;;  %v1317_v58 = vmul.f32 %v9810_v23, %v12091_v24  ;;  %v10066_v8 = vrot.slane %v10049_v30, %v12087_v34  ;;  %v12092_v27 = vld [vmem:[#allocation28_spill] sm:$0xff]  ;;  %12093 = vst [vmem:[#allocation25_spill] sm:$0xff] %v10070_v52  ;;  %v12095_v34 = vld [vmem:[#allocation53_spill] sm:$0xff]  ;;  %v10082_v52 = vpop.f32.mrb[79].mxu1 }
 0x2b7   :  { %v7845_v17 = vpop.eup %7844  ;;  %v2213_v51 = vadd.f32 1.0, %v7843_v56  ;;  %7864 = vpow2.f32 %v6060_v26  ;;  %v1318_v1 = vmul.f32 %v9850_v59, %v12092_v27  ;;  %v12094_v56 = vld [vmem:[#allocation21_spill] sm:$0xff]  ;;  %v10076_v24 = vrot.slane %v10049_v30, %v12090_v37  ;;  %12097 = vst [vmem:[#allocation28_spill] sm:$0xff] %v10082_v52  ;;  %v12100_v52 = vld [vmem:[#allocation54_spill] sm:$0xff] }
 0x2b8   :  { %v7847_v46 = vpop.eup %7846  ;;  %7866 = vrcp.f32 %v2343_v61  ;;  %v2353_v53 = vadd.f32 1.0, %v7845_v17  ;;  %v1275_v26 = vmul.f32 %v10044_v25, %v12094_v56  ;;  %v1276_v38 = vmul.f32 %v10058_v4, %v12095_v34 }
 0x2b9   :  { %v7849_v18 = vpop.eup %7848  ;;  %7868 = vrcp.f32 %v2213_v51  ;;  %v2223_v28 = vadd.f32 1.0, %v7847_v46  ;;  %v1328_v27 = vmul.f32 %v9810_v23, %v12096_v2  ;;  %v10084_v51 = vpop.f32.mrb[103].mxu0  ;;  %v10088_v37 = vadd.f32 %v9871_v22, %v1307_v11 }
 0x2ba   :  { %v7851_v61 = vpop.eup %7850  ;;  %7870 = vrcp.f32 %v2353_v53  ;;  %v2354_v17 = vadd.f32 1.0, %v7849_v18  ;;  %12098 = vst [vmem:[#allocation21_spill] sm:$0xff] %v10084_v51  ;;  %v1286_v18 = vmul.f32 %v10044_v25, %v12099_v63  ;;  %v10094_v2 = vadd.f32 %v9830_v32, %v1317_v58 }
 0x2bb   :  { %v7853_v46 = vpop.eup %7852  ;;  %v2902_v56 = vmul.f32 %v7851_v61, %v9801_v60  ;;  %7872 = vrcp.f32 %v2223_v28  ;;  %v1329_v51 = vmul.f32 %v9850_v59, %v12100_v52  ;;  %v2891_v60 = vmul.f32 %v9996_v12, %v9750_v33 }
 0x2bc   :  { %v7855_v53 = vpop.eup %7854  ;;  %v2860_v34 = vmul.f32 %v7853_v46, %v9819_v13  ;;  %7874 = vrcp.f32 %v2354_v17  ;;  %v10102_v11 = vadd.f32 %v10066_v8, %v1275_v26  ;;  %v10105_v63 = vadd.f32 %v9871_v22, %v1318_v1 }
 0x2bd   :  { %v7857_v14 = vpop.eup %7856  ;;  %7876 = vpow2.f32 %v10007_v36  ;;  %v2849_v28 = vmul.f32 %v10003_v50, %v9754_v47  ;;  %v10111_v52 = vadd.f32 %v10076_v24, %v1276_v38  ;;  %v10114_v58 = vadd.f32 %v9830_v32, %v1328_v27  ;;  %v10124_v50 = vpop.f32.mrb[104].mxu0 }
 0x2be   :  { %v7859_v13 = vpop.eup %7858  ;;  %7878 = vpow2.f32 %v10015_v21  ;;  %v10118_v36 = vadd.f32 %v10066_v8, %v1286_v18  ;;  %v6830_v1 = vpack.c.bf16 %v2902_v56, %v2891_v60  ;;  %v10122_v47 = vadd.f32 %v9871_v22, %v1329_v51  ;;  %12101 = vst [vmem:[#allocation53_spill] sm:$0xff] %v10124_v50  ;;  %v10128_v46 = vpop.f32.mrb[105].mxu0  ;;  %v12103_v51 = vld [vmem:[#allocation26_spill] sm:$0xff] }
 0x2bf   :  { %v7861_v33 = vpop.eup %7860  ;;  %v2224_v12 = vadd.f32 1.0, %v7859_v13  ;;  %7880 = vpow2.f32 %v10018_v41  ;;  %v6854_v38 = vpack.c.bf16 %v2860_v34, %v2849_v28  ;;  %v5941_v27 = vmul.f32 -1.442695, %v10088_v37  ;;  %12102 = vst [vmem:[#allocation52_spill] sm:$0xff] %v10128_v46  ;;  %v10136_v13 = vpop.f32.mrb[106].mxu0 }
 0x2c0   :  { %v7863_v26 = vpop.eup %7862  ;;  %v2364_v61 = vadd.f32 1.0, %v7861_v33  ;;  %7882 = vpow2.f32 %v10031_v40  ;;  %v5951_v41 = vmul.f32 -1.442695, %v10094_v2  ;;  %6831 = vmatprep.subr.bf16.mxu0 %v6830_v1  ;;  %v5952_v40 = vmul.f32 -1.442695, %v10105_v63  ;;  %12105 = vst [vmem:[#allocation27_spill] sm:$0xff] %v10136_v13 }
 0x2c1   :  { %v7865_v21 = vpop.eup %7864  ;;  %7884 = vrcp.f32 %v2224_v12  ;;  %v2234_v17 = vadd.f32 1.0, %v7863_v26  ;;  %v1287_v34 = vmul.f32 %v10058_v4, %v12103_v51  ;;  %6855 = vmatprep.subr.bf16.mxu1 %v6854_v38  ;;  %v12104_v60 = vpack.c.bf16 %v10028_v3, %v10025_v48  ;;  %v12106_v1 = vld [vmem:[#allocation29_spill] sm:$0xff]  ;;  %v10145_v38 = vpop.f32.mrb[107].mxu0  ;;  %v12109_v13 = vld [vmem:[#allocation6_spill] sm:$0xff] }
 0x2c2   :  { %v7867_v56 = vpop.eup %7866  ;;  %7886 = vrcp.f32 %v2364_v61  ;;  %v2365_v18 = vadd.f32 1.0, %v7865_v21  ;;  %v5909_v33 = vmul.f32 -1.442695, %v10102_v11  ;;  %v5910_v12 = vmul.f32 -1.442695, %v10111_v52  ;;  %12108 = vst [vmem:[#allocation54_spill] sm:$0xff] %v10145_v38 }
 0x2c3   :  { %6833 = vmatpush1.bf16.msra.mxu0 %v12104_v60  ;;  %v7869_v28 = vpop.eup %7868  ;;  %7888 = vrcp.f32 %v2234_v17  ;;  %v1339_v26 = vmul.f32 %v9810_v23, %v12106_v1  ;;  %v12107_v61 = vpack.c.bf16 %v10040_v49, %v10037_v29  ;;  %v5962_v48 = vmul.f32 -1.442695, %v10114_v58  ;;  %v10159_v49 = vld [vmem:[%s11822_s7] sm:$0x3] }
 0x2c4   :  { %v7871_v21 = vpop.eup %7870  ;;  %7890 = vrcp.f32 %v2365_v18  ;;  %v5920_v3 = vmul.f32 -1.442695, %v10118_v36  ;;  %v10150_v17 = vmul.f32 -1.442695, %v10122_v47  ;;  %v2870_v60 = vmul.f32 %v7855_v53, %v9858_v43 }
 0x2c5   :  { %6857 = vmatpush1.bf16.msra.mxu1 %v12107_v61  ;;  %v7873_v51 = vpop.eup %7872  ;;  %v2881_v1 = vmul.f32 %v7871_v21, %v9886_v54  ;;  %7892 = vpow2.f32 %v5941_v27  ;;  %v1297_v29 = vmul.f32 %v10044_v25, %v12109_v13  ;;  %v10163_v61 = vmul.f32 %v7857_v14, %v9865_v19  ;;  %v12111_v21 = vld [vmem:[#allocation30_spill] sm:$0xff] }
 0x2c6   :  { %3047 = vmatmul.mubr.f32.vlgmr.msra.gmra.mrb[112].mxu0 %v10159_v49  ;;  %v7875_v18 = vpop.eup %7874  ;;  %v10166_v38 = vmul.f32 %v7873_v51, %v9897_v35  ;;  %7894 = vpow2.f32 %v5951_v41  ;;  %v10169_v43 = vadd.f32 %v10076_v24, %v1287_v34  ;;  %v12110_v54 = vmov 0.0   ;;  %v10180_v34 = vpop.f32.mrb[108].mxu0 }
 0x2c7   :  { %3188 = vmatprep.mubr.f32.mxu0 %v12110_v54  ;;  %v7877_v53 = vpop.eup %7876  ;;  %v6860_v27 = vpack.c.bf16 %v2881_v1, %v2870_v60  ;;  %7896 = vpow2.f32 %v5909_v33  ;;  %v10173_v13 = vadd.f32 %v9830_v32, %v1339_v26  ;;  %v1340_v46 = vmul.f32 %v9850_v59, %v12111_v21  ;;  %12112 = vst [vmem:[#allocation26_spill] sm:$0xff] %v10180_v34  ;;  %v12113_v26 = vld [vmem:[#allocation31_spill] sm:$0xff]  ;;  %v10187_v1 = vpop.f32.mrb[109].mxu0 }
 0x2c8   :  { %v7879_v19 = vpop.eup %7878  ;;  %v6868_v35 = vpack.c.bf16 %v10166_v38, %v10163_v61  ;;  %v2882_v14 = vmul.f32 %v7875_v18, %v9919_v44  ;;  %v2235_v41 = vadd.f32 1.0, %v7877_v53  ;;  %7898 = vpow2.f32 %v5952_v40  ;;  %12114 = vst [vmem:[#allocation29_spill] sm:$0xff] %v10187_v1  ;;  %v12115_v18 = vld [vmem:[#allocation33_spill] sm:$0xff]  ;;  %v10192_v61 = vpop.f32.mrb[110].mxu0  ;;  %v12118_v34 = vld [vmem:[#allocation35_spill] sm:$0xff] }
 0x2c9   :  { %v7881_v51 = vpop.eup %7880  ;;  %v2375_v50 = vadd.f32 1.0, %v7879_v19  ;;  %7900 = vpow2.f32 %v5910_v12  ;;  %v10183_v33 = vadd.f32 %v10066_v8, %v1297_v29  ;;  %v1298_v60 = vmul.f32 %v10058_v4, %v12113_v26  ;;  %12116 = vst [vmem:[#allocation6_spill] sm:$0xff] %v10192_v61  ;;  %v12117_v29 = vld [vmem:[#allocation55_spill] sm:$0xff]  ;;  %v10198_v1 = vpop.f32.mrb[111].mxu0  ;;  %v12121_v61 = vld [vmem:[#allocation58_spill] sm:$0xff] }
 0x2ca   :  { %v7883_v21 = vpop.eup %7882  ;;  %v2871_v38 = vmul.f32 %v7867_v56, %v9861_v10  ;;  %7902 = vrcp.f32 %v2235_v41  ;;  %v2245_v44 = vadd.f32 1.0, %v7881_v51  ;;  %v1350_v40 = vmul.f32 %v9810_v23, %v12115_v18  ;;  %12119 = vst [vmem:[#allocation30_spill] sm:$0xff] %v10198_v1  ;;  %v12120_v18 = vld [vmem:[#allocation57_spill] sm:$0xff] }
 0x2cb   :  { %v7885_v53 = vpop.eup %7884  ;;  %7904 = vrcp.f32 %v2375_v50  ;;  %v2376_v12 = vadd.f32 1.0, %v7883_v21  ;;  %v1308_v19 = vmul.f32 %v10044_v25, %v12117_v29  ;;  %v1351_v26 = vmul.f32 %v9850_v59, %v12118_v34 }
 0x2cc   :  { %v7887_v30 = vpop.eup %7886  ;;  %v2741_v10 = vmul.f32 %v7869_v28, %v9893_v57  ;;  %v2752_v56 = vmul.f32 %v7885_v53, %v9931_v45  ;;  %7906 = vrcp.f32 %v2245_v44  ;;  %v6858_v41 = vpack.c.bf16 %v2882_v14, %v2871_v38 }
 0x2cd   :  { %v7889_v51 = vpop.eup %7888  ;;  %7908 = vrcp.f32 %v2376_v12  ;;  %v5921_v50 = vmul.f32 -1.442695, %v10169_v43  ;;  %v10204_v21 = vadd.f32 %v9871_v22, %v1340_v46  ;;  %v1309_v29 = vmul.f32 %v10058_v4, %v12120_v18 }
 0x2ce   :  { %v7891_v34 = vpop.eup %7890  ;;  %7910 = vpow2.f32 %v5962_v48  ;;  %v5973_v1 = vmul.f32 -1.442695, %v10173_v13  ;;  %v1361_v57 = vmul.f32 %v9810_v23, %v12121_v61  ;;  %6859 = vmatprep.subr.bf16.mxu1 %v6858_v41  ;;  %v6866_v45 = vpack.c.bf16 %v2752_v56, %v2741_v10 }
 0x2cf   :  { %v7893_v28 = vpop.eup %7892  ;;  %7912 = vpow2.f32 %v5920_v3  ;;  %v5931_v14 = vmul.f32 -1.442695, %v10183_v33  ;;  %v10213_v38 = vadd.f32 %v10076_v24, %v1298_v60  ;;  %v10216_v46 = vadd.f32 %v9830_v32, %v1350_v40  ;;  %6861 = vmatpush1.bf16.msra.mxu1 %v6860_v27  ;;  %v12123_v40 = vld [vmem:[#allocation59_spill] sm:$0xff] }
 0x2d0   :  { %v7895_v44 = vpop.eup %7894  ;;  %v2246_v48 = vadd.f32 1.0, %v7893_v28  ;;  %7914 = vpow2.f32 %v10150_v17  ;;  %v10220_v53 = vadd.f32 %v10066_v8, %v1308_v19  ;;  %v10223_v61 = vadd.f32 %v9871_v22, %v1351_v26  ;;  %6867 = vmatprep.subr.bf16.mxu0 %v6866_v45 }
 0x2d1   :  { %v7897_v3 = vpop.eup %7896  ;;  %v2256_v12 = vadd.f32 1.0, %v7895_v44  ;;  %7916 = vpow2.f32 %v5921_v50  ;;  %v10226_v60 = vadd.f32 %v10076_v24, %v1309_v29  ;;  %v1319_v27 = vmul.f32 %v10044_v25, %v12123_v40  ;;  %6869 = vmatpush1.bf16.msra.mxu0 %v6868_v35 }
 0x2d2   :  { %v7899_v10 = vpop.eup %7898  ;;  %7918 = vrcp.f32 %v2246_v48  ;;  %v2214_v17 = vadd.f32 1.0, %v7897_v3  ;;  %v5974_v19 = vmul.f32 -1.442695, %v10204_v21  ;;  %v10232_v56 = vadd.f32 %v9830_v32, %v1361_v57  ;;  %v12124_v3 = vld [vmem:[#allocation18_spill] sm:$0xff] }
 0x2d3   :  { %12122 = vst [vmem:[#allocation31_spill] sm:$0xff] %v10226_v60  ;;  %v7901_v26 = vpop.eup %7900  ;;  %7920 = vrcp.f32 %v2256_v12  ;;  %v2257_v41 = vadd.f32 1.0, %v7899_v10  ;;  %v5932_v50 = vmul.f32 -1.442695, %v10213_v38  ;;  %v5984_v18 = vmul.f32 -1.442695, %v10216_v46 }
 0x2d4   :  { %v7903_v29 = vpop.eup %7902  ;;  %7922 = vrcp.f32 %v2214_v17  ;;  %v2215_v45 = vadd.f32 1.0, %v7901_v26  ;;  %v5942_v35 = vmul.f32 -1.442695, %v10220_v53  ;;  %v10238_v28 = vmul.f32 -1.442695, %v10223_v61 }
 0x2d5   :  { %v7905_v44 = vpop.eup %7904  ;;  %7924 = vrcp.f32 %v2257_v41  ;;  %v10241_v57 = vmul.f32 -1.442695, %v10226_v60  ;;  %v10244_v48 = vadd.f32 %v10066_v8, %v1319_v27  ;;  %v1362_v12 = vmul.f32 %v9850_v59, %v12124_v3  ;;  %v12125_v27 = vld [vmem:[#allocation61_spill] sm:$0xff] }
 0x2d6   :  { %v7907_v40 = vpop.eup %7906  ;;  %v2892_v10 = vmul.f32 %v7887_v30, %v9940_v5  ;;  %v2903_v17 = vmul.f32 %v7905_v44, %v9980_v0  ;;  %7926 = vrcp.f32 %v2215_v45  ;;  %v10251_v26 = vmul.f32 -1.442695, %v10232_v56  ;;  %v12126_v0 = vld [vmem:[#allocation60_spill] sm:$0xff] }
 0x2d7   :  { %v7909_v6 = vpop.eup %7908  ;;  %v10254_v41 = vmul.f32 %v7889_v51, %v9967_v62  ;;  %v2773_v42 = vmul.f32 %v7907_v40, %v9985_v55  ;;  %7928 = vpow2.f32 %v5973_v1  ;;  %v1320_v39 = vmul.f32 %v10058_v4, %v12125_v27  ;;  %v12127_v40 = vld [vmem:[#allocation5_spill] sm:$0xff] }
 0x2d8   :  { %v7911_v3 = vpop.eup %7910  ;;  %v6864_v60 = vpack.c.bf16 %v2903_v17, %v2892_v10  ;;  %v2904_v5 = vmul.f32 %v7909_v6, %v9994_v20  ;;  %7930 = vpow2.f32 %v5931_v14  ;;  %v1372_v30 = vmul.f32 %v9810_v23, %v12126_v0  ;;  %v12128_v10 = vld [vmem:[#allocation62_spill] sm:$0xff] }
 0x2d9   :  { %v7913_v45 = vpop.eup %7912  ;;  %v2893_v44 = vmul.f32 %v7891_v34, %v9973_v31  ;;  %v6872_v62 = vpack.c.bf16 %v2773_v42, %v10254_v41  ;;  %v2267_v51 = vadd.f32 1.0, %v7911_v3  ;;  %7932 = vpow2.f32 %v5974_v19 }
 0x2da   :  { %v7915_v55 = vpop.eup %7914  ;;  %v2225_v1 = vadd.f32 1.0, %v7913_v45  ;;  %7934 = vpow2.f32 %v5932_v50  ;;  %v1330_v27 = vmul.f32 %v10044_v25, %v12127_v40  ;;  %v1373_v20 = vmul.f32 %v9850_v59, %v12128_v10 }
 0x2db   :  { %v7917_v6 = vpop.eup %7916  ;;  %7936 = vrcp.f32 %v2267_v51  ;;  %v2268_v14 = vadd.f32 1.0, %v7915_v55  ;;  %v1331_v17 = vmul.f32 %v10058_v4, %v9587_v16  ;;  %v6862_v31 = vpack.c.bf16 %v2904_v5, %v2893_v44  ;;  %v12129_v55 = vld [vmem:[#allocation36_spill] sm:$0xff] }
 0x2dc   :  { %v7919_v34 = vpop.eup %7918  ;;  %7938 = vrcp.f32 %v2225_v1  ;;  %v2226_v42 = vadd.f32 1.0, %v7917_v6  ;;  %v10271_v19 = vadd.f32 %v9871_v22, %v1362_v12  ;;  %v10274_v50 = vadd.f32 %v10076_v24, %v1320_v39 }
 0x2dd   :  { %v7921_v41 = vpop.eup %7920  ;;  %v2763_v3 = vmul.f32 %v7903_v29, %v9976_v7  ;;  %v2774_v0 = vmul.f32 %v7919_v34, %v10088_v37  ;;  %7940 = vrcp.f32 %v2268_v14  ;;  %v1383_v45 = vmul.f32 %v9810_v23, %v9606_v15  ;;  %6863 = vmatprep.subr.bf16.mxu1 %v6862_v31 }
 0x2de   :  { %v7923_v16 = vpop.eup %7922  ;;  %7942 = vrcp.f32 %v2226_v42  ;;  %v5953_v5 = vmul.f32 -1.442695, %v10244_v48  ;;  %v10282_v12 = vadd.f32 %v9830_v32, %v1372_v30  ;;  %v10285_v39 = vadd.f32 %v10066_v8, %v1330_v27  ;;  %6865 = vmatpush1.bf16.msra.mxu1 %v6864_v60  ;;  %v12130_v27 = vld [vmem:[#allocation17_spill] sm:$0xff] }
 0x2df   :  { %v7925_v44 = vpop.eup %7924  ;;  %7944 = vpow2.f32 %v5984_v18  ;;  %v10288_v7 = vadd.f32 %v9871_v22, %v1373_v20  ;;  %v10291_v37 = vadd.f32 %v10076_v24, %v1331_v17  ;;  %v6870_v15 = vpack.c.bf16 %v2774_v0, %v2763_v3 }
 0x2e0   :  { %v7927_v29 = vpop.eup %7926  ;;  %7946 = vpow2.f32 %v5942_v35  ;;  %v5996_v51 = vmul.f32 -1.442695, %v10271_v19  ;;  %v1341_v30 = vmul.f32 %v10044_v25, %v9629_v9  ;;  %v1384_v1 = vmul.f32 %v9850_v59, %v12129_v55 }
 0x2e1   :  { %v7929_v60 = vpop.eup %7928  ;;  %7948 = vpow2.f32 %v10238_v28  ;;  %v5954_v18 = vmul.f32 -1.442695, %v10274_v50  ;;  %v10301_v40 = vadd.f32 %v9830_v32, %v1383_v45  ;;  %v1342_v10 = vmul.f32 %v10058_v4, %v12130_v27  ;;  %6871 = vmatprep.subr.bf16.mxu0 %v6870_v15  ;;  %3118 = vmatmul.mubr.f32.vlgmr.msra.gmra.mrb[82].mxu1 %v10159_v49 }
 0x2e2   :  { %v7931_v35 = vpop.eup %7930  ;;  %v2278_v20 = vadd.f32 1.0, %v7929_v60  ;;  %7950 = vpow2.f32 %v10241_v57  ;;  %v6006_v9 = vmul.f32 -1.442695, %v10282_v12  ;;  %v10309_v6 = vmul.f32 -1.442695, %v10285_v39  ;;  %6873 = vmatpush1.bf16.msra.mxu0 %v6872_v62  ;;  %3259 = vmatprep.mubr.f32.mxu1 %v12110_v54 }
 0x2e3   :  { %v7933_v28 = vpop.eup %7932  ;;  %v2236_v14 = vadd.f32 1.0, %v7931_v35  ;;  %7952 = vpow2.f32 %v10251_v26  ;;  %v10314_v17 = vmul.f32 -1.442695, %v10288_v7  ;;  %v10317_v49 = vmul.f32 -1.442695, %v10291_v37 }
 0x2e4   :  { %v7935_v31 = vpop.eup %7934  ;;  %7954 = vrcp.f32 %v2278_v20  ;;  %v2279_v57 = vadd.f32 1.0, %v7933_v28  ;;  %v10320_v34 = vadd.f32 %v10066_v8, %v1341_v30  ;;  %v10323_v62 = vadd.f32 %v9871_v22, %v1384_v1  ;;  %v12131_v30 = vld [vmem:[#allocation37_spill] sm:$0xff] }
 0x2e5   :  { %v7937_v42 = vpop.eup %7936  ;;  %7956 = vrcp.f32 %v2236_v14  ;;  %v2237_v3 = vadd.f32 1.0, %v7935_v31  ;;  %v10326_v26 = vmul.f32 -1.442695, %v10301_v40  ;;  %v10329_v0 = vadd.f32 %v10076_v24, %v1342_v10  ;;  %v12132_v20 = vld [vmem:[#allocation9_spill] sm:$0xff] }
 0x2e6   :  { %v7939_v45 = vpop.eup %7938  ;;  %v2784_v15 = vmul.f32 %v7921_v41, %v10094_v2  ;;  %v2795_v55 = vmul.f32 %v7937_v42, %v10114_v58  ;;  %7958 = vrcp.f32 %v2279_v57  ;;  %v1394_v60 = vmul.f32 %v9810_v23, %v12131_v30 }
 0x2e7   :  { %v7941_v1 = vpop.eup %7940  ;;  %v2742_v27 = vmul.f32 %v7923_v16, %v10102_v11  ;;  %v2753_v35 = vmul.f32 %v7939_v45, %v10118_v36  ;;  %7960 = vrcp.f32 %v2237_v3  ;;  %v1352_v28 = vmul.f32 %v10044_v25, %v12132_v20  ;;  %v12133_v16 = vld [vmem:[#allocation19_spill] sm:$0xff] }
 0x2e8   :  { %v7943_v10 = vpop.eup %7942  ;;  %v2785_v14 = vmul.f32 %v7925_v44, %v10105_v63  ;;  %v6876_v31 = vpack.c.bf16 %v2795_v55, %v2784_v15  ;;  %v2796_v2 = vmul.f32 %v7941_v1, %v10122_v47  ;;  %7962 = vpow2.f32 %v5953_v5  ;;  %v12134_v44 = vld [vmem:[#allocation7_spill] sm:$0xff] }
 0x2e9   :  { %v7945_v58 = vpop.eup %7944  ;;  %v2743_v41 = vmul.f32 %v7927_v29, %v10111_v52  ;;  %v6900_v57 = vpack.c.bf16 %v2753_v35, %v2742_v27  ;;  %v2754_v42 = vmul.f32 %v7943_v10, %v10169_v43  ;;  %7964 = vpow2.f32 %v5996_v51  ;;  %v12135_v29 = vld [vmem:[#allocation39_spill] sm:$0xff]  ;;  %v12136_v51 = vld [vmem:[#allocation38_spill] sm:$0xff] }
 0x2ea   :  { %v7947_v11 = vpop.eup %7946  ;;  %v2289_v36 = vadd.f32 1.0, %v7945_v58  ;;  %7966 = vpow2.f32 %v5954_v18  ;;  %v1395_v3 = vmul.f32 %v9850_v59, %v12133_v16  ;;  %v6874_v45 = vpack.c.bf16 %v2796_v2, %v2785_v14 }
 0x2eb   :  { %v7949_v30 = vpop.eup %7948  ;;  %v2247_v63 = vadd.f32 1.0, %v7947_v11  ;;  %7968 = vpow2.f32 %v6006_v9  ;;  %v1353_v47 = vmul.f32 %v10058_v4, %v12134_v44  ;;  %v6898_v5 = vpack.c.bf16 %v2754_v42, %v2743_v41  ;;  %v12137_v9 = vld [vmem:[#allocation41_spill] sm:$0xff] }
 0x2ec   :  { %v7951_v15 = vpop.eup %7950  ;;  %7970 = vrcp.f32 %v2289_v36  ;;  %v2290_v52 = vadd.f32 1.0, %v7949_v30  ;;  %v1405_v43 = vmul.f32 %v9810_v23, %v12135_v29  ;;  %v1363_v18 = vmul.f32 %v10044_v25, %v12136_v51  ;;  %6875 = vmatprep.subr.bf16.mxu0 %v6874_v45  ;;  %v12141_v45 = vld [vmem:[#allocation40_spill] sm:$0xff] }
 0x2ed   :  { %v7953_v55 = vpop.eup %7952  ;;  %7972 = vrcp.f32 %v2247_v63  ;;  %v2248_v1 = vadd.f32 1.0, %v7951_v15  ;;  %v10352_v27 = vadd.f32 %v9830_v32, %v1394_v60  ;;  %v1406_v35 = vmul.f32 %v9850_v59, %v12137_v9  ;;  %6899 = vmatprep.subr.bf16.mxu1 %v6898_v5  ;;  %6877 = vmatpush1.bf16.msra.mxu0 %v6876_v31  ;;  %v12142_v5 = vld [vmem:[#allocation11_spill] sm:$0xff] }
 0x2ee   :  { %v7955_v20 = vpop.eup %7954  ;;  %7974 = vrcp.f32 %v2290_v52  ;;  %v2300_v10 = vadd.f32 1.0, %v7953_v55  ;;  %v10357_v14 = vadd.f32 %v10066_v8, %v1352_v28  ;;  %v10360_v2 = vadd.f32 %v9871_v22, %v1395_v3  ;;  %6901 = vmatpush1.bf16.msra.mxu1 %v6900_v57 }
 0x2ef   :  { %v7957_v58 = vpop.eup %7956  ;;  %7976 = vrcp.f32 %v2248_v1  ;;  %v5975_v60 = vmul.f32 -1.442695, %v10320_v34  ;;  %v6018_v41 = vmul.f32 -1.442695, %v10323_v62  ;;  %v10365_v42 = vadd.f32 %v10076_v24, %v1353_v47 }
 0x2f0   :  { %v7959_v31 = vpop.eup %7958  ;;  %7978 = vrcp.f32 %v2300_v10  ;;  %v5976_v11 = vmul.f32 -1.442695, %v10329_v0  ;;  %v10369_v28 = vadd.f32 %v9830_v32, %v1405_v43  ;;  %v10372_v36 = vadd.f32 %v10066_v8, %v1363_v18 }
 0x2f1   :  { %v7961_v57 = vpop.eup %7960  ;;  %7980 = vpow2.f32 %v10309_v6  ;;  %v6028_v16 = vmul.f32 -1.442695, %v10352_v27  ;;  %v10377_v3 = vadd.f32 %v9871_v22, %v1406_v35  ;;  %v1364_v30 = vmul.f32 %v10058_v4, %v12141_v45  ;;  %v12143_v45 = vld [vmem:[#allocation14_spill] sm:$0xff] }
 0x2f2   :  { %12138 = vst [vmem:[#allocation33_spill] sm:$0xff] %v10369_v28  ;;  %12139 = vst [vmem:[#allocation55_spill] sm:$0xff] %v10372_v36  ;;  %v7963_v63 = vpop.eup %7962  ;;  %7982 = vpow2.f32 %v10314_v17  ;;  %v5986_v44 = vmul.f32 -1.442695, %v10357_v14  ;;  %v10384_v47 = vmul.f32 -1.442695, %v10360_v2  ;;  %v1416_v15 = vmul.f32 %v9810_v23, %v12142_v5 }
 0x2f3   :  { %12140 = vst [vmem:[#allocation35_spill] sm:$0xff] %v10377_v3  ;;  %v7965_v6 = vpop.eup %7964  ;;  %v2258_v52 = vadd.f32 1.0, %v7963_v63  ;;  %7984 = vpow2.f32 %v10317_v49  ;;  %v10390_v29 = vmul.f32 -1.442695, %v10365_v42  ;;  %v10394_v17 = vmul.f32 -1.442695, %v10369_v28 }
 0x2f4   :  { %v7967_v43 = vpop.eup %7966  ;;  %v2301_v51 = vadd.f32 1.0, %v7965_v6  ;;  %7986 = vpow2.f32 %v10326_v26  ;;  %v10397_v18 = vmul.f32 -1.442695, %v10372_v36  ;;  %v10400_v9 = vmul.f32 -1.442695, %v10377_v3 }
 0x2f5   :  { %v7969_v55 = vpop.eup %7968  ;;  %7988 = vrcp.f32 %v2258_v52  ;;  %v2259_v1 = vadd.f32 1.0, %v7967_v43  ;;  %v10403_v49 = vadd.f32 %v10076_v24, %v1364_v30  ;;  %v10406_v26 = vadd.f32 %v9830_v32, %v1416_v15  ;;  %v12144_v43 = vld [vmem:[#allocation13_spill] sm:$0xff]  ;;  %v12145_v15 = vld [vmem:[#allocation43_spill] sm:$0xff] }
 0x2f6   :  { %v7971_v35 = vpop.eup %7970  ;;  %7990 = vrcp.f32 %v2301_v51  ;;  %v2311_v10 = vadd.f32 1.0, %v7969_v55  ;;  %v1374_v63 = vmul.f32 %v10044_v25, %v12143_v45  ;;  %v2806_v6 = vmul.f32 %v7955_v20, %v10173_v13 }
 0x2f7   :  { %v7973_v5 = vpop.eup %7972  ;;  %v2817_v52 = vmul.f32 %v7971_v35, %v10216_v46  ;;  %7992 = vrcp.f32 %v2259_v1  ;;  %v1417_v54 = vmul.f32 %v9850_v59, %v12144_v43  ;;  %v2764_v3 = vmul.f32 %v7957_v58, %v10183_v33  ;;  %v12146_v35 = vld [vmem:[#allocation31_spill] sm:$0xff]  ;;  %v12147_v58 = vld [vmem:[#allocation42_spill] sm:$0xff] }
 0x2f8   :  { %v7975_v30 = vpop.eup %7974  ;;  %v2775_v51 = vmul.f32 %v7973_v5, %v10220_v53  ;;  %7994 = vrcp.f32 %v2311_v10  ;;  %v1375_v55 = vmul.f32 %v10058_v4, %v12145_v15  ;;  %v2807_v45 = vmul.f32 %v7959_v31, %v10204_v21 }
 0x2f9   :  { %v7977_v36 = vpop.eup %7976  ;;  %v6880_v28 = vpack.c.bf16 %v2817_v52, %v2806_v6  ;;  %v2818_v13 = vmul.f32 %v7975_v30, %v10223_v61  ;;  %7996 = vpow2.f32 %v5975_v60  ;;  %v2765_v20 = vmul.f32 %v7961_v57, %v10213_v38  ;;  %v12149_v6 = vld [vmem:[#allocation44_spill] sm:$0xff]  ;;  %v12150_v52 = vld [vmem:[#allocation2_spill] sm:$0xff] }
 0x2fa   :  { %v7979_v46 = vpop.eup %7978  ;;  %v6904_v1 = vpack.c.bf16 %v2775_v51, %v2764_v3  ;;  %v2776_v43 = vmul.f32 %v7977_v36, %v12146_v35  ;;  %7998 = vpow2.f32 %v6018_v41  ;;  %v10423_v53 = vadd.f32 %v10066_v8, %v1374_v63 }
 0x2fb   :  { %v7981_v33 = vpop.eup %7980  ;;  %8000 = vpow2.f32 %v5976_v11  ;;  %v1427_v10 = vmul.f32 %v9810_v23, %v12147_v58  ;;  %v6878_v21 = vpack.c.bf16 %v2818_v13, %v2807_v45  ;;  %v10428_v61 = vadd.f32 %v9871_v22, %v1417_v54  ;;  %v12148_v11 = vld [vmem:[#allocation10_spill] sm:$0xff] }
 0x2fc   :  { %v7983_v31 = vpop.eup %7982  ;;  %v2269_v5 = vadd.f32 1.0, %v7981_v33  ;;  %8002 = vpow2.f32 %v6028_v16  ;;  %v6902_v38 = vpack.c.bf16 %v2776_v43, %v2765_v20  ;;  %v10431_v41 = vadd.f32 %v10076_v24, %v1375_v55  ;;  %v12151_v20 = vld [vmem:[#allocation12_spill] sm:$0xff] }
 0x2fd   :  { %v7985_v60 = vpop.eup %7984  ;;  %v2312_v57 = vadd.f32 1.0, %v7983_v31  ;;  %8004 = vpow2.f32 %v5986_v44  ;;  %v1385_v36 = vmul.f32 %v10044_v25, %v12148_v11  ;;  %6879 = vmatprep.subr.bf16.mxu0 %v6878_v21  ;;  %v1428_v16 = vmul.f32 %v9850_v59, %v12149_v6  ;;  %v12152_v6 = vld [vmem:[#allocation63_spill] sm:$0xff] }
 0x2fe   :  { %v7987_v3 = vpop.eup %7986  ;;  %8006 = vrcp.f32 %v2269_v5  ;;  %v2270_v63 = vadd.f32 1.0, %v7985_v60  ;;  %v1386_v54 = vmul.f32 %v10058_v4, %v12150_v52  ;;  %6903 = vmatprep.subr.bf16.mxu1 %v6902_v38  ;;  %6881 = vmatpush1.bf16.msra.mxu0 %v6880_v28  ;;  %v5998_v51 = vmul.f32 -1.442695, %v10403_v49  ;;  %v12153_v52 = vld [vmem:[#allocation15_spill] sm:$0xff] }
 0x2ff   :  { %v7989_v30 = vpop.eup %7988  ;;  %8008 = vrcp.f32 %v2312_v57  ;;  %v2322_v44 = vadd.f32 1.0, %v7987_v3  ;;  %v10441_v15 = vadd.f32 %v9830_v32, %v1427_v10  ;;  %6905 = vmatpush1.bf16.msra.mxu1 %v6904_v1  ;;  %v6050_v45 = vmul.f32 -1.442695, %v10406_v26 }
 0x300   :  { %v7991_v55 = vpop.eup %7990  ;;  %8010 = vrcp.f32 %v2270_v63  ;;  %v10445_v13 = vmul.f32 -1.442695, %v10423_v53  ;;  %v1438_v35 = vmul.f32 %v9810_v23, %v12151_v20  ;;  %v10450_v43 = vmul.f32 -1.442695, %v10428_v61 }
 0x301   :  { %v7993_v28 = vpop.eup %7992  ;;  %8012 = vrcp.f32 %v2322_v44  ;;  %v10453_v33 = vadd.f32 %v10066_v8, %v1385_v36  ;;  %v10457_v1 = vmul.f32 -1.442695, %v10431_v41  ;;  %v10460_v10 = vadd.f32 %v9871_v22, %v1428_v16 }
 0x302   :  { %v7995_v58 = vpop.eup %7994  ;;  %8014 = vpow2.f32 %v10384_v47  ;;  %v10463_v21 = vadd.f32 %v10076_v24, %v1386_v54  ;;  %v10466_v31 = vmul.f32 %v7979_v46, %v10232_v56  ;;  %v10473_v47 = vmul.f32 -1.442695, %v10441_v15 }
 0x303   :  { %v7997_v23 = vpop.eup %7996  ;;  %v10469_v5 = vmul.f32 %v7995_v58, %v10282_v12  ;;  %8016 = vpow2.f32 %v10390_v29  ;;  %v10477_v57 = vadd.f32 %v9830_v32, %v1438_v35  ;;  %v10483_v12 = vmul.f32 -1.442695, %v10453_v33  ;;  %v12154_v35 = vld [vmem:[#allocation64_spill] sm:$0xff] }
 0x304   :  { %v7999_v38 = vpop.eup %7998  ;;  %v2280_v60 = vadd.f32 1.0, %v7997_v23  ;;  %8018 = vpow2.f32 %v10394_v17  ;;  %v10486_v3 = vmul.f32 -1.442695, %v10460_v10  ;;  %v10489_v17 = vmul.f32 -1.442695, %v10463_v21 }
 0x305   :  { %v8001_v11 = vpop.eup %8000  ;;  %v6884_v56 = vpack.c.bf16 %v10469_v5, %v10466_v31  ;;  %v2323_v46 = vadd.f32 1.0, %v7999_v38  ;;  %8020 = vpow2.f32 %v10397_v18  ;;  %v1396_v16 = vmul.f32 %v10044_v25, %v12152_v6  ;;  %v12155_v38 = vld [vmem:[#allocation8_spill] sm:$0xff] }
 0x306   :  { %v8003_v29 = vpop.eup %8002  ;;  %8022 = vrcp.f32 %v2280_v60  ;;  %v2281_v36 = vadd.f32 1.0, %v8001_v11  ;;  %v1439_v18 = vmul.f32 %v9850_v59, %v12153_v52  ;;  %v10496_v20 = vmul.f32 -1.442695, %v10477_v57  ;;  %v12156_v60 = vld [vmem:[#allocation48_spill] sm:$0xff] }
 0x307   :  { %v8005_v32 = vpop.eup %8004  ;;  %8024 = vrcp.f32 %v2323_v46  ;;  %v2333_v63 = vadd.f32 1.0, %v8003_v29  ;;  %v1397_v58 = vmul.f32 %v10058_v4, %v12154_v35  ;;  %v2786_v31 = vmul.f32 %v7989_v30, %v10244_v48 }
 0x308   :  { %v8007_v54 = vpop.eup %8006  ;;  %8026 = vrcp.f32 %v2281_v36  ;;  %v2291_v44 = vadd.f32 1.0, %v8005_v32  ;;  %v10504_v11 = vrot.slane %v12156_v60, %v12155_v38  ;;  %v2829_v46 = vmul.f32 %v7991_v55, %v10271_v19  ;;  %v12157_v36 = vld [vmem:[#allocation16_spill] sm:$0xff]  ;;  %v12158_v19 = vld [vmem:[#allocation50_spill] sm:$0xff] }
 0x309   :  { %v8009_v23 = vpop.eup %8008  ;;  %v2797_v5 = vmul.f32 %v8007_v54, %v10285_v39  ;;  %8028 = vrcp.f32 %v2333_v63  ;;  %v1407_v32 = vmul.f32 %v10044_v25, %v12157_v36  ;;  %v2787_v52 = vmul.f32 %v7993_v28, %v10274_v50  ;;  %v12159_v50 = vld [vmem:[#allocation23_spill] sm:$0xff] }
 0x30a   :  { %v8011_v59 = vpop.eup %8010  ;;  %v2840_v29 = vmul.f32 %v8009_v23, %v10288_v7  ;;  %8030 = vrcp.f32 %v2291_v44  ;;  %v10514_v63 = vadd.f32 %v10066_v8, %v1396_v16  ;;  %v10518_v7 = vrot.slane %v12158_v19, %v12155_v38 }
 0x30b   :  { %v8013_v6 = vpop.eup %8012  ;;  %v6908_v48 = vpack.c.bf16 %v2797_v5, %v2786_v31  ;;  %v2798_v39 = vmul.f32 %v8011_v59, %v10291_v37  ;;  %8032 = vpow2.f32 %v10400_v9  ;;  %v1299_v28 = vmul.f32 %v12159_v50, %v10504_v11 }
 0x30c   :  { %v8015_v30 = vpop.eup %8014  ;;  %8034 = vpow2.f32 %v5998_v51  ;;  %v6882_v55 = vpack.c.bf16 %v2840_v29, %v2829_v46  ;;  %v10524_v9 = vadd.f32 %v9871_v22, %v1439_v18  ;;  %v12160_v51 = vld [vmem:[#allocation22_spill] sm:$0xff]  ;;  %v10532_v60 = vadd.f32 %v10066_v8, %v1407_v32  ;;  %v12161_v22 = vld [vmem:[#allocation56_spill] sm:$0xff] }
 0x30d   :  { %v8017_v54 = vpop.eup %8016  ;;  %v2334_v44 = vadd.f32 1.0, %v8015_v30  ;;  %8036 = vpow2.f32 %v6050_v45  ;;  %v6906_v35 = vpack.c.bf16 %v2798_v39, %v2787_v52  ;;  %v1408_v16 = vmul.f32 %v10058_v4, %v12160_v51  ;;  %v12162_v30 = vld [vmem:[#allocation34_spill] sm:$0xff] }
 0x30e   :  { %v8019_v37 = vpop.eup %8018  ;;  %v2292_v23 = vadd.f32 1.0, %v8017_v54  ;;  %8038 = vpow2.f32 %v10445_v13  ;;  %6883 = vmatprep.subr.bf16.mxu0 %v6882_v55  ;;  %v10529_v45 = vadd.f32 %v10076_v24, %v1397_v58  ;;  %v1277_v18 = vmul.f32 %v10504_v11, %v12161_v22  ;;  %v12164_v22 = vld [vmem:[#allocation20_spill] sm:$0xff] }
 0x30f   :  { %v8021_v31 = vpop.eup %8020  ;;  %8040 = vrcp.f32 %v2334_v44  ;;  %v2344_v5 = vadd.f32 1.0, %v8019_v37  ;;  %6907 = vmatprep.subr.bf16.mxu1 %v6906_v35  ;;  %6885 = vmatpush1.bf16.msra.mxu0 %v6884_v56  ;;  %v10537_v29 = vadd.f32 %v10518_v7, %v1299_v28  ;;  %v6030_v58 = vmul.f32 -1.442695, %v10514_v63 }
 0x310   :  { %v8023_v59 = vpop.eup %8022  ;;  %8042 = vrcp.f32 %v2292_v23  ;;  %v2302_v13 = vadd.f32 1.0, %v8021_v31  ;;  %6909 = vmatpush1.bf16.msra.mxu1 %v6908_v48  ;;  %v10541_v32 = vmul.f32 -1.442695, %v10524_v9  ;;  %v10544_v56 = vadd.f32 %v10076_v24, %v1408_v16 }
 0x311   :  { %v8025_v46 = vpop.eup %8024  ;;  %8044 = vrcp.f32 %v2344_v5  ;;  %v10548_v48 = vmul.f32 -1.442695, %v10529_v45  ;;  %v10551_v39 = vmul.f32 -1.442695, %v10532_v60  ;;  %v1418_v19 = vmul.f32 %v10044_v25, %v12162_v30  ;;  %v12163_v5 = vld [vmem:[#allocation45_spill] sm:$0xff] }
 0x312   :  { %v8027_v36 = vpop.eup %8026  ;;  %8046 = vrcp.f32 %v2302_v13  ;;  %v2850_v54 = vmul.f32 %v8013_v6, %v10301_v40  ;;  %v10559_v50 = vadd.f32 %v10518_v7, %v1277_v18  ;;  %v2808_v28 = vmul.f32 %v8023_v59, %v10320_v34 }
 0x313   :  { %v8029_v52 = vpop.eup %8028  ;;  %8048 = vpow2.f32 %v10450_v43  ;;  %v10565_v37 = vmul.f32 -1.442695, %v10537_v29  ;;  %v10573_v34 = vadd.f32 %v10066_v8, %v1418_v19  ;;  %v1419_v18 = vmul.f32 %v10058_v4, %v12164_v22  ;;  %v12169_v22 = vld [vmem:[#allocation51_spill] sm:$0xff] }
 0x314   :  { %v8031_v55 = vpop.eup %8030  ;;  %v2861_v44 = vmul.f32 %v8029_v52, %v10352_v27  ;;  %8050 = vpow2.f32 %v10457_v1  ;;  %v10569_v27 = vmul.f32 -1.442695, %v10544_v56  ;;  %v10576_v31 = vmul.f32 -1.442695, %v10559_v50  ;;  %v12165_v52 = vld [vmem:[#allocation47_spill] sm:$0xff] }
 0x315   :  { %v8033_v43 = vpop.eup %8032  ;;  %v2819_v35 = vmul.f32 %v8031_v55, %v10357_v14  ;;  %8052 = vpow2.f32 %v10473_v47  ;;  %v2851_v19 = vmul.f32 %v8025_v46, %v10323_v62 }
 0x316   :  { %v8035_v23 = vpop.eup %8034  ;;  %v6888_v51 = vpack.c.bf16 %v2861_v44, %v2850_v54  ;;  %v2345_v40 = vadd.f32 1.0, %v8033_v43  ;;  %8054 = vpow2.f32 %v10483_v12  ;;  %v1310_v12 = vmul.f32 %v12163_v5, %v10504_v11  ;;  %v12166_v54 = vld [vmem:[#allocation46_spill] sm:$0xff] }
 0x317   :  { %v8037_v1 = vpop.eup %8036  ;;  %v6912_v6 = vpack.c.bf16 %v2819_v35, %v2808_v28  ;;  %v2303_v16 = vadd.f32 1.0, %v8035_v23  ;;  %8056 = vpow2.f32 %v10486_v3  ;;  %v1288_v3 = vmul.f32 %v10504_v11, %v12165_v52  ;;  %v12167_v23 = vld [vmem:[#allocation49_spill] sm:$0xff] }
 0x318   :  { %v8039_v14 = vpop.eup %8038  ;;  %8058 = vrcp.f32 %v2345_v40  ;;  %v2355_v47 = vadd.f32 1.0, %v8037_v1  ;;  %v1429_v44 = vmul.f32 %v10044_v25, %v12166_v54  ;;  %v2809_v28 = vmul.f32 %v8027_v36, %v10329_v0 }
 0x319   :  { %v8041_v59 = vpop.eup %8040  ;;  %8060 = vrcp.f32 %v2303_v16  ;;  %v2313_v13 = vadd.f32 1.0, %v8039_v14  ;;  %v1343_v40 = vmul.f32 %v12167_v23, %v10504_v11  ;;  %v10594_v62 = vadd.f32 %v10518_v7, %v1310_v12 }
 0x31a   :  { %v8043_v30 = vpop.eup %8042  ;;  %v2862_v55 = vmul.f32 %v8041_v59, %v10360_v2  ;;  %8062 = vrcp.f32 %v2355_v47  ;;  %v12168_v2 = vld [vmem:[#allocation24_spill] sm:$0xff]  ;;  %v10600_v0 = vmul.f32 -1.442695, %v10573_v34  ;;  %v10609_v12 = vadd.f32 %v10066_v8, %v1429_v44 }
 0x31b   :  { %v8045_v43 = vpop.eup %8044  ;;  %v2820_v35 = vmul.f32 %v8043_v30, %v10365_v42  ;;  %8064 = vrcp.f32 %v2313_v13  ;;  %v1430_v46 = vmul.f32 %v10058_v4, %v12168_v2  ;;  %v10603_v42 = vadd.f32 %v10076_v24, %v1419_v18 }
 0x31c   :  { %v8047_v1 = vpop.eup %8046  ;;  %8066 = vpow2.f32 %v10489_v17  ;;  %v6886_v16 = vpack.c.bf16 %v2862_v55, %v2851_v19  ;;  %v10606_v17 = vadd.f32 %v10518_v7, %v1288_v3  ;;  %v1321_v18 = vmul.f32 %v10504_v11, %v12169_v22  ;;  %v12172_v22 = vld [vmem:[#allocation32_spill] sm:$0xff] }
 0x31d   :  { %v8049_v14 = vpop.eup %8048  ;;  %8068 = vpow2.f32 %v10496_v20  ;;  %v6910_v36 = vpack.c.bf16 %v2820_v35, %v2809_v28  ;;  %v10613_v20 = vadd.f32 %v10518_v7, %v1343_v40  ;;  %v10618_v3 = vmul.f32 -1.442695, %v10594_v62 }
 0x31e   :  { %v8051_v47 = vpop.eup %8050  ;;  %v2356_v5 = vadd.f32 1.0, %v8049_v14  ;;  %8070 = vpow2.f32 %v6030_v58  ;;  %6887 = vmatprep.subr.bf16.mxu0 %v6886_v16  ;;  %v10621_v30 = vadd.f32 %v10076_v24, %v1430_v46  ;;  %v6053_v44 = vmul.f32 -1.442695, %v10603_v42  ;;  %v12170_v16 = vld [vmem:[#allocation33_spill] sm:$0xff] }
 0x31f   :  { %v8053_v59 = vpop.eup %8052  ;;  %v2314_v13 = vadd.f32 1.0, %v8051_v47  ;;  %8072 = vpow2.f32 %v10541_v32  ;;  %6911 = vmatprep.subr.bf16.mxu1 %v6910_v36  ;;  %6889 = vmatpush1.bf16.msra.mxu0 %v6888_v51  ;;  %v10625_v51 = vmul.f32 -1.442695, %v10606_v17  ;;  %v10628_v35 = vmul.f32 -1.442695, %v10609_v12 }
 0x320   :  { %v8055_v58 = vpop.eup %8054  ;;  %8074 = vrcp.f32 %v2356_v5  ;;  %v2366_v52 = vadd.f32 1.0, %v8053_v59  ;;  %6913 = vmatpush1.bf16.msra.mxu1 %v6912_v6  ;;  %v10631_v23 = vmul.f32 -1.442695, %v10613_v20  ;;  %v10634_v6 = vadd.f32 %v10518_v7, %v1321_v18  ;;  %v12171_v5 = vld [vmem:[#allocation55_spill] sm:$0xff] }
 0x321   :  { %v8057_v19 = vpop.eup %8056  ;;  %8076 = vrcp.f32 %v2314_v13  ;;  %v2324_v32 = vadd.f32 1.0, %v8055_v58  ;;  %v10637_v2 = vmul.f32 -1.442695, %v10621_v30  ;;  %v2872_v14 = vmul.f32 %v8045_v43, %v12170_v16 }
 0x322   :  { %v8059_v55 = vpop.eup %8058  ;;  %8078 = vrcp.f32 %v2366_v52  ;;  %v2367_v54 = vadd.f32 1.0, %v8057_v19  ;;  %v2830_v59 = vmul.f32 %v8047_v1, %v12171_v5  ;;  %v1440_v18 = vmul.f32 %v10044_v25, %v12172_v22  ;;  %v12176_v5 = vld [vmem:[#allocation21_spill] sm:$0xff] }
 0x323   :  { %v8061_v28 = vpop.eup %8060  ;;  %8080 = vrcp.f32 %v2324_v32  ;;  %v10649_v43 = vmul.f32 -1.442695, %v10634_v6 }
 0x324   :  { %v8063_v40 = vpop.eup %8062  ;;  %8082 = vrcp.f32 %v2367_v54  ;;  %v2831_v22 = vmul.f32 %v8061_v28, %v10403_v49 }
 0x325   :  { %v8065_v46 = vpop.eup %8064  ;;  %v2883_v36 = vmul.f32 %v8063_v40, %v10406_v26  ;;  %8084 = vpow2.f32 %v10548_v48 }
 0x326   :  { %v8067_v47 = vpop.eup %8066  ;;  %v2841_v13 = vmul.f32 %v8065_v46, %v10423_v53  ;;  %8086 = vpow2.f32 %v10551_v39  ;;  %v12173_v39 = vld [vmem:[#allocation25_spill] sm:$0xff]  ;;  %v10655_v46 = vadd.f32 %v10066_v8, %v1440_v18 }
 0x327   :  { %v8069_v58 = vpop.eup %8068  ;;  %v6892_v52 = vpack.c.bf16 %v2883_v36, %v2872_v14  ;;  %v2325_v19 = vadd.f32 1.0, %v8067_v47  ;;  %8088 = vpow2.f32 %v10565_v37  ;;  %v1354_v54 = vmul.f32 %v12173_v39, %v10504_v11  ;;  %v12174_v37 = vld [vmem:[#allocation28_spill] sm:$0xff]  ;;  %v12175_v36 = vld [vmem:[#allocation35_spill] sm:$0xff] }
 0x328   :  { %v8071_v26 = vpop.eup %8070  ;;  %v6916_v48 = vpack.c.bf16 %v2841_v13, %v2830_v59  ;;  %v2377_v32 = vadd.f32 1.0, %v8069_v58  ;;  %8090 = vpow2.f32 %v10569_v27  ;;  %v1441_v16 = vmul.f32 %v10058_v4, %v12174_v37 }
 0x329   :  { %v8073_v1 = vpop.eup %8072  ;;  %8092 = vrcp.f32 %v2325_v19  ;;  %v2335_v53 = vadd.f32 1.0, %v8071_v26  ;;  %v2873_v47 = vmul.f32 %v8059_v55, %v12175_v36  ;;  %v1332_v59 = vmul.f32 %v10504_v11, %v12176_v5 }
 0x32a   :  { %v8075_v25 = vpop.eup %8074  ;;  %8094 = vrcp.f32 %v2377_v32  ;;  %v2378_v40 = vadd.f32 1.0, %v8073_v1  ;;  %v10668_v55 = vadd.f32 %v10518_v7, %v1354_v54  ;;  %v10674_v49 = vmul.f32 -1.442695, %v10655_v46 }
 0x32b   :  { %v8077_v14 = vpop.eup %8076  ;;  %v2884_v27 = vmul.f32 %v8075_v25, %v10428_v61  ;;  %8096 = vrcp.f32 %v2335_v53  ;;  %v12177_v61 = vld [vmem:[#allocation53_spill] sm:$0xff] }
 0x32c   :  { %v8079_v13 = vpop.eup %8078  ;;  %v2842_v58 = vmul.f32 %v8077_v14, %v10431_v41  ;;  %8098 = vrcp.f32 %v2378_v40  ;;  %v1387_v19 = vmul.f32 %v12177_v61, %v10504_v11  ;;  %v10677_v41 = vadd.f32 %v10076_v24, %v1441_v16 }
 0x32d   :  { %v8081_v8 = vpop.eup %8080  ;;  %8100 = vpow2.f32 %v10576_v31  ;;  %v6890_v18 = vpack.c.bf16 %v2884_v27, %v2873_v47  ;;  %v10680_v31 = vadd.f32 %v10518_v7, %v1332_v59  ;;  %v10684_v24 = vmul.f32 -1.442695, %v10668_v55  ;;  %v12179_v47 = vld [vmem:[#allocation27_spill] sm:$0xff] }
 0x32e   :  { %v8083_v4 = vpop.eup %8082  ;;  %8102 = vpow2.f32 %v10600_v0  ;;  %v6914_v26 = vpack.c.bf16 %v2842_v58, %v2831_v22  ;;  %v10687_v54 = vadd.f32 %v10518_v7, %v1387_v19  ;;  %v2894_v14 = vmul.f32 %v8079_v13, %v10441_v15 }
 0x32f   :  { %v8085_v32 = vpop.eup %8084  ;;  %8104 = vpow2.f32 %v10618_v3  ;;  %6891 = vmatprep.subr.bf16.mxu0 %v6890_v18  ;;  %v1398_v27 = vmul.f32 %v12179_v47, %v10504_v11  ;;  %v10702_v59 = vmul.f32 %v8081_v8, %v10453_v33  ;;  %v2895_v15 = vmul.f32 %v8083_v4, %v10460_v10 }
 0x330   :  { %v8087_v0 = vpop.eup %8086  ;;  %v2336_v28 = vadd.f32 1.0, %v8085_v32  ;;  %8106 = vpow2.f32 %v6053_v44  ;;  %6915 = vmatprep.subr.bf16.mxu1 %v6914_v26  ;;  %6893 = vmatpush1.bf16.msra.mxu0 %v6892_v52  ;;  %v10690_v44 = vmul.f32 -1.442695, %v10677_v41  ;;  %v10693_v52 = vmul.f32 -1.442695, %v10680_v31  ;;  %v12180_v26 = vld [vmem:[#allocation54_spill] sm:$0xff] }
 0x331   :  { %v8089_v1 = vpop.eup %8088  ;;  %v2346_v53 = vadd.f32 1.0, %v8087_v0  ;;  %8108 = vpow2.f32 %v10625_v51  ;;  %6917 = vmatpush1.bf16.msra.mxu1 %v6916_v48  ;;  %v12178_v48 = vld [vmem:[#allocation52_spill] sm:$0xff]  ;;  %v10707_v58 = vmul.f32 -1.442695, %v10687_v54  ;;  %v10719_v10 = vadd.f32 %v10518_v7, %v1398_v27  ;;  %v10742_v27 = vld [vmem:[%s11822_s7] sm:$0x3] }
 0x332   :  { %v8091_v3 = vpop.eup %8090  ;;  %8110 = vrcp.f32 %v2336_v28  ;;  %v2238_v39 = vadd.f32 1.0, %v8089_v1  ;;  %v1365_v37 = vmul.f32 %v10504_v11, %v12178_v48  ;;  %v1376_v32 = vmul.f32 %v10504_v11, %v12180_v26  ;;  %v12181_v28 = vld [vmem:[#allocation26_spill] sm:$0xff] }
 0x333   :  { %v8093_v25 = vpop.eup %8092  ;;  %8112 = vrcp.f32 %v2346_v53  ;;  %v2347_v40 = vadd.f32 1.0, %v8091_v3  ;;  %v1431_v1 = vmul.f32 %v12181_v28, %v10504_v11 }
 0x334   :  { %v8095_v51 = vpop.eup %8094  ;;  %8114 = vrcp.f32 %v2238_v39  ;;  %v2853_v39 = vmul.f32 %v8093_v25, %v10463_v21  ;;  %v6032_v21 = vmul.f32 -1.442695, %v10719_v10 }
 0x335   :  { %v8097_v16 = vpop.eup %8096  ;;  %v2905_v36 = vmul.f32 %v8095_v51, %v10477_v57  ;;  %8116 = vrcp.f32 %v2347_v40  ;;  %v8198_v51 = vmov 0.0|0.0  }
 0x336   :  { %v8099_v5 = vpop.eup %8098  ;;  %v2863_v22 = vmul.f32 %v8097_v16, %v10514_v63  ;;  %8118 = vpow2.f32 %v10628_v35  ;;  %v10715_v63 = vadd.f32 %v10518_v7, %v1365_v37  ;;  %v10730_v16 = vadd.f32 %v10518_v7, %v1376_v32 }
 0x337   :  { %v8101_v18 = vpop.eup %8100  ;;  %v6896_v13 = vpack.c.bf16 %v2905_v36, %v2894_v14  ;;  %v2906_v57 = vmul.f32 %v8099_v5, %v10524_v9  ;;  %8120 = vpow2.f32 %v10631_v23  ;;  %v12182_v14 = vld [vmem:[#allocation29_spill] sm:$0xff] }
 0x338   :  { %v8103_v61 = vpop.eup %8102  ;;  %v6920_v19 = vpack.c.bf16 %v2863_v22, %v10702_v59  ;;  %v2216_v33 = vadd.f32 1.0, %v8101_v18  ;;  %8122 = vpow2.f32 %v10637_v2  ;;  %v5999_v37 = vmul.f32 -1.442695, %v10715_v63 }
 0x339   :  { %v8105_v35 = vpop.eup %8104  ;;  %v2357_v8 = vadd.f32 1.0, %v8103_v61  ;;  %8124 = vpow2.f32 %v10649_v43  ;;  %v6894_v4 = vpack.c.bf16 %v2906_v57, %v2895_v15  ;;  %v1409_v36 = vmul.f32 %v10504_v11, %v12182_v14 }
 0x33a   :  { %v8107_v9 = vpop.eup %8106  ;;  %8126 = vrcp.f32 %v2216_v33  ;;  %v2249_v23 = vadd.f32 1.0, %v8105_v35  ;;  %v12183_v59 = vmov 0.0   ;;  %v12184_v35 = vld [vmem:[#allocation6_spill] sm:$0xff] }
 0x33b   :  { %v8109_v0 = vpop.eup %8108  ;;  %8128 = vrcp.f32 %v2357_v8  ;;  %v2358_v2 = vadd.f32 1.0, %v8107_v9  ;;  %6895 = vmatprep.subr.bf16.mxu0 %v6894_v4  ;;  %v10752_v57 = vadd.f32 %v10518_v7, %v1409_v36  ;;  %v1442_v8 = vmul.f32 %v12184_v35, %v10504_v11 }
 0x33c   :  { %v8111_v53 = vpop.eup %8110  ;;  %8130 = vrcp.f32 %v2249_v23  ;;  %v2227_v43 = vadd.f32 1.0, %v8109_v0  ;;  %6897 = vmatpush1.bf16.msra.mxu0 %v6896_v13  ;;  %v6010_v13 = vmul.f32 -1.442695, %v10730_v16  ;;  %v12185_v23 = vld [vmem:[#allocation30_spill] sm:$0xff] }
 0x33d   :  { %v8113_v3 = vpop.eup %8112  ;;  %v2864_v40 = vmul.f32 %v8111_v53, %v10529_v45  ;;  %8132 = vrcp.f32 %v2358_v2  ;;  %6930 = vmatprep.subr.bf16.mxu0 %v8198_v51  ;;  %v10737_v45 = vadd.f32 %v10518_v7, %v1431_v1  ;;  %v1420_v26 = vmul.f32 %v10504_v11, %v12185_v23 }
 0x33e   :  { %v8115_v48 = vpop.eup %8114  ;;  %8134 = vrcp.f32 %v2227_v43  ;;  %v2874_v0 = vmul.f32 %v8113_v3, %v10532_v60  ;;  %v6043_v28 = vmul.f32 -1.442695, %v10752_v57 }
 0x33f   :  { %v8117_v47 = vpop.eup %8116  ;;  %8136 = vpow2.f32 %v10674_v49  ;;  %v6918_v25 = vpack.c.bf16 %v2864_v40, %v2853_v39  ;;  %3189 = vmatmul.mubr.f32.vlgmr.msra.gmra.mrb[114].mxu0 %v10742_v27  ;;  %v6065_v33 = vmul.f32 -1.442695, %v10737_v45  ;;  %v2766_v53 = vmul.f32 %v8115_v48, %v10537_v29 }
 0x340   :  { %v8119_v5 = vpop.eup %8118  ;;  %8138 = vpow2.f32 %v10684_v24  ;;  %6680 = vmatprep.mubr.msk.f32.mxu0 %vm8199_vm1, %v12183_v59  ;;  %v10770_v39 = vadd.f32 %v10518_v7, %v1442_v8  ;;  %v2875_v40 = vmul.f32 %v8117_v47, %v10544_v56 }
 0x341   :  { %v8121_v49 = vpop.eup %8120  ;;  %v2368_v22 = vadd.f32 1.0, %v8119_v5  ;;  %8140 = vpow2.f32 %v10690_v44  ;;  %6919 = vmatprep.subr.bf16.mxu1 %v6918_v25 }
 0x342   :  { %v8123_v18 = vpop.eup %8122  ;;  %v2282_v15 = vadd.f32 1.0, %v8121_v49  ;;  %8142 = vpow2.f32 %v10693_v52  ;;  %6921 = vmatpush1.bf16.msra.mxu1 %v6920_v19  ;;  %v10757_v9 = vpop.f32.mrb[80].mxu1 }
 0x343   :  { %v8125_v24 = vpop.eup %8124  ;;  %8144 = vrcp.f32 %v2368_v22  ;;  %v2369_v61 = vadd.f32 1.0, %v8123_v18  ;;  %v10761_v32 = vpop.f32.mrb[81].mxu1 }
 0x344   :  { %v8127_v44 = vpop.eup %8126  ;;  %8146 = vrcp.f32 %v2282_v15  ;;  %v2260_v4 = vadd.f32 1.0, %v8125_v24 }
 0x345   :  { %v8129_v52 = vpop.eup %8128  ;;  %8148 = vrcp.f32 %v2369_v61  ;;  %v2744_v3 = vmul.f32 %v8127_v44, %v10559_v50 }
 0x346   :  { %v8131_v19 = vpop.eup %8130  ;;  %v2885_v2 = vmul.f32 %v8129_v52, %v10573_v34  ;;  %8150 = vrcp.f32 %v2260_v4 }
 0x347   :  { %v8133_v1 = vpop.eup %8132  ;;  %v2777_v43 = vmul.f32 %v8131_v19, %v10594_v62  ;;  %8152 = vpow2.f32 %v10707_v58  ;;  %v10777_v58 = vadd.f32 %v10518_v7, %v1420_v26 }
 0x348   :  { %v8135_v11 = vpop.eup %8134  ;;  %v6924_v14 = vpack.c.bf16 %v2885_v2, %v2874_v0  ;;  %v2886_v60 = vmul.f32 %v8133_v1, %v10603_v42  ;;  %8154 = vpow2.f32 %v5999_v37  ;;  %v6076_v42 = vmul.f32 -1.442695, %v10770_v39 }
 0x349   :  { %v8137_v34 = vpop.eup %8136  ;;  %v6934_v36 = vpack.c.bf16 %v2777_v43, %v2766_v53  ;;  %v2755_v29 = vmul.f32 %v8135_v11, %v10606_v17  ;;  %8156 = vpow2.f32 %v6032_v21  ;;  %v6054_v7 = vmul.f32 -1.442695, %v10777_v58 }
 0x34a   :  { %v8139_v62 = vpop.eup %8138  ;;  %v2379_v48 = vadd.f32 1.0, %v8137_v34  ;;  %8158 = vpow2.f32 %v6010_v13  ;;  %v6922_v25 = vpack.c.bf16 %v2886_v60, %v2875_v40 }
 0x34b   :  { %v8141_v5 = vpop.eup %8140  ;;  %v6931_v56 = vpack.c.bf16 %v2755_v29, %v2744_v3  ;;  %v2293_v47 = vadd.f32 1.0, %v8139_v62  ;;  %8160 = vpow2.f32 %v6065_v33 }
 0x34c   :  { %v8143_v37 = vpop.eup %8142  ;;  %8162 = vrcp.f32 %v2379_v48  ;;  %v2380_v50 = vadd.f32 1.0, %v8141_v5  ;;  %6923 = vmatprep.subr.bf16.mxu1 %v6922_v25  ;;  %v7077_v48 = vld [vmem:[%s11823_s8 + $0x1c] ss:$12 sps:$4 sm:$0xff]   ;;  %v3337_v5 = vpack.c.bf16 %v10761_v32, %v10761_v32 }
 0x34d   :  { %v8145_v49 = vpop.eup %8144  ;;  %8164 = vrcp.f32 %v2293_v47  ;;  %v2271_v17 = vadd.f32 1.0, %v8143_v37  ;;  %6932 = vmatpush3.bf16.msra.mxu0 %v6931_v56  ;;  %6925 = vmatpush1.bf16.msra.mxu1 %v6924_v14 }
 0x34e   :  { %v8147_v21 = vpop.eup %8146  ;;  %8166 = vrcp.f32 %v2380_v50  ;;  %6933 = vmatprep.subr.bf16.mxu0 %v8198_v51  ;;  %v2896_v26 = vmul.f32 %v8145_v49, %v10609_v12  ;;  %v7075_v49 = vld [vmem:[%s11823_s8 + $0x18] ss:$12 sps:$4 sm:$0xff]  }
 0x34f   :  { %v8149_v22 = vpop.eup %8148  ;;  %8168 = vrcp.f32 %v2271_v17 }
 0x350   :  { %v8151_v18 = vpop.eup %8150  ;;  %8170 = vpow2.f32 %v6043_v28  ;;  %v2810_v28 = vmul.f32 %v8147_v21, %v10613_v20  ;;  %v2897_v43 = vmul.f32 %v8149_v22, %v10621_v30  ;;  %v7074_v20 = vld [vmem:[%s11823_s8 + $0x4] ss:$12 sps:$4 sm:$0xff]   ;;  %v7083_v21 = vld [vmem:[%s11823_s8 + $0x4c] ss:$12 sps:$4 sm:$0xff]  }
 0x351   :  { %v8153_v15 = vpop.eup %8152  ;;  %8172 = vpow2.f32 %v6076_v42  ;;  %6935 = vmatpush3.bf16.msra.mxu0 %v6934_v36  ;;  %v2788_v60 = vmul.f32 %v8151_v18, %v10634_v6  ;;  %v7072_v6 = vld [vmem:[%s11823_s8] ss:$12 sps:$4 sm:$0xff]  }
 0x352   :  { %v8155_v13 = vpop.eup %8154  ;;  %v2326_v24 = vadd.f32 1.0, %v8153_v15  ;;  %8174 = vpow2.f32 %v6054_v7  ;;  %6936 = vmatprep.subr.bf16.mxu0 %v8198_v51 }
 0x353   :  { %v8157_v61 = vpop.eup %8156  ;;  %v2304_v33 = vadd.f32 1.0, %v8155_v13 }
 0x354   :  { %v8159_v35 = vpop.eup %8158  ;;  %8176 = vrcp.f32 %v2326_v24  ;;  %v2337_v8 = vadd.f32 1.0, %v8157_v61  ;;  %v7081_v61 = vld [vmem:[%s11823_s8 + $0x48] ss:$12 sps:$4 sm:$0xff]  }
 0x355   :  { %v8161_v44 = vpop.eup %8160  ;;  %8178 = vrcp.f32 %v2304_v33  ;;  %v2315_v4 = vadd.f32 1.0, %v8159_v35 }
 0x356   :  { %v8163_v52 = vpop.eup %8162  ;;  %8180 = vrcp.f32 %v2337_v8  ;;  %v2370_v0 = vadd.f32 1.0, %v8161_v44  ;;  %v7087_v8 = vld [vmem:[%s11823_s8 + $0x78] ss:$12 sps:$4 sm:$0xff]   ;;  %v7092_v44 = vld [vmem:[%s11823_s8 + $0x94] ss:$12 sps:$4 sm:$0xff]  }
 0x357   :  { %v8165_v23 = vpop.eup %8164  ;;  %v2907_v19 = vmul.f32 %v8163_v52, %v10655_v46  ;;  %8182 = vrcp.f32 %v2315_v4  ;;  %v7112_v4 = vld [vmem:[%s11823_s8 + $0x8] ss:$12 sps:$4 sm:$0xff]   ;;  %v7116_v52 = vld [vmem:[%s11823_s8 + $0xe0] ss:$12 sps:$4 sm:$0xff]  }
 0x358   :  { %v8167_v2 = vpop.eup %8166  ;;  %v2821_v1 = vmul.f32 %v8165_v23, %v10668_v55  ;;  %8184 = vrcp.f32 %v2370_v0  ;;  %v7090_v23 = vld [vmem:[%s11823_s8 + $0x90] ss:$12 sps:$4 sm:$0xff]   ;;  %v7093_v0 = vld [vmem:[%s11823_s8 + $0xa8] ss:$12 sps:$4 sm:$0xff]  }
 0x359   :  { %v8169_v53 = vpop.eup %8168  ;;  %v6928_v11 = vpack.c.bf16 %v2907_v19, %v2896_v26  ;;  %v2908_v40 = vmul.f32 %v8167_v2, %v10677_v41  ;;  %v7095_v26 = vld [vmem:[%s11823_s8 + $0xac] ss:$12 sps:$4 sm:$0xff]   ;;  %v7098_v2 = vld [vmem:[%s11823_s8 + $0xc4] ss:$12 sps:$4 sm:$0xff]  }
 0x35a   :  { %v8171_v14 = vpop.eup %8170  ;;  %v6940_v34 = vpack.c.bf16 %v2821_v1, %v2810_v28  ;;  %v2799_v12 = vmul.f32 %v8169_v53, %v10680_v31  ;;  %v7117_v19 = vld [vmem:[%s11823_s8 + $0x20] ss:$12 sps:$4 sm:$0xff]   ;;  %v7122_v28 = vld [vmem:[%s11823_s8 + $0x38] ss:$12 sps:$4 sm:$0xff]   ;;  %v7126_v1 = vld [vmem:[%s11823_s8 + $0x110] ss:$12 sps:$4 sm:$0xff]  }
 0x35b   :  { %v8173_v46 = vpop.eup %8172  ;;  %v2348_v3 = vadd.f32 1.0, %v8171_v14  ;;  %v6926_v36 = vpack.c.bf16 %v2908_v40, %v2897_v43  ;;  %v7096_v53 = vld [vmem:[%s11823_s8 + $0xc0] ss:$12 sps:$4 sm:$0xff]   ;;  %v7101_v43 = vld [vmem:[%s11823_s8 + $0xdc] ss:$12 sps:$4 sm:$0xff]  }
 0x35c   :  { %v8175_v55 = vpop.eup %8174  ;;  %v6937_v29 = vpack.c.bf16 %v2799_v12, %v2788_v60  ;;  %v2381_v30 = vadd.f32 1.0, %v8173_v46  ;;  %v7131_v40 = vld [vmem:[%s11823_s8 + $0x128] ss:$12 sps:$4 sm:$0xff]   ;;  %v7099_v14 = vld [vmem:[%s11823_s8 + $0xd8] ss:$12 sps:$4 sm:$0xff]  }
 0x35d   :  { %8186 = vrcp.f32 %v2348_v3  ;;  %v2359_v62 = vadd.f32 1.0, %v8175_v55  ;;  %6927 = vmatprep.subr.bf16.mxu1 %v6926_v36  ;;  %v7104_v60 = vld [vmem:[%s11823_s8 + $0xf4] ss:$12 sps:$4 sm:$0xff]   ;;  %v7102_v46 = vld [vmem:[%s11823_s8 + $0xf0] ss:$12 sps:$4 sm:$0xff]  }
 0x35e   :  { %v8177_v41 = vpop.eup %8176  ;;  %8188 = vrcp.f32 %v2381_v30  ;;  %6938 = vmatpush3.bf16.msra.mxu0 %v6937_v29  ;;  %6929 = vmatpush1.bf16.msra.mxu1 %v6928_v11  ;;  %v7127_v11 = vld [vmem:[%s11823_s8 + $0x50] ss:$12 sps:$4 sm:$0xff]   ;;  %v7136_v12 = vld [vmem:[%s11823_s8 + $0x140] ss:$12 sps:$4 sm:$0xff]   ;;  %v7105_v55 = vld [vmem:[%s11823_s8 + $0x108] ss:$12 sps:$4 sm:$0xff]  }
 0x35f   :  { %v8179_v31 = vpop.eup %8178  ;;  %8190 = vrcp.f32 %v2359_v62  ;;  %6939 = vmatprep.subr.bf16.mxu0 %v8198_v51  ;;  %5124 = vmatprep.subr.bf16.mxu1 %v7074_v20  ;;  %v2854_v47 = vmul.f32 %v8177_v41, %v10687_v54  ;;  %v7080_v54 = vld [vmem:[%s11823_s8 + $0x34] ss:$12 sps:$4 sm:$0xff]   ;;  %v7107_v3 = vld [vmem:[%s11823_s8 + $0x10c] ss:$12 sps:$4 sm:$0xff]   ;;  %v7110_v30 = vld [vmem:[%s11823_s8 + $0x124] ss:$12 sps:$4 sm:$0xff]  }
 0x360   :  { %v8181_v25 = vpop.eup %8180  ;;  %v2832_v37 = vmul.f32 %v8179_v31, %v10715_v63  ;;  %v7078_v63 = vld [vmem:[%s11823_s8 + $0x30] ss:$12 sps:$4 sm:$0xff]   ;;  %v7137_v36 = vld [vmem:[%s11823_s8 + $0x80] ss:$12 sps:$4 sm:$0xff]   ;;  %v7141_v20 = vld [vmem:[%s11823_s8 + $0x158] ss:$12 sps:$4 sm:$0xff]  }
 0x361   :  { %v8183_v56 = vpop.eup %8182  ;;  %v2865_v42 = vmul.f32 %v8181_v25, %v10719_v10  ;;  %3260 = vmatmul.mubr.f32.vlgmr.msra.gmra.mrb[84].mxu1 %v10742_v27  ;;  %v7142_v29 = vld [vmem:[%s11823_s8 + $0x98] ss:$12 sps:$4 sm:$0xff]   ;;  %v7146_v62 = vld [vmem:[%s11823_s8 + $0x170] ss:$12 sps:$4 sm:$0xff]   ;;  %v7108_v41 = vld [vmem:[%s11823_s8 + $0x120] ss:$12 sps:$4 sm:$0xff]  }
 0x362   :  { %v2843_v50 = vmul.f32 %v8183_v56, %v10730_v16  ;;  %6941 = vmatpush3.bf16.msra.mxu0 %v6940_v34  ;;  %5125 = vmatpush1.bf16.msra.mxu1 %v7072_v6  ;;  %v8185_v32 = vpop.eup %8184  ;;  %v7132_v34 = vld [vmem:[%s11823_s8 + $0x68] ss:$12 sps:$4 sm:$0xff]   ;;  %v7147_v6 = vld [vmem:[%s11823_s8 + $0xb0] ss:$12 sps:$4 sm:$0xff]   ;;  %v7113_v25 = vld [vmem:[%s11823_s8 + $0x138] ss:$12 sps:$4 sm:$0xff]  }
 0x363   :  { %v6946_v17 = vpack.c.bf16 %v2865_v42, %v2854_v47  ;;  %6942 = vmatprep.subr.bf16.mxu0 %v8198_v51  ;;  %5126 = vmatprep.subr.bf16.mxu1 %v7077_v48  ;;  %v2898_v18 = vmul.f32 %v8185_v32, %v10737_v45  ;;  %v7086_v45 = vld [vmem:[%s11823_s8 + $0x64] ss:$12 sps:$4 sm:$0xff]   ;;  %v7115_v31 = vld [vmem:[%s11823_s8 + $0x13c] ss:$12 sps:$4 sm:$0xff]   ;;  %v7120_v56 = vld [vmem:[%s11823_s8 + $0x154] ss:$12 sps:$4 sm:$0xff]   ;;  %v3336_v47 = vpack.c.bf16 %v10757_v9, %v10757_v9 }
 0x364   :  { %v6943_v10 = vpack.c.bf16 %v2843_v50, %v2832_v37  ;;  %5156 = vmatprep.mubr.bf16.mxu1 %v3337_v5  ;;  %v7151_v48 = vld [vmem:[%s11823_s8 + $0x248] ss:$12 sps:$4 sm:$0xff]   ;;  %v7156_v42 = vld [vmem:[%s11823_s8 + $0x260] ss:$12 sps:$4 sm:$0xff]   ;;  %v7118_v37 = vld [vmem:[%s11823_s8 + $0x150] ss:$12 sps:$4 sm:$0xff]  }
 0x365   :  { %v7125_v50 = vld [vmem:[%s11823_s8 + $0x16c] ss:$12 sps:$4 sm:$0xff]  }
 0x366   :  { %6944 = vmatpush3.bf16.msra.mxu0 %v6943_v10  ;;  %5127 = vmatpush1.bf16.msra.mxu1 %v7075_v49  ;;  %v7157_v9 = vld [vmem:[%s11823_s8 + $0x1a0] ss:$12 sps:$4 sm:$0xff]   ;;  %v7161_v49 = vld [vmem:[%s11823_s8 + $0x278] ss:$12 sps:$4 sm:$0xff]  }
 0x367   :  { %v8187_v16 = vpop.eup %8186  ;;  %6945 = vmatprep.subr.bf16.mxu0 %v8198_v51  ;;  %5128 = vmatprep.subr.bf16.mxu1 %v7080_v54  ;;  %v7130_v10 = vld [vmem:[%s11823_s8 + $0x184] ss:$12 sps:$4 sm:$0xff]  }
 0x368   :  { %v8189_v7 = vpop.eup %8188  ;;  %v2876_v13 = vmul.f32 %v8187_v16, %v10752_v57  ;;  %v7084_v57 = vld [vmem:[%s11823_s8 + $0x60] ss:$12 sps:$4 sm:$0xff]   ;;  %v7162_v32 = vld [vmem:[%s11823_s8 + $0x1b8] ss:$12 sps:$4 sm:$0xff]  }
 0x369   :  { %v8191_v22 = vpop.eup %8190  ;;  %v2909_v15 = vmul.f32 %v8189_v7, %v10770_v39  ;;  %v7089_v39 = vld [vmem:[%s11823_s8 + $0x7c] ss:$12 sps:$4 sm:$0xff]   ;;  %v7128_v7 = vld [vmem:[%s11823_s8 + $0x180] ss:$12 sps:$4 sm:$0xff]  }
 0x36a   :  { %v2887_v24 = vmul.f32 %v8191_v22, %v10777_v58  ;;  %6947 = vmatpush3.bf16.msra.mxu0 %v6946_v17  ;;  %5129 = vmatpush1.bf16.msra.mxu1 %v7078_v63  ;;  %v7111_v58 = vld [vmem:[%s11823_s8 + $0xc8] ss:$12 sps:$4 sm:$0xff]   ;;  %v7166_v63 = vld [vmem:[%s11823_s8 + $0x290] ss:$12 sps:$4 sm:$0xff]  }
 0x36b   :  { %v6952_v33 = vpack.c.bf16 %v2909_v15, %v2898_v18  ;;  %6948 = vmatprep.subr.bf16.mxu0 %v8198_v51  ;;  %5130 = vmatprep.subr.bf16.mxu1 %v7083_v21  ;;  %v7123_v17 = vld [vmem:[%s11823_s8 + $0x168] ss:$12 sps:$4 sm:$0xff]   ;;  %v7167_v22 = vld [vmem:[%s11823_s8 + $0x1d0] ss:$12 sps:$4 sm:$0xff]  }
 0x36c   :  { %v6949_v35 = vpack.c.bf16 %v2887_v24, %v2876_v13  ;;  %v7135_v18 = vld [vmem:[%s11823_s8 + $0x19c] ss:$12 sps:$4 sm:$0xff]   ;;  %v7133_v13 = vld [vmem:[%s11823_s8 + $0x198] ss:$12 sps:$4 sm:$0xff]  }
 0x36d   :  { %v7171_v15 = vld [vmem:[%s11823_s8 + $0x2a8] ss:$12 sps:$4 sm:$0xff]  }
 0x36e   :  { %6950 = vmatpush3.bf16.msra.mxu0 %v6949_v35  ;;  %5131 = vmatpush1.bf16.msra.mxu1 %v7081_v61  ;;  %v7172_v24 = vld [vmem:[%s11823_s8 + $0x1e8] ss:$12 sps:$4 sm:$0xff]   ;;  %v7177_v35 = vld [vmem:[%s11823_s8 + $0x200] ss:$12 sps:$4 sm:$0xff]  }
 0x36f   :  { %6951 = vmatprep.subr.bf16.mxu0 %v8198_v51  ;;  %5132 = vmatprep.subr.bf16.mxu1 %v7086_v45  ;;  %v7140_v61 = vld [vmem:[%s11823_s8 + $0x1b4] ss:$12 sps:$4 sm:$0xff]   ;;  %v7138_v45 = vld [vmem:[%s11823_s8 + $0x1b0] ss:$12 sps:$4 sm:$0xff]  }
 0x372   :  { %6953 = vmatpush3.bf16.msra.mxu0 %v6952_v33  ;;  %5133 = vmatpush1.bf16.msra.mxu1 %v7084_v57  ;;  %v7176_v33 = vld [vmem:[%s11823_s8 + $0x2c0] ss:$12 sps:$4 sm:$0xff]  }
 0x373   :  { %5134 = vmatprep.subr.bf16.mxu1 %v7089_v39  ;;  %6401 = vmatprep.subr.bf16.mxu0 %v7111_v58  ;;  %v7145_v57 = vld [vmem:[%s11823_s8 + $0x1cc] ss:$12 sps:$4 sm:$0xff]   ;;  %v7143_v58 = vld [vmem:[%s11823_s8 + $0x1c8] ss:$12 sps:$4 sm:$0xff]  }
 0x374   :  { %v7181_v39 = vld [vmem:[%s11823_s8 + $0x2d8] ss:$12 sps:$4 sm:$0xff]  }
 0x375   :  { %6681 = vmatmul.mubr.f32.vlgmr.msra.gmra.mrb[116].mxu0 %v10742_v27  ;;  %v7121_v27 = vld [vmem:[%s11823_s8 + $0xf8] ss:$12 sps:$4 sm:$0xff]  }
 0x376   :  { %5135 = vmatpush1.bf16.msra.mxu1 %v7087_v8  ;;  %6402 = vmatpush3.bf16.msra.mxu0 %v7112_v4  ;;  %v7182_v8 = vld [vmem:[%s11823_s8 + $0x218] ss:$12 sps:$4 sm:$0xff]   ;;  %v7186_v4 = vld [vmem:[%s11823_s8 + $0x2f0] ss:$12 sps:$4 sm:$0xff]  }
 0x377   :  { %5136 = vmatprep.subr.bf16.mxu1 %v7092_v44  ;;  %6403 = vmatprep.subr.bf16.mxu0 %v7116_v52  ;;  %v7150_v44 = vld [vmem:[%s11823_s8 + $0x1e4] ss:$12 sps:$4 sm:$0xff]   ;;  %v7148_v52 = vld [vmem:[%s11823_s8 + $0x1e0] ss:$12 sps:$4 sm:$0xff]  }
 0x378   :  { %5402 = vmatprep.mubr.bf16.mxu0 %v3337_v5  ;;  %v7152_v5 = vld [vmem:[%s11823_s8 + $0x188] ss:$12 sps:$4 sm:$0xff]  }
 0x37a   :  { %5137 = vmatpush1.bf16.msra.mxu1 %v7090_v23  ;;  %6404 = vmatpush3.bf16.msra.mxu0 %v7117_v19  ;;  %v7187_v23 = vld [vmem:[%s11823_s8 + $0x230] ss:$12 sps:$4 sm:$0xff]   ;;  %v7191_v19 = vld [vmem:[%s11823_s8 + $0x3c8] ss:$12 sps:$4 sm:$0xff]  }
 0x37b   :  { %5138 = vmatprep.subr.bf16.mxu1 %v7095_v26  ;;  %6405 = vmatprep.subr.bf16.mxu0 %v7121_v27  ;;  %v7155_v26 = vld [vmem:[%s11823_s8 + $0x1fc] ss:$12 sps:$4 sm:$0xff]  }
 0x37e   :  { %5139 = vmatpush1.bf16.msra.mxu1 %v7093_v0  ;;  %6406 = vmatpush3.bf16.msra.mxu0 %v7122_v28  ;;  %v7153_v0 = vld [vmem:[%s11823_s8 + $0x1f8] ss:$12 sps:$4 sm:$0xff]   ;;  %v7160_v28 = vld [vmem:[%s11823_s8 + $0x214] ss:$12 sps:$4 sm:$0xff]  }
 0x37f   :  { %5140 = vmatprep.subr.bf16.mxu1 %v7098_v2  ;;  %6407 = vmatprep.subr.bf16.mxu0 %v7126_v1  ;;  %v7192_v2 = vld [vmem:[%s11823_s8 + $0x308] ss:$12 sps:$4 sm:$0xff]   ;;  %v7196_v1 = vld [vmem:[%s11823_s8 + $0x3e0] ss:$12 sps:$4 sm:$0xff]  }
 0x382   :  { %5141 = vmatpush1.bf16.msra.mxu1 %v7096_v53  ;;  %6408 = vmatpush3.bf16.msra.mxu0 %v7127_v11  ;;  %v7158_v11 = vld [vmem:[%s11823_s8 + $0x210] ss:$12 sps:$4 sm:$0xff]  }
 0x383   :  { %5142 = vmatprep.subr.bf16.mxu1 %v7101_v43  ;;  %6409 = vmatprep.subr.bf16.mxu0 %v7131_v40  ;;  %v7197_v40 = vld [vmem:[%s11823_s8 + $0x320] ss:$12 sps:$4 sm:$0xff]  }
 0x386   :  { %5143 = vmatpush1.bf16.msra.mxu1 %v7099_v14  ;;  %6410 = vmatpush3.bf16.msra.mxu0 %v7132_v34  ;;  %v7201_v34 = vld [vmem:[%s11823_s8 + $0x3f8] ss:$12 sps:$4 sm:$0xff]  }
 0x387   :  { %5144 = vmatprep.subr.bf16.mxu1 %v7104_v60  ;;  %6411 = vmatprep.subr.bf16.mxu0 %v7136_v12  ;;  %v7165_v60 = vld [vmem:[%s11823_s8 + $0x22c] ss:$12 sps:$4 sm:$0xff]   ;;  %v7163_v12 = vld [vmem:[%s11823_s8 + $0x228] ss:$12 sps:$4 sm:$0xff]  }
 0x38a   :  { %5145 = vmatpush1.bf16.msra.mxu1 %v7102_v46  ;;  %6412 = vmatpush3.bf16.msra.mxu0 %v7137_v36  ;;  %v7202_v46 = vld [vmem:[%s11823_s8 + $0x338] ss:$12 sps:$4 sm:$0xff]   ;;  %v7206_v36 = vld [vmem:[%s11823_s8 + $0x410] ss:$12 sps:$4 sm:$0xff]  }
 0x38b   :  { %5146 = vmatprep.subr.bf16.mxu1 %v7107_v3  ;;  %6413 = vmatprep.subr.bf16.mxu0 %v7141_v20  ;;  %v7170_v3 = vld [vmem:[%s11823_s8 + $0x244] ss:$12 sps:$4 sm:$0xff]   ;;  %v7168_v20 = vld [vmem:[%s11823_s8 + $0x240] ss:$12 sps:$4 sm:$0xff]  }
 0x38e   :  { %5147 = vmatpush1.bf16.msra.mxu1 %v7105_v55  ;;  %6414 = vmatpush3.bf16.msra.mxu0 %v7142_v29  ;;  %v7207_v55 = vld [vmem:[%s11823_s8 + $0x350] ss:$12 sps:$4 sm:$0xff]  }
 0x38f   :  { %5148 = vmatprep.subr.bf16.mxu1 %v7110_v30  ;;  %6415 = vmatprep.subr.bf16.mxu0 %v7146_v62  ;;  %v7175_v29 = vld [vmem:[%s11823_s8 + $0x25c] ss:$12 sps:$4 sm:$0xff]   ;;  %v7173_v62 = vld [vmem:[%s11823_s8 + $0x258] ss:$12 sps:$4 sm:$0xff]  }
 0x390   :  { %v7211_v30 = vld [vmem:[%s11823_s8 + $0x428] ss:$12 sps:$4 sm:$0xff]  }
 0x392   :  { %5149 = vmatpush1.bf16.msra.mxu1 %v7108_v41  ;;  %6416 = vmatpush3.bf16.msra.mxu0 %v7147_v6  ;;  %v7212_v41 = vld [vmem:[%s11823_s8 + $0x368] ss:$12 sps:$4 sm:$0xff]  }
 0x393   :  { %5150 = vmatprep.subr.bf16.mxu1 %v7115_v31  ;;  %6423 = vmatprep.subr.bf16.mxu0 %v7151_v48  ;;  %v7180_v6 = vld [vmem:[%s11823_s8 + $0x274] ss:$12 sps:$4 sm:$0xff]   ;;  %v7178_v48 = vld [vmem:[%s11823_s8 + $0x270] ss:$12 sps:$4 sm:$0xff]  }
 0x394   :  { %v7216_v31 = vld [vmem:[%s11823_s8 + $0x440] ss:$12 sps:$4 sm:$0xff]  }
 0x395   :  { %5403 = vmatmul.mubr.bf16.vlgmr.msra.gmra.mrb[120].mxu0 %v3336_v47 }
 0x396   :  { %5151 = vmatpush1.bf16.msra.mxu1 %v7113_v25  ;;  %6424 = vmatpush3.bf16.msra.mxu0 %v7152_v5  ;;  %v7217_v25 = vld [vmem:[%s11823_s8 + $0x380] ss:$12 sps:$4 sm:$0xff]  }
 0x397   :  { %5152 = vmatprep.subr.bf16.mxu1 %v7120_v56  ;;  %6425 = vmatprep.subr.bf16.mxu0 %v7156_v42  ;;  %v7185_v5 = vld [vmem:[%s11823_s8 + $0x28c] ss:$12 sps:$4 sm:$0xff]  }
 0x398   :  { %v7221_v56 = vld [vmem:[%s11823_s8 + $0x458] ss:$12 sps:$4 sm:$0xff]  }
 0x399   :  { %v3048_v54 = vpop.f32.mrb[112].mxu0  ;;  %v7222_v42 = vld [vmem:[%s11823_s8 + $0x398] ss:$12 sps:$4 sm:$0xff]  }
 0x39a   :  { %v3050_v16 = vpop.f32.mrb[113].mxu0  ;;  %5153 = vmatpush1.bf16.msra.mxu1 %v7118_v37  ;;  %6426 = vmatpush3.bf16.msra.mxu0 %v7157_v9  ;;  %v11038_v27 = vpack.c.bf16 %v3048_v54, %v3048_v54  ;;  %v7190_v37 = vld [vmem:[%s11823_s8 + $0x2a4] ss:$12 sps:$4 sm:$0xff]   ;;  %v7188_v9 = vld [vmem:[%s11823_s8 + $0x2a0] ss:$12 sps:$4 sm:$0xff]  }
 0x39b   :  { %v3339_v21 = vpack.c.bf16 %v3050_v16, %v3050_v16  ;;  %5154 = vmatprep.subr.bf16.mxu1 %v7125_v50  ;;  %6427 = vmatprep.subr.bf16.mxu0 %v7161_v49  ;;  %v7226_v50 = vld [vmem:[%s11823_s8 + $0x470] ss:$12 sps:$4 sm:$0xff]   ;;  %v7231_v54 = vld [vmem:[%s11823_s8 + $0x548] ss:$12 sps:$4 sm:$0xff]  }
 0x39c   :  { %v7227_v49 = vld [vmem:[%s11823_s8 + $0x3b0] ss:$12 sps:$4 sm:$0xff]   ;;  %v7200_v16 = vld [vmem:[%s11823_s8 + $0x2d4] ss:$12 sps:$4 sm:$0xff]  }
 0x39d   :  { %5442 = vmatprep.mubr.bf16.mxu0 %v3339_v21 }
 0x39e   :  { %5155 = vmatpush1.bf16.msra.mxu1 %v7123_v17  ;;  %6428 = vmatpush3.bf16.msra.mxu0 %v7162_v32  ;;  %v7195_v17 = vld [vmem:[%s11823_s8 + $0x2bc] ss:$12 sps:$4 sm:$0xff]   ;;  %v7193_v32 = vld [vmem:[%s11823_s8 + $0x2b8] ss:$12 sps:$4 sm:$0xff]  }
 0x39f   :  { %5165 = vmatprep.subr.bf16.mxu1 %v7130_v10  ;;  %6429 = vmatprep.subr.bf16.mxu0 %v7166_v63  ;;  %v7232_v63 = vld [vmem:[%s11823_s8 + $0x488] ss:$12 sps:$4 sm:$0xff]  }
 0x3a1   :  { %5157 = vmatmul.mubr.bf16.vlgmr.msra.gmra.mrb[88].mxu1 %v3336_v47  ;;  %v7183_v47 = vld [vmem:[%s11823_s8 + $0x288] ss:$12 sps:$4 sm:$0xff]  }
 0x3a2   :  { %5166 = vmatpush1.bf16.msra.mxu1 %v7128_v7  ;;  %6430 = vmatpush3.bf16.msra.mxu0 %v7167_v22  ;;  %v7198_v7 = vld [vmem:[%s11823_s8 + $0x2d0] ss:$12 sps:$4 sm:$0xff]   ;;  %v7237_v22 = vld [vmem:[%s11823_s8 + $0x4a0] ss:$12 sps:$4 sm:$0xff]  }
 0x3a3   :  { %5167 = vmatprep.subr.bf16.mxu1 %v7135_v18  ;;  %6431 = vmatprep.subr.bf16.mxu0 %v7171_v15  ;;  %v7205_v18 = vld [vmem:[%s11823_s8 + $0x2ec] ss:$12 sps:$4 sm:$0xff]  }
 0x3a4   :  { %5197 = vmatprep.mubr.bf16.mxu1 %v3339_v21  ;;  %v7236_v21 = vld [vmem:[%s11823_s8 + $0x560] ss:$12 sps:$4 sm:$0xff]   ;;  %v7241_v15 = vld [vmem:[%s11823_s8 + $0x578] ss:$12 sps:$4 sm:$0xff]  }
 0x3a6   :  { %5168 = vmatpush1.bf16.msra.mxu1 %v7133_v13  ;;  %6432 = vmatpush3.bf16.msra.mxu0 %v7172_v24  ;;  %v7203_v13 = vld [vmem:[%s11823_s8 + $0x2e8] ss:$12 sps:$4 sm:$0xff]   ;;  %v7242_v24 = vld [vmem:[%s11823_s8 + $0x4b8] ss:$12 sps:$4 sm:$0xff]  }
 0x3a7   :  { %5169 = vmatprep.subr.bf16.mxu1 %v7140_v61  ;;  %6433 = vmatprep.subr.bf16.mxu0 %v7176_v33  ;;  %v7210_v61 = vld [vmem:[%s11823_s8 + $0x304] ss:$12 sps:$4 sm:$0xff]  }
 0x3a8   :  { %v7246_v33 = vld [vmem:[%s11823_s8 + $0x590] ss:$12 sps:$4 sm:$0xff]  }
 0x3aa   :  { %5170 = vmatpush1.bf16.msra.mxu1 %v7138_v45  ;;  %6434 = vmatpush3.bf16.msra.mxu0 %v7177_v35  ;;  %v7208_v45 = vld [vmem:[%s11823_s8 + $0x300] ss:$12 sps:$4 sm:$0xff]   ;;  %v7247_v35 = vld [vmem:[%s11823_s8 + $0x4d0] ss:$12 sps:$4 sm:$0xff]  }
 0x3ab   :  { %5171 = vmatprep.subr.bf16.mxu1 %v7145_v57  ;;  %6435 = vmatprep.subr.bf16.mxu0 %v7181_v39  ;;  %v7215_v57 = vld [vmem:[%s11823_s8 + $0x31c] ss:$12 sps:$4 sm:$0xff]  }
 0x3ac   :  { %v7251_v39 = vld [vmem:[%s11823_s8 + $0x5a8] ss:$12 sps:$4 sm:$0xff]  }
 0x3ae   :  { %5172 = vmatpush1.bf16.msra.mxu1 %v7143_v58  ;;  %6436 = vmatpush3.bf16.msra.mxu0 %v7182_v8  ;;  %v7213_v58 = vld [vmem:[%s11823_s8 + $0x318] ss:$12 sps:$4 sm:$0xff]   ;;  %v7252_v8 = vld [vmem:[%s11823_s8 + $0x4e8] ss:$12 sps:$4 sm:$0xff]  }
 0x3af   :  { %5173 = vmatprep.subr.bf16.mxu1 %v7150_v44  ;;  %6437 = vmatprep.subr.bf16.mxu0 %v7186_v4  ;;  %v7220_v44 = vld [vmem:[%s11823_s8 + $0x334] ss:$12 sps:$4 sm:$0xff]  }
 0x3b0   :  { %v7256_v4 = vld [vmem:[%s11823_s8 + $0x5c0] ss:$12 sps:$4 sm:$0xff]  }
 0x3b2   :  { %5174 = vmatpush1.bf16.msra.mxu1 %v7148_v52  ;;  %6438 = vmatpush3.bf16.msra.mxu0 %v7187_v23  ;;  %v7218_v52 = vld [vmem:[%s11823_s8 + $0x330] ss:$12 sps:$4 sm:$0xff]   ;;  %v7257_v23 = vld [vmem:[%s11823_s8 + $0x500] ss:$12 sps:$4 sm:$0xff]  }
 0x3b3   :  { %5175 = vmatprep.subr.bf16.mxu1 %v7155_v26  ;;  %6445 = vmatprep.subr.bf16.mxu0 %v7191_v19  ;;  %v7225_v26 = vld [vmem:[%s11823_s8 + $0x34c] ss:$12 sps:$4 sm:$0xff]  }
 0x3b4   :  { %v3119_v53 = vpop.f32.mrb[82].mxu1  ;;  %v7261_v19 = vld [vmem:[%s11823_s8 + $0x5d8] ss:$12 sps:$4 sm:$0xff]  }
 0x3b5   :  { %5443 = vmatmul.mubr.bf16.vlgmr.msra.gmra.mrb[124].mxu0 %v11038_v27  ;;  %v3121_v43 = vpop.f32.mrb[83].mxu1  ;;  %v11140_v10 = vpack.c.bf16 %v3119_v53, %v3119_v53  ;;  %v7267_v53 = vld [vmem:[%s11823_s8 + $0x530] ss:$12 sps:$4 sm:$0xff]  }
 0x3b6   :  { %5176 = vmatpush1.bf16.msra.mxu1 %v7153_v0  ;;  %6446 = vmatpush3.bf16.msra.mxu0 %v7192_v2  ;;  %v11059_v14 = vpack.c.bf16 %v3121_v43, %v3121_v43  ;;  %v7262_v0 = vld [vmem:[%s11823_s8 + $0x518] ss:$12 sps:$4 sm:$0xff]   ;;  %v7235_v43 = vld [vmem:[%s11823_s8 + $0x37c] ss:$12 sps:$4 sm:$0xff]  }
 0x3b7   :  { %5177 = vmatprep.subr.bf16.mxu1 %v7160_v28  ;;  %6447 = vmatprep.subr.bf16.mxu0 %v7196_v1  ;;  %v7230_v2 = vld [vmem:[%s11823_s8 + $0x364] ss:$12 sps:$4 sm:$0xff]   ;;  %v7228_v1 = vld [vmem:[%s11823_s8 + $0x360] ss:$12 sps:$4 sm:$0xff]  }
 0x3b8   :  { %5482 = vmatprep.mubr.bf16.mxu0 %v11059_v14  ;;  %v7266_v28 = vld [vmem:[%s11823_s8 + $0x5f0] ss:$12 sps:$4 sm:$0xff]  }
 0x3ba   :  { %5178 = vmatpush1.bf16.msra.mxu1 %v7158_v11  ;;  %6448 = vmatpush3.bf16.msra.mxu0 %v7197_v40  ;;  %v7271_v11 = vld [vmem:[%s11823_s8 + $0x6c8] ss:$12 sps:$4 sm:$0xff]   ;;  %v7233_v40 = vld [vmem:[%s11823_s8 + $0x378] ss:$12 sps:$4 sm:$0xff]  }
 0x3bb   :  { %5179 = vmatprep.subr.bf16.mxu1 %v7165_v60  ;;  %6449 = vmatprep.subr.bf16.mxu0 %v7201_v34  ;;  %v7238_v60 = vld [vmem:[%s11823_s8 + $0x390] ss:$12 sps:$4 sm:$0xff]   ;;  %v7245_v34 = vld [vmem:[%s11823_s8 + $0x3ac] ss:$12 sps:$4 sm:$0xff]  }
 0x3be   :  { %5180 = vmatpush1.bf16.msra.mxu1 %v7163_v12  ;;  %6450 = vmatpush3.bf16.msra.mxu0 %v7202_v46  ;;  %v7243_v12 = vld [vmem:[%s11823_s8 + $0x3a8] ss:$12 sps:$4 sm:$0xff]   ;;  %v7250_v46 = vld [vmem:[%s11823_s8 + $0x3c4] ss:$12 sps:$4 sm:$0xff]  }
 0x3bf   :  { %5181 = vmatprep.subr.bf16.mxu1 %v7170_v3  ;;  %6451 = vmatprep.subr.bf16.mxu0 %v7206_v36  ;;  %v7248_v3 = vld [vmem:[%s11823_s8 + $0x3c0] ss:$12 sps:$4 sm:$0xff]   ;;  %v7255_v36 = vld [vmem:[%s11823_s8 + $0x3dc] ss:$12 sps:$4 sm:$0xff]  }
 0x3c2   :  { %5182 = vmatpush1.bf16.msra.mxu1 %v7168_v20  ;;  %6452 = vmatpush3.bf16.msra.mxu0 %v7207_v55  ;;  %v7253_v20 = vld [vmem:[%s11823_s8 + $0x3d8] ss:$12 sps:$4 sm:$0xff]   ;;  %v7260_v55 = vld [vmem:[%s11823_s8 + $0x3f4] ss:$12 sps:$4 sm:$0xff]  }
 0x3c3   :  { %5183 = vmatprep.subr.bf16.mxu1 %v7175_v29  ;;  %6453 = vmatprep.subr.bf16.mxu0 %v7211_v30  ;;  %v7258_v29 = vld [vmem:[%s11823_s8 + $0x3f0] ss:$12 sps:$4 sm:$0xff]   ;;  %v7265_v30 = vld [vmem:[%s11823_s8 + $0x40c] ss:$12 sps:$4 sm:$0xff]  }
 0x3c6   :  { %5184 = vmatpush1.bf16.msra.mxu1 %v7173_v62  ;;  %6454 = vmatpush3.bf16.msra.mxu0 %v7212_v41  ;;  %v7263_v62 = vld [vmem:[%s11823_s8 + $0x408] ss:$12 sps:$4 sm:$0xff]   ;;  %v7270_v41 = vld [vmem:[%s11823_s8 + $0x424] ss:$12 sps:$4 sm:$0xff]  }
 0x3c7   :  { %5185 = vmatprep.subr.bf16.mxu1 %v7180_v6  ;;  %6455 = vmatprep.subr.bf16.mxu0 %v7216_v31  ;;  %v7268_v6 = vld [vmem:[%s11823_s8 + $0x420] ss:$12 sps:$4 sm:$0xff]   ;;  %v7275_v31 = vld [vmem:[%s11823_s8 + $0x43c] ss:$12 sps:$4 sm:$0xff]  }
 0x3ca   :  { %5186 = vmatpush1.bf16.msra.mxu1 %v7178_v48  ;;  %6456 = vmatpush3.bf16.msra.mxu0 %v7217_v25  ;;  %v7273_v25 = vld [vmem:[%s11823_s8 + $0x438] ss:$12 sps:$4 sm:$0xff]  }
 0x3cb   :  { %5187 = vmatprep.subr.bf16.mxu1 %v7185_v5  ;;  %6457 = vmatprep.subr.bf16.mxu0 %v7221_v56 }
 0x3ce   :  { %5188 = vmatpush1.bf16.msra.mxu1 %v7183_v47  ;;  %6458 = vmatpush3.bf16.msra.mxu0 %v7222_v42  ;;  %v7280_v47 = vld [vmem:[%s11823_s8 + $0x454] ss:$12 sps:$4 sm:$0xff]  }
 0x3cf   :  { %5189 = vmatprep.subr.bf16.mxu1 %v7190_v37  ;;  %6459 = vmatprep.subr.bf16.mxu0 %v7226_v50  ;;  %v7272_v37 = vld [vmem:[%s11823_s8 + $0x608] ss:$12 sps:$4 sm:$0xff]   ;;  %v7276_v50 = vld [vmem:[%s11823_s8 + $0x6e0] ss:$12 sps:$4 sm:$0xff]  }
 0x3d2   :  { %5190 = vmatpush1.bf16.msra.mxu1 %v7188_v9  ;;  %6460 = vmatpush3.bf16.msra.mxu0 %v7227_v49  ;;  %v7278_v9 = vld [vmem:[%s11823_s8 + $0x450] ss:$12 sps:$4 sm:$0xff]   ;;  %v7285_v49 = vld [vmem:[%s11823_s8 + $0x46c] ss:$12 sps:$4 sm:$0xff]  }
 0x3d3   :  { %5191 = vmatprep.subr.bf16.mxu1 %v7195_v17  ;;  %6467 = vmatprep.subr.bf16.mxu0 %v7231_v54  ;;  %v7277_v17 = vld [vmem:[%s11823_s8 + $0x620] ss:$12 sps:$4 sm:$0xff]   ;;  %v7281_v54 = vld [vmem:[%s11823_s8 + $0x6f8] ss:$12 sps:$4 sm:$0xff]  }
 0x3d5   :  { %5483 = vmatmul.mubr.bf16.vlgmr.msra.gmra.mrb[128].mxu0 %v11140_v10 }
 0x3d6   :  { %5192 = vmatpush1.bf16.msra.mxu1 %v7193_v32  ;;  %6468 = vmatpush3.bf16.msra.mxu0 %v7232_v63  ;;  %v7283_v32 = vld [vmem:[%s11823_s8 + $0x468] ss:$12 sps:$4 sm:$0xff]   ;;  %v7290_v63 = vld [vmem:[%s11823_s8 + $0x484] ss:$12 sps:$4 sm:$0xff]  }
 0x3d7   :  { %5193 = vmatprep.subr.bf16.mxu1 %v7200_v16  ;;  %6469 = vmatprep.subr.bf16.mxu0 %v7236_v21  ;;  %v7282_v16 = vld [vmem:[%s11823_s8 + $0x638] ss:$12 sps:$4 sm:$0xff]   ;;  %v7286_v21 = vld [vmem:[%s11823_s8 + $0x710] ss:$12 sps:$4 sm:$0xff]  }
 0x3da   :  { %5194 = vmatpush1.bf16.msra.mxu1 %v7198_v7  ;;  %6470 = vmatpush3.bf16.msra.mxu0 %v7237_v22  ;;  %v7288_v7 = vld [vmem:[%s11823_s8 + $0x480] ss:$12 sps:$4 sm:$0xff]   ;;  %v7295_v22 = vld [vmem:[%s11823_s8 + $0x49c] ss:$12 sps:$4 sm:$0xff]  }
 0x3db   :  { %5195 = vmatprep.subr.bf16.mxu1 %v7205_v18  ;;  %6471 = vmatprep.subr.bf16.mxu0 %v7241_v15  ;;  %v7287_v18 = vld [vmem:[%s11823_s8 + $0x650] ss:$12 sps:$4 sm:$0xff]   ;;  %v7291_v15 = vld [vmem:[%s11823_s8 + $0x728] ss:$12 sps:$4 sm:$0xff]  }
 0x3de   :  { %5196 = vmatpush1.bf16.msra.mxu1 %v7203_v13  ;;  %6472 = vmatpush3.bf16.msra.mxu0 %v7242_v24  ;;  %v7293_v13 = vld [vmem:[%s11823_s8 + $0x498] ss:$12 sps:$4 sm:$0xff]   ;;  %v7300_v24 = vld [vmem:[%s11823_s8 + $0x4b4] ss:$12 sps:$4 sm:$0xff]  }
 0x3df   :  { %5206 = vmatprep.subr.bf16.mxu1 %v7210_v61  ;;  %6473 = vmatprep.subr.bf16.mxu0 %v7246_v33  ;;  %v7292_v61 = vld [vmem:[%s11823_s8 + $0x668] ss:$12 sps:$4 sm:$0xff]   ;;  %v7298_v33 = vld [vmem:[%s11823_s8 + $0x4b0] ss:$12 sps:$4 sm:$0xff]  }
 0x3e1   :  { %5198 = vmatmul.mubr.bf16.vlgmr.msra.gmra.mrb[88].mxu1 %v11038_v27  ;;  %v7223_v27 = vld [vmem:[%s11823_s8 + $0x348] ss:$12 sps:$4 sm:$0xff]  }
 0x3e2   :  { %5207 = vmatpush1.bf16.msra.mxu1 %v7208_v45  ;;  %6474 = vmatpush3.bf16.msra.mxu0 %v7247_v35  ;;  %v7305_v45 = vld [vmem:[%s11823_s8 + $0x4cc] ss:$12 sps:$4 sm:$0xff]  }
 0x3e3   :  { %5208 = vmatprep.subr.bf16.mxu1 %v7215_v57  ;;  %6475 = vmatprep.subr.bf16.mxu0 %v7251_v39  ;;  %v7297_v35 = vld [vmem:[%s11823_s8 + $0x680] ss:$12 sps:$4 sm:$0xff]   ;;  %v7301_v57 = vld [vmem:[%s11823_s8 + $0x758] ss:$12 sps:$4 sm:$0xff]   ;;  %v7303_v39 = vld [vmem:[%s11823_s8 + $0x4c8] ss:$12 sps:$4 sm:$0xff]  }
 0x3e4   :  { %5238 = vmatprep.mubr.bf16.mxu1 %v11059_v14  ;;  %v7240_v14 = vld [vmem:[%s11823_s8 + $0x394] ss:$12 sps:$4 sm:$0xff]  }
 0x3e6   :  { %5209 = vmatpush1.bf16.msra.mxu1 %v7213_v58  ;;  %6476 = vmatpush3.bf16.msra.mxu0 %v7252_v8  ;;  %v7310_v58 = vld [vmem:[%s11823_s8 + $0x4e4] ss:$12 sps:$4 sm:$0xff]  }
 0x3e7   :  { %5210 = vmatprep.subr.bf16.mxu1 %v7220_v44  ;;  %6477 = vmatprep.subr.bf16.mxu0 %v7256_v4  ;;  %v7302_v8 = vld [vmem:[%s11823_s8 + $0x698] ss:$12 sps:$4 sm:$0xff]   ;;  %v7306_v44 = vld [vmem:[%s11823_s8 + $0x770] ss:$12 sps:$4 sm:$0xff]   ;;  %v7308_v4 = vld [vmem:[%s11823_s8 + $0x4e0] ss:$12 sps:$4 sm:$0xff]  }
 0x3ea   :  { %5211 = vmatpush1.bf16.msra.mxu1 %v7218_v52  ;;  %6478 = vmatpush3.bf16.msra.mxu0 %v7257_v23  ;;  %v7314_v52 = vld [vmem:[%s11823_s8 + $0x4fc] ss:$12 sps:$4 sm:$0xff]  }
 0x3eb   :  { %5212 = vmatprep.subr.bf16.mxu1 %v7225_v26  ;;  %6479 = vmatprep.subr.bf16.mxu0 %v7261_v19  ;;  %v7307_v23 = vld [vmem:[%s11823_s8 + $0x6b0] ss:$12 sps:$4 sm:$0xff]   ;;  %v7312_v26 = vld [vmem:[%s11823_s8 + $0x4f8] ss:$12 sps:$4 sm:$0xff]   ;;  %v7318_v19 = vld [vmem:[%s11823_s8 + $0x514] ss:$12 sps:$4 sm:$0xff]  }
 0x3ee   :  { %5213 = vmatpush1.bf16.msra.mxu1 %v7223_v27  ;;  %6480 = vmatpush3.bf16.msra.mxu0 %v7262_v0 }
 0x3ef   :  { %5214 = vmatprep.subr.bf16.mxu1 %v7230_v2  ;;  %6481 = vmatprep.subr.bf16.mxu0 %v7266_v28 }
 0x3f2   :  { %5215 = vmatpush1.bf16.msra.mxu1 %v7228_v1  ;;  %6482 = vmatpush3.bf16.msra.mxu0 %v7267_v53  ;;  %v7311_v1 = vld [vmem:[%s11823_s8 + $0x788] ss:$12 sps:$4 sm:$0xff]   ;;  %v7316_v53 = vld [vmem:[%s11823_s8 + $0x510] ss:$12 sps:$4 sm:$0xff]  }
 0x3f3   :  { %5216 = vmatprep.subr.bf16.mxu1 %v7235_v43  ;;  %6489 = vmatprep.subr.bf16.mxu0 %v7271_v11  ;;  %v7322_v43 = vld [vmem:[%s11823_s8 + $0x52c] ss:$12 sps:$4 sm:$0xff]  }
 0x3f4   :  { %v7315_v11 = vld [vmem:[%s11823_s8 + $0x7a0] ss:$12 sps:$4 sm:$0xff]  }
 0x3f6   :  { %5217 = vmatpush1.bf16.msra.mxu1 %v7233_v40  ;;  %v7320_v40 = vld [vmem:[%s11823_s8 + $0x528] ss:$12 sps:$4 sm:$0xff]  }
 0x3f7   :  { %5218 = vmatprep.subr.bf16.mxu1 %v7240_v14  ;;  %v7326_v14 = vld [vmem:[%s11823_s8 + $0x544] ss:$12 sps:$4 sm:$0xff]  }
 0x3fa   :  { %5219 = vmatpush1.bf16.msra.mxu1 %v7238_v60  ;;  %v7319_v60 = vld [vmem:[%s11823_s8 + $0x7b8] ss:$12 sps:$4 sm:$0xff]  }
 0x3fb   :  { %5220 = vmatprep.subr.bf16.mxu1 %v7245_v34  ;;  %v7324_v34 = vld [vmem:[%s11823_s8 + $0x540] ss:$12 sps:$4 sm:$0xff]  }
 0x3fe   :  { %5221 = vmatpush1.bf16.msra.mxu1 %v7243_v12  ;;  %v7330_v12 = vld [vmem:[%s11823_s8 + $0x55c] ss:$12 sps:$4 sm:$0xff]  }
 0x3ff   :  { %5222 = vmatprep.subr.bf16.mxu1 %v7250_v46  ;;  %v7323_v46 = vld [vmem:[%s11823_s8 + $0x7d0] ss:$12 sps:$4 sm:$0xff]  }
 0x402   :  { %5223 = vmatpush1.bf16.msra.mxu1 %v7248_v3  ;;  %v7328_v3 = vld [vmem:[%s11823_s8 + $0x558] ss:$12 sps:$4 sm:$0xff]  }
 0x403   :  { %5224 = vmatprep.subr.bf16.mxu1 %v7255_v36  ;;  %v7334_v36 = vld [vmem:[%s11823_s8 + $0x574] ss:$12 sps:$4 sm:$0xff]  }
 0x406   :  { %5225 = vmatpush1.bf16.msra.mxu1 %v7253_v20  ;;  %v7327_v20 = vld [vmem:[%s11823_s8 + $0x7e8] ss:$12 sps:$4 sm:$0xff]  }
 0x407   :  { %5226 = vmatprep.subr.bf16.mxu1 %v7260_v55  ;;  %v7332_v55 = vld [vmem:[%s11823_s8 + $0x570] ss:$12 sps:$4 sm:$0xff]  }
 0x40a   :  { %5227 = vmatpush1.bf16.msra.mxu1 %v7258_v29  ;;  %v7338_v29 = vld [vmem:[%s11823_s8 + $0x58c] ss:$12 sps:$4 sm:$0xff]  }
 0x40b   :  { %5228 = vmatprep.subr.bf16.mxu1 %v7265_v30 }
 0x40e   :  { %5229 = vmatpush1.bf16.msra.mxu1 %v7263_v62 }
 0x40f   :  { %5230 = vmatprep.subr.bf16.mxu1 %v7270_v41  ;;  %v7331_v41 = vld [vmem:[%s11823_s8 + $0x800] ss:$12 sps:$4 sm:$0xff]  }
 0x412   :  { %v3190_v48 = vpop.f32.mrb[114].mxu0  ;;  %5231 = vmatpush1.bf16.msra.mxu1 %v7268_v6  ;;  %v7336_v6 = vld [vmem:[%s11823_s8 + $0x588] ss:$12 sps:$4 sm:$0xff]  }
 0x413   :  { %v11292_v5 = vpack.c.bf16 %v3190_v48, %v3190_v48  ;;  %v3192_v56 = vpop.f32.mrb[115].mxu0  ;;  %5232 = vmatprep.subr.bf16.mxu1 %v7275_v31  ;;  %v7342_v31 = vld [vmem:[%s11823_s8 + $0x5a4] ss:$12 sps:$4 sm:$0xff]  }
 0x414   :  { %v3343_v42 = vpack.c.bf16 %v3192_v56, %v3192_v56  ;;  %v7335_v48 = vld [vmem:[%s11823_s8 + $0x818] ss:$12 sps:$4 sm:$0xff]   ;;  %v7345_v56 = vld [vmem:[%s11823_s8 + $0x5bc] ss:$12 sps:$4 sm:$0xff]  }
 0x416   :  { %5522 = vmatprep.mubr.bf16.mxu0 %v3343_v42  ;;  %5233 = vmatpush1.bf16.msra.mxu1 %v7273_v25  ;;  %v7340_v25 = vld [vmem:[%s11823_s8 + $0x5a0] ss:$12 sps:$4 sm:$0xff]  }
 0x417   :  { %5523 = vmatmul.mubr.bf16.vlgmr.msra.gmra.mrb[132].mxu0 %v11292_v5  ;;  %5234 = vmatprep.subr.bf16.mxu1 %v7280_v47  ;;  %v7339_v47 = vld [vmem:[%s11823_s8 + $0x830] ss:$12 sps:$4 sm:$0xff]  }
 0x418   :  { %6490 = vmatpush3.bf16.msra.mxu0 %v7272_v37  ;;  %v7348_v37 = vld [vmem:[%s11823_s8 + $0x5d4] ss:$12 sps:$4 sm:$0xff]  }
 0x419   :  { %6491 = vmatprep.subr.bf16.mxu0 %v7276_v50 }
 0x41a   :  { %5235 = vmatpush1.bf16.msra.mxu1 %v7278_v9  ;;  %v7346_v9 = vld [vmem:[%s11823_s8 + $0x5d0] ss:$12 sps:$4 sm:$0xff]  }
 0x41b   :  { %5236 = vmatprep.subr.bf16.mxu1 %v7285_v49  ;;  %v7351_v49 = vld [vmem:[%s11823_s8 + $0x5ec] ss:$12 sps:$4 sm:$0xff]  }
 0x41c   :  { %6492 = vmatpush3.bf16.msra.mxu0 %v7277_v17  ;;  %v7349_v17 = vld [vmem:[%s11823_s8 + $0x5e8] ss:$12 sps:$4 sm:$0xff]  }
 0x41d   :  { %6493 = vmatprep.subr.bf16.mxu0 %v7281_v54  ;;  %v7354_v54 = vld [vmem:[%s11823_s8 + $0x604] ss:$12 sps:$4 sm:$0xff]  }
 0x41e   :  { %5237 = vmatpush1.bf16.msra.mxu1 %v7283_v32  ;;  %v7352_v32 = vld [vmem:[%s11823_s8 + $0x600] ss:$12 sps:$4 sm:$0xff]  }
 0x41f   :  { %5247 = vmatprep.subr.bf16.mxu1 %v7290_v63  ;;  %v7357_v63 = vld [vmem:[%s11823_s8 + $0x61c] ss:$12 sps:$4 sm:$0xff]  }
 0x420   :  { %6494 = vmatpush3.bf16.msra.mxu0 %v7282_v16  ;;  %v7355_v16 = vld [vmem:[%s11823_s8 + $0x618] ss:$12 sps:$4 sm:$0xff]  }
 0x421   :  { %6495 = vmatprep.subr.bf16.mxu0 %v7286_v21  ;;  %5239 = vmatmul.mubr.bf16.vlgmr.msra.gmra.mrb[88].mxu1 %v11140_v10  ;;  %v7296_v10 = vld [vmem:[%s11823_s8 + $0x740] ss:$12 sps:$4 sm:$0xff]  }
 0x422   :  { %5248 = vmatpush1.bf16.msra.mxu1 %v7288_v7  ;;  %5279 = vmatprep.mubr.bf16.mxu1 %v3343_v42  ;;  %v7343_v42 = vld [vmem:[%s11823_s8 + $0x5b8] ss:$12 sps:$4 sm:$0xff]   ;;  %v7360_v21 = vld [vmem:[%s11823_s8 + $0x634] ss:$12 sps:$4 sm:$0xff]   ;;  %v7358_v7 = vld [vmem:[%s11823_s8 + $0x630] ss:$12 sps:$4 sm:$0xff]  }
 0x423   :  { %5249 = vmatprep.subr.bf16.mxu1 %v7295_v22 }
 0x424   :  { %6496 = vmatpush3.bf16.msra.mxu0 %v7287_v18 }
 0x425   :  { %6497 = vmatprep.subr.bf16.mxu0 %v7291_v15  ;;  %v7361_v15 = vld [vmem:[%s11823_s8 + $0x648] ss:$12 sps:$4 sm:$0xff]  }
 0x426   :  { %5250 = vmatpush1.bf16.msra.mxu1 %v7293_v13 }
 0x427   :  { %5251 = vmatprep.subr.bf16.mxu1 %v7300_v24 }
 0x428   :  { %6498 = vmatpush3.bf16.msra.mxu0 %v7292_v61  ;;  %v7366_v61 = vld [vmem:[%s11823_s8 + $0x664] ss:$12 sps:$4 sm:$0xff]  }
 0x429   :  { %6499 = vmatprep.subr.bf16.mxu0 %v7296_v10 }
 0x42a   :  { %5252 = vmatpush1.bf16.msra.mxu1 %v7298_v33  ;;  %v7364_v33 = vld [vmem:[%s11823_s8 + $0x660] ss:$12 sps:$4 sm:$0xff]  }
 0x42b   :  { %5253 = vmatprep.subr.bf16.mxu1 %v7305_v45  ;;  %v7369_v45 = vld [vmem:[%s11823_s8 + $0x67c] ss:$12 sps:$4 sm:$0xff]  }
 0x42c   :  { %6500 = vmatpush3.bf16.msra.mxu0 %v7297_v35  ;;  %v7367_v35 = vld [vmem:[%s11823_s8 + $0x678] ss:$12 sps:$4 sm:$0xff]  }
 0x42d   :  { %6501 = vmatprep.subr.bf16.mxu0 %v7301_v57  ;;  %v7372_v57 = vld [vmem:[%s11823_s8 + $0x694] ss:$12 sps:$4 sm:$0xff]  }
 0x42e   :  { %5254 = vmatpush1.bf16.msra.mxu1 %v7303_v39  ;;  %v7370_v39 = vld [vmem:[%s11823_s8 + $0x690] ss:$12 sps:$4 sm:$0xff]  }
 0x42f   :  { %5255 = vmatprep.subr.bf16.mxu1 %v7310_v58  ;;  %v7375_v58 = vld [vmem:[%s11823_s8 + $0x6ac] ss:$12 sps:$4 sm:$0xff]  }
 0x430   :  { %6502 = vmatpush3.bf16.msra.mxu0 %v7302_v8  ;;  %v7373_v8 = vld [vmem:[%s11823_s8 + $0x6a8] ss:$12 sps:$4 sm:$0xff]  }
 0x431   :  { %6503 = vmatprep.subr.bf16.mxu0 %v7306_v44  ;;  %v7378_v44 = vld [vmem:[%s11823_s8 + $0x6c4] ss:$12 sps:$4 sm:$0xff]  }
 0x432   :  { %5256 = vmatpush1.bf16.msra.mxu1 %v7308_v4  ;;  %v7376_v4 = vld [vmem:[%s11823_s8 + $0x6c0] ss:$12 sps:$4 sm:$0xff]  }
 0x433   :  { %5257 = vmatprep.subr.bf16.mxu1 %v7314_v52  ;;  %v7381_v52 = vld [vmem:[%s11823_s8 + $0x6dc] ss:$12 sps:$4 sm:$0xff]  }
 0x434   :  { %v3261_v27 = vpop.f32.mrb[84].mxu1  ;;  %6504 = vmatpush3.bf16.msra.mxu0 %v7307_v23  ;;  %v7379_v23 = vld [vmem:[%s11823_s8 + $0x6d8] ss:$12 sps:$4 sm:$0xff]  }
 0x435   :  { %v11392_v0 = vpack.c.bf16 %v3261_v27, %v3261_v27  ;;  %v3263_v2 = vpop.f32.mrb[85].mxu1  ;;  %6683 = vmatprep.subr.bf16.mxu0 %v12183_v59 }
 0x436   :  { %v11395_v28 = vpack.c.bf16 %v3263_v2, %v3263_v2  ;;  %5258 = vmatpush1.bf16.msra.mxu1 %v7312_v26  ;;  %v11557_v26 = vld [vmem:[%s11824_s9] sm:$0x7]  ;;  %v7382_v2 = vld [vmem:[%s11823_s8 + $0x6f0] ss:$12 sps:$4 sm:$0xff]  }
 0x437   :  { %5259 = vmatprep.subr.bf16.mxu1 %v7318_v19  ;;  %v7384_v19 = vld [vmem:[%s11823_s8 + $0x6f4] ss:$12 sps:$4 sm:$0xff]   ;;  %v3712_v27 = vrot.slane %v11557_v26, %v12155_v38  ;;  %v7390_v38 = vld [vmem:[%s11823_s8 + $0x724] ss:$12 sps:$4 sm:$0xff]  }
 0x438   :  { %5562 = vmatprep.mubr.bf16.mxu0 %v11395_v28 }
 0x439   :  { %5563 = vmatmul.mubr.bf16.vlgmr.msra.gmra.mrb[136].mxu0 %v11392_v0 }
 0x43a   :  { %6684 = vmatpush3.bf16.msra.mxu0 %v7311_v1  ;;  %5260 = vmatpush1.bf16.msra.mxu1 %v7316_v53 }
 0x43b   :  { %6685 = vmatprep.subr.bf16.mxu0 %v12183_v59  ;;  %5261 = vmatprep.subr.bf16.mxu1 %v7322_v43 }
 0x43c   :  { %6699 = vmatprep.mubr.msk.bf16.mxu0 %vm8199_vm1, %v12183_v59 }
 0x43e   :  { %6686 = vmatpush3.bf16.msra.mxu0 %v7315_v11  ;;  %5262 = vmatpush1.bf16.msra.mxu1 %v7320_v40  ;;  %v7385_v11 = vld [vmem:[%s11823_s8 + $0x708] ss:$12 sps:$4 sm:$0xff]  }
 0x43f   :  { %6687 = vmatprep.subr.bf16.mxu0 %v12183_v59  ;;  %5263 = vmatprep.subr.bf16.mxu1 %v7326_v14 }
 0x442   :  { %6688 = vmatpush3.bf16.msra.mxu0 %v7319_v60  ;;  %5264 = vmatpush1.bf16.msra.mxu1 %v7324_v34 }
 0x443   :  { %6689 = vmatprep.subr.bf16.mxu0 %v12183_v59  ;;  %5265 = vmatprep.subr.bf16.mxu1 %v7330_v12  ;;  %v7388_v12 = vld [vmem:[%s11823_s8 + $0x720] ss:$12 sps:$4 sm:$0xff]  }
 0x446   :  { %6690 = vmatpush3.bf16.msra.mxu0 %v7323_v46  ;;  %5266 = vmatpush1.bf16.msra.mxu1 %v7328_v3  ;;  %v7393_v46 = vld [vmem:[%s11823_s8 + $0x73c] ss:$12 sps:$4 sm:$0xff]   ;;  %v7391_v3 = vld [vmem:[%s11823_s8 + $0x738] ss:$12 sps:$4 sm:$0xff]  }
 0x447   :  { %6691 = vmatprep.subr.bf16.mxu0 %v12183_v59  ;;  %5267 = vmatprep.subr.bf16.mxu1 %v7334_v36  ;;  %v7396_v36 = vld [vmem:[%s11823_s8 + $0x754] ss:$12 sps:$4 sm:$0xff]  }
 0x448   :  { %v3332_v30 = vpop.f32.mrb[116].mxu0 }
 0x449   :  { %v6682_v62 = vpop.f32.mrb[117].mxu0  ;;  %v11480_v50 = vpack.c.bf16 %v3332_v30, %v3332_v30  ;;  %v7402_v30 = vld [vmem:[%s11823_s8 + $0x784] ss:$12 sps:$4 sm:$0xff]  }
 0x44a   :  { %6692 = vmatpush3.bf16.msra.mxu0 %v7327_v20  ;;  %5268 = vmatpush1.bf16.msra.mxu1 %v7332_v55  ;;  %v7394_v20 = vld [vmem:[%s11823_s8 + $0x750] ss:$12 sps:$4 sm:$0xff]   ;;  %v7399_v55 = vld [vmem:[%s11823_s8 + $0x76c] ss:$12 sps:$4 sm:$0xff]  }
 0x44b   :  { %6693 = vmatprep.subr.bf16.mxu0 %v12183_v59  ;;  %5269 = vmatprep.subr.bf16.mxu1 %v7338_v29  ;;  %v7397_v29 = vld [vmem:[%s11823_s8 + $0x768] ss:$12 sps:$4 sm:$0xff]   ;;  %v7400_v62 = vld [vmem:[%s11823_s8 + $0x780] ss:$12 sps:$4 sm:$0xff]  }
 0x44e   :  { %6694 = vmatpush3.bf16.msra.mxu0 %v7331_v41  ;;  %5270 = vmatpush1.bf16.msra.mxu1 %v7336_v6  ;;  %v7405_v41 = vld [vmem:[%s11823_s8 + $0x79c] ss:$12 sps:$4 sm:$0xff]   ;;  %v7403_v6 = vld [vmem:[%s11823_s8 + $0x798] ss:$12 sps:$4 sm:$0xff]  }
 0x44f   :  { %6695 = vmatprep.subr.bf16.mxu0 %v12183_v59  ;;  %5271 = vmatprep.subr.bf16.mxu1 %v7342_v31  ;;  %v12186_v31 = vmov 0  }
 0x452   :  { %6696 = vmatpush3.bf16.msra.mxu0 %v7335_v48  ;;  %5272 = vmatpush1.bf16.msra.mxu1 %v7340_v25  ;;  %v7408_v48 = vld [vmem:[%s11823_s8 + $0x7b4] ss:$12 sps:$4 sm:$0xff]   ;;  %v7406_v25 = vld [vmem:[%s11823_s8 + $0x7b0] ss:$12 sps:$4 sm:$0xff]  }
 0x453   :  { %6697 = vmatprep.subr.bf16.mxu0 %v12183_v59  ;;  %5273 = vmatprep.subr.bf16.mxu1 %v7345_v56 }
 0x456   :  { %6698 = vmatpush3.bf16.msra.mxu0 %v7339_v47  ;;  %5274 = vmatpush1.bf16.msra.mxu1 %v7343_v42  ;;  %v7409_v42 = vld [vmem:[%s11823_s8 + $0x7c8] ss:$12 sps:$4 sm:$0xff]  }
 0x457   :  { %5275 = vmatprep.subr.bf16.mxu1 %v7348_v37 }
 0x459   :  { %6700 = vmatmul.mubr.bf16.vlgmr.msra.gmra.mrb[140].mxu0 %v11480_v50 }
 0x45a   :  { %5276 = vmatpush1.bf16.msra.mxu1 %v7346_v9 }
 0x45b   :  { %5277 = vmatprep.subr.bf16.mxu1 %v7351_v49  ;;  %v7414_v49 = vld [vmem:[%s11823_s8 + $0x7e4] ss:$12 sps:$4 sm:$0xff]  }
 0x45e   :  { %5278 = vmatpush1.bf16.msra.mxu1 %v7349_v17 }
 0x45f   :  { %5288 = vmatprep.subr.bf16.mxu1 %v7354_v54 }
 0x461   :  { %5280 = vmatmul.mubr.bf16.vlgmr.msra.gmra.mrb[88].mxu1 %v11292_v5  ;;  %v7363_v5 = vld [vmem:[%s11823_s8 + $0x64c] ss:$12 sps:$4 sm:$0xff]  }
 0x462   :  { %5289 = vmatpush1.bf16.msra.mxu1 %v7352_v32  ;;  %5320 = vmatprep.mubr.bf16.mxu1 %v11395_v28  ;;  %v7387_v28 = vld [vmem:[%s11823_s8 + $0x70c] ss:$12 sps:$4 sm:$0xff]  }
 0x463   :  { %5290 = vmatprep.subr.bf16.mxu1 %v7357_v63  ;;  %v7412_v32 = vld [vmem:[%s11823_s8 + $0x7e0] ss:$12 sps:$4 sm:$0xff]   ;;  %v7417_v63 = vld [vmem:[%s11823_s8 + $0x7fc] ss:$12 sps:$4 sm:$0xff]  }
 0x466   :  { %5291 = vmatpush1.bf16.msra.mxu1 %v7355_v16  ;;  %v7415_v16 = vld [vmem:[%s11823_s8 + $0x7f8] ss:$12 sps:$4 sm:$0xff]  }
 0x467   :  { %5292 = vmatprep.subr.bf16.mxu1 %v7360_v21  ;;  %v5629_v21 = vld [vmem:[%s11825_s10 + $0x80] sm:$0xff] }
 0x468   :  { %v6417_v22 = vpop.f32.mrb[120].mxu0 }
 0x469   :  { %v6418_v18 = vpop.f32.mrb[121].mxu0 }
 0x46a   :  { %5293 = vmatpush1.bf16.msra.mxu1 %v7358_v7  ;;  %v6419_v13 = vadd.f32 %v6418_v18, %v6417_v22  ;;  %v6420_v24 = vpop.f32.mrb[122].mxu0  ;;  %v5630_v7 = vld [vmem:[%s11825_s10 + $0x88] sm:$0xff] }
 0x46b   :  { %5294 = vmatprep.subr.bf16.mxu1 %v7363_v5  ;;  %v6421_v10 = vpop.f32.mrb[123].mxu0  ;;  %v5613_v5 = vld [vmem:[%s11825_s10] sm:$0xff]  ;;  %v6954_v22 = vpack.c.bf16 %v5630_v7, %v5629_v21  ;;  %v5614_v18 = vld [vmem:[%s11825_s10 + $0x8] sm:$0xff]  ;;  %v5627_v21 = vld [vmem:[%s11825_s10 + $0x70] sm:$0xff] }
 0x46c   :  { %v5405_v43 = vadd.f32 %v6419_v13, %v3712_v27  ;;  %v5632_v13 = vld [vmem:[%s11825_s10 + $0x98] sm:$0xff]  ;;  %v6956_v24 = vpack.c.bf16 %v5614_v18, %v5613_v5  ;;  %v5615_v10 = vld [vmem:[%s11825_s10 + $0x10] sm:$0xff] }
 0x46d   :  { %6955 = vmatprep.subr.bf16.mxu0 %v6954_v22 }
 0x46e   :  { %5295 = vmatpush1.bf16.msra.mxu1 %v7361_v15  ;;  %v5631_v15 = vld [vmem:[%s11825_s10 + $0x90] sm:$0xff]  ;;  %6957 = vmatpush3.bf16.msra.mxu0 %v6956_v24 }
 0x46f   :  { %5296 = vmatprep.subr.bf16.mxu1 %v7366_v61  ;;  %v6958_v61 = vpack.c.bf16 %v5632_v13, %v5631_v15 }
 0x471   :  { %6959 = vmatprep.subr.bf16.mxu0 %v6958_v61  ;;  %v12187_v61 = vld [vmem:[#allocation3_spill] sm:$0xff] }
 0x472   :  { %5297 = vmatpush1.bf16.msra.mxu1 %v7364_v33  ;;  %v5616_v33 = vld [vmem:[%s11825_s10 + $0x18] sm:$0xff] }
 0x473   :  { %5298 = vmatprep.subr.bf16.mxu1 %v7369_v45  ;;  %v5633_v45 = vld [vmem:[%s11825_s10 + $0xa0] sm:$0xff] }
 0x476   :  { %5299 = vmatpush1.bf16.msra.mxu1 %v7367_v35  ;;  %v7420_v35 = vld [vmem:[%s11823_s8 + $0x814] ss:$12 sps:$4 sm:$0xff]  }
 0x477   :  { %5300 = vmatprep.subr.bf16.mxu1 %v7372_v57  ;;  %v5634_v57 = vld [vmem:[%s11825_s10 + $0xa8] sm:$0xff] }
 0x47a   :  { %5301 = vmatpush1.bf16.msra.mxu1 %v7370_v39  ;;  %v6960_v39 = vpack.c.bf16 %v5616_v33, %v5615_v10  ;;  %v3704_v10 = vrot.slane %v11557_v26, %v12187_v61  ;;  %v12188_v33 = vld [vmem:[#allocation4_spill] sm:$0xff] }
 0x47b   :  { %5302 = vmatprep.subr.bf16.mxu1 %v7375_v58  ;;  %v6962_v58 = vpack.c.bf16 %v5634_v57, %v5633_v45  ;;  %v3708_v45 = vrot.slane %v11557_v26, %v12188_v33  ;;  %v5647_v26 = vld [vmem:[%s11825_s10 + $0x110] sm:$0xff] }
 0x47c   :  { %6961 = vmatpush3.bf16.msra.mxu0 %v6960_v39 }
 0x47d   :  { %6963 = vmatprep.subr.bf16.mxu0 %v6962_v58  ;;  %v5645_v58 = vld [vmem:[%s11825_s10 + $0x100] sm:$0xff] }
 0x47e   :  { %5303 = vmatpush1.bf16.msra.mxu1 %v7373_v8  ;;  %v5617_v8 = vld [vmem:[%s11825_s10 + $0x20] sm:$0xff] }
 0x47f   :  { %5304 = vmatprep.subr.bf16.mxu1 %v7378_v44  ;;  %v5618_v44 = vld [vmem:[%s11825_s10 + $0x28] sm:$0xff] }
 0x480   :  { %v6964_v27 = vpack.c.bf16 %v5618_v44, %v5617_v8  ;;  %v5646_v8 = vld [vmem:[%s11825_s10 + $0x108] sm:$0xff] }
 0x482   :  { %5305 = vmatpush1.bf16.msra.mxu1 %v7376_v4  ;;  %v7418_v4 = vld [vmem:[%s11823_s8 + $0x810] ss:$12 sps:$4 sm:$0xff]   ;;  %6965 = vmatpush3.bf16.msra.mxu0 %v6964_v27 }
 0x483   :  { %5306 = vmatprep.subr.bf16.mxu1 %v7381_v52  ;;  %v5635_v52 = vld [vmem:[%s11825_s10 + $0xb0] sm:$0xff] }
 0x486   :  { %5307 = vmatpush1.bf16.msra.mxu1 %v7379_v23  ;;  %v5636_v23 = vld [vmem:[%s11825_s10 + $0xb8] sm:$0xff] }
 0x487   :  { %5308 = vmatprep.subr.bf16.mxu1 %v7384_v19  ;;  %v7423_v19 = vld [vmem:[%s11823_s8 + $0x82c] ss:$12 sps:$4 sm:$0xff]  }
 0x488   :  { %v6439_v1 = vpop.f32.mrb[124].mxu0 }
 0x489   :  { %v6440_v53 = vpop.f32.mrb[125].mxu0 }
 0x48a   :  { %5309 = vmatpush1.bf16.msra.mxu1 %v7382_v2  ;;  %v6441_v40 = vadd.f32 %v6440_v53, %v6439_v1  ;;  %v6442_v14 = vpop.f32.mrb[126].mxu0  ;;  %v6966_v2 = vpack.c.bf16 %v5636_v23, %v5635_v52  ;;  %v5620_v1 = vld [vmem:[%s11825_s10 + $0x38] sm:$0xff]  ;;  %v7421_v53 = vld [vmem:[%s11823_s8 + $0x828] ss:$12 sps:$4 sm:$0xff]  }
 0x48b   :  { %5310 = vmatprep.subr.bf16.mxu1 %v7387_v28  ;;  %v6443_v60 = vpop.f32.mrb[127].mxu0  ;;  %v5619_v28 = vld [vmem:[%s11825_s10 + $0x30] sm:$0xff] }
 0x48c   :  { %v5445_v34 = vadd.f32 %v6441_v40, %v5405_v43  ;;  %v5637_v43 = vld [vmem:[%s11825_s10 + $0xc0] sm:$0xff]  ;;  %v6968_v40 = vpack.c.bf16 %v5620_v1, %v5619_v28  ;;  %6967 = vmatprep.subr.bf16.mxu0 %v6966_v2  ;;  %v5622_v60 = vld [vmem:[%s11825_s10 + $0x48] sm:$0xff]  ;;  %v5648_v2 = vld [vmem:[%s11825_s10 + $0x118] sm:$0xff] }
 0x48d   :  { %v6990_v28 = vpack.c.bf16 %v5648_v2, %v5647_v26  ;;  %v5649_v1 = vld [vmem:[%s11825_s10 + $0x120] sm:$0xff] }
 0x48e   :  { %5311 = vmatpush1.bf16.msra.mxu1 %v7385_v11  ;;  %v5638_v11 = vld [vmem:[%s11825_s10 + $0xc8] sm:$0xff]  ;;  %6969 = vmatpush3.bf16.msra.mxu0 %v6968_v40 }
 0x48f   :  { %5312 = vmatprep.subr.bf16.mxu1 %v7390_v38  ;;  %v6970_v14 = vpack.c.bf16 %v5638_v11, %v5637_v43  ;;  %v5621_v38 = vld [vmem:[%s11825_s10 + $0x40] sm:$0xff]  ;;  %v5651_v11 = vld [vmem:[%s11825_s10 + $0x130] sm:$0xff] }
 0x491   :  { %6971 = vmatprep.subr.bf16.mxu0 %v6970_v14  ;;  %v5653_v14 = vld [vmem:[%s11825_s10 + $0x140] sm:$0xff] }
 0x492   :  { %5313 = vmatpush1.bf16.msra.mxu1 %v7388_v12  ;;  %v5640_v12 = vld [vmem:[%s11825_s10 + $0xd8] sm:$0xff] }
 0x493   :  { %5314 = vmatprep.subr.bf16.mxu1 %v7393_v46  ;;  %v6972_v46 = vpack.c.bf16 %v5622_v60, %v5621_v38  ;;  %v5654_v38 = vld [vmem:[%s11825_s10 + $0x148] sm:$0xff] }
 0x494   :  { %v6999_v60 = vpack.c.bf16 %v5654_v38, %v5653_v14 }
 0x495   :  { %6973 = vmatpush3.bf16.msra.mxu0 %v6972_v46 }
 0x496   :  { %5315 = vmatpush1.bf16.msra.mxu1 %v7391_v3 }
 0x497   :  { %5316 = vmatprep.subr.bf16.mxu1 %v7396_v36  ;;  %v5623_v36 = vld [vmem:[%s11825_s10 + $0x50] sm:$0xff] }
 0x49a   :  { %5317 = vmatpush1.bf16.msra.mxu1 %v7394_v20  ;;  %v5624_v20 = vld [vmem:[%s11825_s10 + $0x58] sm:$0xff] }
 0x49b   :  { %5318 = vmatprep.subr.bf16.mxu1 %v7399_v55  ;;  %v5641_v55 = vld [vmem:[%s11825_s10 + $0xe0] sm:$0xff] }
 0x49e   :  { %5319 = vmatpush1.bf16.msra.mxu1 %v7397_v29  ;;  %v5642_v29 = vld [vmem:[%s11825_s10 + $0xe8] sm:$0xff] }
 0x49f   :  { %5329 = vmatprep.subr.bf16.mxu1 %v7402_v30  ;;  %v6978_v30 = vpack.c.bf16 %v5642_v29, %v5641_v55  ;;  %v5659_v55 = vld [vmem:[%s11825_s10 + $0x170] sm:$0xff]  ;;  %v5660_v29 = vld [vmem:[%s11825_s10 + $0x178] sm:$0xff] }
 0x4a1   :  { %5321 = vmatmul.mubr.bf16.vlgmr.msra.gmra.mrb[88].mxu1 %v11392_v0  ;;  %v7411_v0 = vld [vmem:[%s11823_s8 + $0x7cc] ss:$12 sps:$4 sm:$0xff]  }
 0x4a2   :  { %5330 = vmatpush1.bf16.msra.mxu1 %v7400_v62  ;;  %5361 = vmatprep.mubr.bf16.mxu1 %v12186_v31  ;;  %v5625_v62 = vld [vmem:[%s11825_s10 + $0x60] sm:$0xff] }
 0x4a3   :  { %5331 = vmatprep.subr.bf16.mxu1 %v7405_v41  ;;  %v5626_v41 = vld [vmem:[%s11825_s10 + $0x68] sm:$0xff] }
 0x4a6   :  { %5332 = vmatpush1.bf16.msra.mxu1 %v7403_v6  ;;  %v6980_v6 = vpack.c.bf16 %v5626_v41, %v5625_v62 }
 0x4a7   :  { %5333 = vmatprep.subr.bf16.mxu1 %v7408_v48 }
 0x4a8   :  { %v6461_v56 = vpop.f32.mrb[128].mxu0 }
 0x4a9   :  { %v6462_v47 = vpop.f32.mrb[129].mxu0 }
 0x4aa   :  { %5334 = vmatpush1.bf16.msra.mxu1 %v7406_v25  ;;  %v6463_v37 = vadd.f32 %v6462_v47, %v6461_v56  ;;  %v6464_v9 = vpop.f32.mrb[130].mxu0 }
 0x4ab   :  { %5335 = vmatprep.subr.bf16.mxu1 %v7411_v0  ;;  %v6465_v17 = vpop.f32.mrb[131].mxu0 }
 0x4ac   :  { %v11626_v54 = vadd.f32 %v6463_v37, %v5445_v34  ;;  %v5639_v34 = vld [vmem:[%s11825_s10 + $0xd0] sm:$0xff] }
 0x4ad   :  { %v6974_v3 = vpack.c.bf16 %v5640_v12, %v5639_v34  ;;  %v5655_v34 = vld [vmem:[%s11825_s10 + $0x150] sm:$0xff]  ;;  %v5656_v12 = vld [vmem:[%s11825_s10 + $0x158] sm:$0xff] }
 0x4ae   :  { %5336 = vmatpush1.bf16.msra.mxu1 %v7409_v42  ;;  %v7002_v46 = vpack.c.bf16 %v5656_v12, %v5655_v34 }
 0x4af   :  { %5337 = vmatprep.subr.bf16.mxu1 %v7414_v49  ;;  %6975 = vmatprep.subr.bf16.mxu0 %v6974_v3  ;;  %v5657_v3 = vld [vmem:[%s11825_s10 + $0x160] sm:$0xff] }
 0x4b2   :  { %5338 = vmatpush1.bf16.msra.mxu1 %v7412_v32 }
 0x4b3   :  { %5339 = vmatprep.subr.bf16.mxu1 %v7417_v63  ;;  %v5643_v63 = vld [vmem:[%s11825_s10 + $0xf0] sm:$0xff] }
 0x4b6   :  { %5340 = vmatpush1.bf16.msra.mxu1 %v7415_v16  ;;  %v5644_v16 = vld [vmem:[%s11825_s10 + $0xf8] sm:$0xff] }
 0x4b7   :  { %5341 = vmatprep.subr.bf16.mxu1 %v7420_v35  ;;  %v6982_v7 = vpack.c.bf16 %v5644_v16, %v5643_v63 }
 0x4ba   :  { %5342 = vmatpush1.bf16.msra.mxu1 %v7418_v4 }
 0x4bb   :  { %5343 = vmatprep.subr.bf16.mxu1 %v7423_v19  ;;  %v6987_v19 = vpack.c.bf16 %v5646_v8, %v5645_v58 }
 0x4be   :  { %5344 = vmatpush1.bf16.msra.mxu1 %v7421_v53  ;;  %v5650_v53 = vld [vmem:[%s11825_s10 + $0x128] sm:$0xff] }
 0x4bf   :  { %v6993_v43 = vpack.c.bf16 %v5650_v53, %v5649_v1 }
 0x4c1   :  { %5362 = vmatmul.mubr.bf16.vlgmr.msra.gmra.mrb[88].mxu1 %v11480_v50  ;;  %v6976_v50 = vpack.c.bf16 %v5624_v20, %v5623_v36  ;;  %v5658_v36 = vld [vmem:[%s11825_s10 + $0x168] sm:$0xff] }
 0x4c2   :  { %v7005_v20 = vpack.c.bf16 %v5658_v36, %v5657_v3 }
 0x4c3   :  { %6977 = vmatpush3.bf16.msra.mxu0 %v6976_v50  ;;  %v7008_v50 = vpack.c.bf16 %v5660_v29, %v5659_v55 }
 0x4c4   :  { %6979 = vmatprep.subr.bf16.mxu0 %v6978_v30 }
 0x4c7   :  { %6981 = vmatpush3.bf16.msra.mxu0 %v6980_v6 }
 0x4c8   :  { %6983 = vmatprep.subr.bf16.mxu0 %v6982_v7 }
 0x4ea   :  { %v6483_v31 = vpop.f32.mrb[132].mxu0 }
 0x4eb   :  { %v6484_v48 = vpop.f32.mrb[133].mxu0 }
 0x4ec   :  { %v6485_v25 = vadd.f32 %v6484_v48, %v6483_v31  ;;  %v6486_v0 = vpop.f32.mrb[134].mxu0  ;;  %v6341_v31 = vld [vmem:[%s11826_s11] ss:$0 sm:$0xff] }
 0x4ed   :  { %v6487_v56 = vpop.f32.mrb[135].mxu0 }
 0x4ee   :  { %v5525_v47 = vadd.f32 %v6485_v25, %v11626_v54  ;;  %v5628_v54 = vld [vmem:[%s11825_s10 + $0x78] sm:$0xff] }
 0x4ef   :  { %v6984_v5 = vpack.c.bf16 %v5628_v54, %v5627_v21 }
 0x4f1   :  { %6985 = vmatpush3.bf16.msra.mxu0 %v6984_v5 }
 0x4f2   :  { %6986 = vmatprep.subr.bf16.mxu0 %v8198_v51 }
 0x50c   :  { %v6505_v42 = vpop.f32.mrb[136].mxu0 }
 0x50d   :  { %v6506_v37 = vpop.f32.mrb[137].mxu0 }
 0x50e   :  { %v6507_v9 = vadd.f32 %v6506_v37, %v6505_v42  ;;  %v6508_v49 = vpop.f32.mrb[138].mxu0 }
 0x50f   :  { %v6509_v17 = vpop.f32.mrb[139].mxu0 }
 0x510   :  { %v5565_v32 = vadd.f32 %v6507_v9, %v5525_v47 }
 0x52c   :  { %v5604_v22 = vpop.f32.mrb[140].mxu0 }
 0x52d   :  { %v5605_v18 = vadd.f32 %v5604_v22, %v5565_v32  ;;  %v6701_v15 = vpop.f32.mrb[141].mxu0 }
 0x52e   :  { %v5607_v13 = vpop.f32.mrb[142].mxu0 }
 0x52f   :  { %v6702_v24 = vpop.f32.mrb[143].mxu0  ;;  %v5612_v30 = vmax.f32 %v5605_v18, 0.0 }
 0x594   :  { %v5363_v35 = vpop.f32.mrb[88].mxu1 }
 0x595   :  { %v7014_v57 = vadd.f32 %v5363_v35, %v3704_v10  ;;  %v5365_v39 = vpop.f32.mrb[89].mxu1 }
 0x596   :  { %v7015_v44 = vadd.f32 %v5365_v39, %v3708_v45  ;;  %v5367_v4 = vpop.f32.mrb[90].mxu1 }
 0x597   :  { %v5368_v52 = vpop.f32.mrb[91].mxu1  ;;  %v5610_v27 = vmax.f32 %v7014_v57, 0.0 }
 0x598   :  { %v5611_v23 = vmax.f32 %v7015_v44, 0.0 }
 0x59a   :  { %5732 = vmatprep.mubr.f32.mxu0 %v5611_v23 }
 0x59b   :  { %5733 = vmatmul.mubr.f32.vlgmr.msra.gmra.mrb[118].mxu0 %v5610_v27 }
 0x59c   :  { %6988 = vmatpush3.bf16.msra.mxu0 %v6987_v19  ;;  %6735 = vmatprep.mubr.msk.f32.mxu0 %vm8199_vm1, %v12183_v59  ;;  %v5652_v59 = vld [vmem:[%s11825_s10 + $0x138] sm:$0xff] }
 0x59d   :  { %6989 = vmatprep.subr.bf16.mxu0 %v8198_v51  ;;  %v6996_v40 = vpack.c.bf16 %v5652_v59, %v5651_v11 }
 0x5a0   :  { %6991 = vmatpush3.bf16.msra.mxu0 %v6990_v28 }
 0x5a1   :  { %6992 = vmatprep.subr.bf16.mxu0 %v8198_v51 }
 0x5a4   :  { %6994 = vmatpush3.bf16.msra.mxu0 %v6993_v43 }
 0x5a5   :  { %6995 = vmatprep.subr.bf16.mxu0 %v8198_v51 }
 0x5a8   :  { %6997 = vmatpush3.bf16.msra.mxu0 %v6996_v40 }
 0x5a9   :  { %6998 = vmatprep.subr.bf16.mxu0 %v8198_v51 }
 0x5ac   :  { %7000 = vmatpush3.bf16.msra.mxu0 %v6999_v60 }
 0x5ad   :  { %7001 = vmatprep.subr.bf16.mxu0 %v8198_v51 }
 0x5b0   :  { %7003 = vmatpush3.bf16.msra.mxu0 %v7002_v46 }
 0x5b1   :  { %7004 = vmatprep.subr.bf16.mxu0 %v8198_v51 }
 0x5b4   :  { %7006 = vmatpush3.bf16.msra.mxu0 %v7005_v20 }
 0x5b5   :  { %7007 = vmatprep.subr.bf16.mxu0 %v8198_v51 }
 0x5b8   :  { %7009 = vmatpush3.bf16.msra.mxu0 %v7008_v50 }
 0x5bb   :  { %6736 = vmatmul.mubr.f32.vlgmr.msra.gmra.mrb[144].mxu0 %v5612_v30 }
 0x66e   :  { %v6552_v62 = vpop.f32.mrb[118].mxu0 }
 0x66f   :  { %v6553_v41 = vpop.f32.mrb[119].mxu0 }
 0x670   :  { %v6554_v6 = vadd.f32 %v6553_v41, %v6552_v62 }
 0x672   :  { %v5735_v48 = vadd.f32 %v6554_v6, %v6341_v31 }
 0x68e   :  { %v5804_v25 = vpop.f32.mrb[144].mxu0 }
 0x68f   :  { %v5805_v0 = vadd.f32 %v5804_v25, %v5735_v48  ;;  %v6737_v56 = vpop.f32.mrb[145].mxu0 }
 0x691   :  { %5808 = vst [vmem:[%s11827_s12] sm:$0x3] %v5805_v0 }

</bundles_post_ra>
